<compile_context>
chip_gen: v5e
topology: v5e:2x2
jax: 0.10.0
libtpu: 0.0.40
codegen_flags: <defaults>
</compile_context>

<pallas_src>
import functools
import math

import numpy as np
import jax
import jax.numpy as jnp
from jax import lax
from jax.experimental import pallas as pl
from jax.experimental.pallas import tpu as pltpu


# ----------------------------------------------------------------------------
# In-kernel math helpers (exp / reciprocal only -> guaranteed Mosaic lowering)
# ----------------------------------------------------------------------------

def _erf_approx(x):
    # Abramowitz & Stegun 7.1.26, |err| <= 1.5e-7.  The divide goes through
    # the EUP reciprocal so it stays off the VALU.
    a1, a2, a3, a4, a5 = (0.254829592, -0.284496736, 1.421413741,
                          -1.453152027, 1.061405429)
    p = 0.3275911
    s = jnp.where(x >= 0.0, 1.0, -1.0)
    a = jnp.abs(x)
    t = pl.reciprocal(1.0 + p * a, approx=True)
    poly = t * (a1 + t * (a2 + t * (a3 + t * (a4 + t * a5))))
    return s * (1.0 - poly * jnp.exp(-a * a))


def _gelu_exact(x):
    # erf-based GELU (matches torch.nn.GELU() default), computed in f32.
    return 0.5 * x * (1.0 + _erf_approx(x * 0.7071067811865476))


def _apply_activation(x, activation):
    if activation == "gelu":
        return _gelu_exact(x)
    if activation == "sigmoid":
        return jax.nn.sigmoid(x)
    return x


# ----------------------------------------------------------------------------
# Tile selection
# ----------------------------------------------------------------------------

_TM, _TN, _TK = 512, 512, 512


def _row_tile(m):
    return m if m <= _TM else _TM


def _col_tile(n):
    return n if n <= _TN else _TN


def _k_plan(k):
    """Return (tk, padded_k).  K is padded (with zeros) rather than ever
    falling back to a whole-K VMEM tile."""
    if k <= _TK:
        return k, k
    for t in range(_TK, 127, -128):
        if k % t == 0:
            return t, k
    kp = pl.cdiv(k, _TK) * _TK
    return _TK, kp


def _head_block(bh, s_pad, need_attn, max_block=8):
    """VMEM-aware head block: ~live (hb,S,S) f32 intermediates must fit the
    scoped budget; also keep the parallel grid >=2 steps (v7x megacore)."""
    budget = 20 * 1024 * 1024
    live = 10 if need_attn else 8
    per_head = max(live * s_pad * s_pad * 4, 1)
    cap = max(1, budget // per_head)
    cap = min(cap, max_block, bh)
    if bh >= 2:
        cap = max(1, min(cap, bh // 2))
    for cand in range(cap, 0, -1):
        if bh % cand == 0:
            return cand
    return 1


# ----------------------------------------------------------------------------
# Tiled dense (+ optional fused activation epilogue); bf16 I/O, f32 accumulate
# ----------------------------------------------------------------------------

def _dense_kernel(x_ref, w_ref, b_ref, o_ref, acc_ref, *, nk, activation):
    k = pl.program_id(2)

    @pl.when(k == 0)
    def _init():
        acc_ref[...] = jnp.zeros_like(acc_ref)

    acc_ref[...] += jnp.dot(x_ref[...], w_ref[...],
                            preferred_element_type=jnp.float32)

    @pl.when(k == nk - 1)
    def _fin():
        out = _apply_activation(acc_ref[...] + b_ref[...], activation)
        o_ref[...] = out.astype(o_ref.dtype)


def dense(x, w, b, activation=None, out_dtype=jnp.bfloat16):
    M, K = x.shape
    N = w.shape[1]
    tm, tn = _row_tile(M), _col_tile(N)
    tk, kp = _k_plan(K)
    if kp != K:
        x = jnp.pad(x, ((0, 0), (0, kp - K)))
        w = jnp.pad(w, ((0, kp - K), (0, 0)))
    nk = kp // tk
    kern = functools.partial(_dense_kernel, nk=nk, activation=activation)
    return pl.pallas_call(
        kern,
        grid=(pl.cdiv(M, tm), pl.cdiv(N, tn), nk),
        in_specs=[
            pl.BlockSpec((tm, tk), lambda i, j, k: (i, k)),
            pl.BlockSpec((tk, tn), lambda i, j, k: (k, j)),
            pl.BlockSpec((1, tn), lambda i, j, k: (0, j)),
        ],
        out_specs=pl.BlockSpec((tm, tn), lambda i, j, k: (i, j)),
        out_shape=jax.ShapeDtypeStruct((M, N), out_dtype),
        scratch_shapes=[pltpu.VMEM((tm, tn), jnp.float32)],
        compiler_params=pltpu.CompilerParams(
            dimension_semantics=("parallel", "parallel", "arbitrary")),
    )(x, w, b.reshape(1, N))


# ----------------------------------------------------------------------------
# Fused: tiled matmul + bias + residual + LayerNorm (eps=1e-5, biased var)
# ----------------------------------------------------------------------------

def _dense_add_ln_kernel(x_ref, w_ref, b_ref, r_ref, g_ref, bt_ref, o_ref,
                         acc_ref, *, nk):
    k = pl.program_id(1)

    @pl.when(k == 0)
    def _init():
        acc_ref[...] = jnp.zeros_like(acc_ref)

    acc_ref[...] += jnp.dot(x_ref[...], w_ref[...],
                            preferred_element_type=jnp.float32)

    @pl.when(k == nk - 1)
    def _fin():
        h = acc_ref[...] + b_ref[...] + r_ref[...].astype(jnp.float32)
        mean = jnp.mean(h, axis=-1, keepdims=True)
        var = jnp.mean((h - mean) ** 2, axis=-1, keepdims=True)
        y = (h - mean) * lax.rsqrt(var + 1e-5) * g_ref[...] + bt_ref[...]
        o_ref[...] = y.astype(o_ref.dtype)


def dense_add_ln(x, w, b, res, gamma, beta, out_dtype=jnp.bfloat16):
    M, K = x.shape
    N = w.shape[1]                 # LayerNorm needs the full feature row
    tm = _row_tile(M)
    tk, kp = _k_plan(K)
    if kp != K:
        x = jnp.pad(x, ((0, 0), (0, kp - K)))
        w = jnp.pad(w, ((0, kp - K), (0, 0)))
    nk = kp // tk
    kern = functools.partial(_dense_add_ln_kernel, nk=nk)
    return pl.pallas_call(
        kern,
        grid=(pl.cdiv(M, tm), nk),
        in_specs=[
            pl.BlockSpec((tm, tk), lambda i, k: (i, k)),
            pl.BlockSpec((tk, N), lambda i, k: (k, 0)),
            pl.BlockSpec((1, N), lambda i, k: (0, 0)),
            pl.BlockSpec((tm, N), lambda i, k: (i, 0)),
            pl.BlockSpec((1, N), lambda i, k: (0, 0)),
            pl.BlockSpec((1, N), lambda i, k: (0, 0)),
        ],
        out_specs=pl.BlockSpec((tm, N), lambda i, k: (i, 0)),
        out_shape=jax.ShapeDtypeStruct((M, N), out_dtype),
        scratch_shapes=[pltpu.VMEM((tm, N), jnp.float32)],
        compiler_params=pltpu.CompilerParams(
            dimension_semantics=("parallel", "arbitrary")),
    )(x, w, b.reshape(1, N), res, gamma.reshape(1, N), beta.reshape(1, N))


# ----------------------------------------------------------------------------
# AKT-style "individual attention" (blocked over heads; optional attn output)
# ----------------------------------------------------------------------------

def _attention_kernel(g_ref, q_ref, k_ref, v_ref, bias_ref, mult_ref, cum_ref,
                      pos_ref, *out_refs, hb, d_k, need_attn):
    if need_attn:
        o_ref, attn_ref = out_refs
    else:
        (o_ref,) = out_refs

    q = q_ref[...]                                # (hb, S, Dk) bf16
    k = k_ref[...]
    v = v_ref[...]
    bias = bias_ref[...][None]                    # (1, S, S) additive mask
    mult = mult_ref[...][None]                    # (1, S, S) {0,1}
    pos = pos_ref[...][None]                      # (1, S, S) |i-j|
    scale = 1.0 / math.sqrt(d_k)

    scores = jnp.einsum("bqd,bkd->bqk", q, k,
                        preferred_element_type=jnp.float32) * scale

    # first softmax (torch no_grad branch); additive -1e32 mask bias
    s1 = scores + bias
    m1 = jnp.max(s1, axis=-1, keepdims=True)
    e1 = jnp.exp(s1 - m1)
    sm = e1 * pl.reciprocal(jnp.sum(e1, axis=-1, keepdims=True), approx=True)
    sm = sm * mult

    # cumsum along the last axis via matmul with a precomputed upper-tri matrix
    S = sm.shape[-1]
    distcum = jnp.dot(sm.astype(jnp.bfloat16).reshape(hb * S, S), cum_ref[...],
                      preferred_element_type=jnp.float32).reshape(hb, S, S)
    disttotal = jnp.sum(sm, axis=-1, keepdims=True)
    dist_scores = jnp.sqrt(jnp.maximum((disttotal - distcum) * pos, 0.0))

    # per-head gamma (already -softplus) read from SMEM
    h0 = pl.program_id(0) * hb
    hidx = lax.broadcasted_iota(jnp.int32, (hb, 1, 1), 0)
    gvec = jnp.full((hb, 1, 1), g_ref[h0], jnp.float32)
    for j in range(1, hb):
        gvec = jnp.where(hidx == j, g_ref[h0 + j], gvec)

    total_effect = jnp.clip(jnp.exp(dist_scores * gvec), 1e-5, 1e5)

    s2 = scores * total_effect + bias
    m2 = jnp.max(s2, axis=-1, keepdims=True)
    e2 = jnp.exp(s2 - m2)
    attn = e2 * pl.reciprocal(jnp.sum(e2, axis=-1, keepdims=True), approx=True)

    out = jnp.einsum("bqk,bkd->bqd", attn.astype(jnp.bfloat16), v,
                     preferred_element_type=jnp.float32)
    o_ref[...] = out.astype(o_ref.dtype)
    if need_attn:
        attn_ref[...] = attn


def individual_attention(qh, kh, vh, consts, gamma_bh, d_k, need_attn):
    """qh/kh/vh: (B*H, S, Dk) bf16; consts built at S_pad; gamma_bh: (B*H,) f32
    holding -softplus(gamma_head)."""
    bias, mult, cum, pos = consts
    BH, S, Dk = qh.shape
    Sp = bias.shape[0]
    if Sp != S:                      # pad seq to a multiple of 8 (lane/sublane)
        pad = Sp - S
        qh = jnp.pad(qh, ((0, 0), (0, pad), (0, 0)))
        kh = jnp.pad(kh, ((0, 0), (0, pad), (0, 0)))
        vh = jnp.pad(vh, ((0, 0), (0, pad), (0, 0)))

    hb = _head_block(BH, Sp, need_attn)
    kern = functools.partial(_attention_kernel, hb=hb, d_k=d_k,
                             need_attn=need_attn)

    in_specs = [
        pl.BlockSpec(memory_space=pltpu.MemorySpace.SMEM),    # gamma (BH,)
        pl.BlockSpec((hb, Sp, Dk), lambda i: (i, 0, 0)),      # q
        pl.BlockSpec((hb, Sp, Dk), lambda i: (i, 0, 0)),      # k
        pl.BlockSpec((hb, Sp, Dk), lambda i: (i, 0, 0)),      # v
        pl.BlockSpec((Sp, Sp), lambda i: (0, 0)),             # additive bias
        pl.BlockSpec((Sp, Sp), lambda i: (0, 0)),             # mult mask
        pl.BlockSpec((Sp, Sp), lambda i: (0, 0)),             # cumsum (bf16)
        pl.BlockSpec((Sp, Sp), lambda i: (0, 0)),             # |i-j|
    ]
    if need_attn:
        out_specs = [pl.BlockSpec((hb, Sp, Dk), lambda i: (i, 0, 0)),
                     pl.BlockSpec((hb, Sp, Sp), lambda i: (i, 0, 0))]
        out_shape = [jax.ShapeDtypeStruct((BH, Sp, Dk), jnp.bfloat16),
                     jax.ShapeDtypeStruct((BH, Sp, Sp), jnp.float32)]
    else:
        out_specs = pl.BlockSpec((hb, Sp, Dk), lambda i: (i, 0, 0))
        out_shape = jax.ShapeDtypeStruct((BH, Sp, Dk), jnp.bfloat16)

    res = pl.pallas_call(
        kern,
        grid=(BH // hb,),
        in_specs=in_specs,
        out_specs=out_specs,
        out_shape=out_shape,
        compiler_params=pltpu.CompilerParams(
            dimension_semantics=("parallel",)),
    )(gamma_bh, qh, kh, vh, bias, mult, cum, pos)

    if need_attn:
        o, attn = res
    else:
        o, attn = res, None
    if Sp != S:
        o = o[:, :S, :]
        if attn is not None:
            attn = attn[:, :S, :S]
    return o, attn


# ----------------------------------------------------------------------------
# Fused output head: Linear -> GELU -> Linear -> GELU -> Linear(->1) -> sigmoid
# ----------------------------------------------------------------------------

def _out_head_kernel(x_ref, w1_ref, b1_ref, w2_ref, b2_ref, w3_ref, b3_ref,
                     o_ref):
    h = jnp.dot(x_ref[...], w1_ref[...],
                preferred_element_type=jnp.float32) + b1_ref[...]
    h = _gelu_exact(h).astype(jnp.bfloat16)
    h = jnp.dot(h, w2_ref[...],
                preferred_element_type=jnp.float32) + b2_ref[...]
    h = _gelu_exact(h)
    # final (F2 -> 1) projection: VPU multiply + lane reduce (an MXU matmul
    # would use 1 live lane), fused with the sigmoid.
    logit = jnp.sum(h * w3_ref[...], axis=-1, keepdims=True) + b3_ref[...]
    o_ref[...] = jax.nn.sigmoid(logit)


def output_head(x, op):
    M, K = x.shape
    F1 = op["Wout1"].shape[1]
    F2 = op["Wout2"].shape[1]
    tm = _row_tile(M)
    return pl.pallas_call(
        _out_head_kernel,
        grid=(pl.cdiv(M, tm),),
        in_specs=[
            pl.BlockSpec((tm, K), lambda i: (i, 0)),
            pl.BlockSpec((K, F1), lambda i: (0, 0)),
            pl.BlockSpec((1, F1), lambda i: (0, 0)),
            pl.BlockSpec((F1, F2), lambda i: (0, 0)),
            pl.BlockSpec((1, F2), lambda i: (0, 0)),
            pl.BlockSpec((1, F2), lambda i: (0, 0)),
            pl.BlockSpec((1, 1), lambda i: (0, 0)),
        ],
        out_specs=pl.BlockSpec((tm, 1), lambda i: (i, 0)),
        out_shape=jax.ShapeDtypeStruct((M, 1), jnp.float32),
        compiler_params=pltpu.CompilerParams(
            dimension_semantics=("parallel",)),
    )(x, op["Wout1"], op["bout1"].reshape(1, F1),
      op["Wout2"], op["bout2"].reshape(1, F2),
      op["Wout3"].reshape(1, F2), op["bout3"].reshape(1, 1))


# ----------------------------------------------------------------------------
# Model glue (plain JAX)
# ----------------------------------------------------------------------------

def build_attention_constants(seq_len, mask_type, s_pad):
    row = np.arange(s_pad)[:, None]
    col = np.arange(s_pad)[None, :]
    if mask_type == 1:            # causal incl. diagonal (encoders)
        m = col <= row
    elif mask_type == 0:          # strictly past (knowledge retriever)
        m = col < row
    else:                         # bert-style, all visible
        m = np.ones((s_pad, s_pad), dtype=bool)
    m = m & (col < seq_len)       # padded key columns are never attended
    bias = np.where(m, 0.0, -1e32).astype(np.float32)   # additive mask
    mult = m.astype(np.float32)
    cum = (row <= col).astype(np.float32)  # sm @ cum == cumsum(sm, axis=-1)
    pos = np.abs(col - row).astype(np.float32)
    # NOTE: with mask_type=0 the first row is fully masked; like the PyTorch
    # reference this yields uniform attention for that row (over S_pad when
    # padding is active — only that degenerate row differs).
    return (jnp.asarray(bias), jnp.asarray(mult),
            jnp.asarray(cum, jnp.bfloat16), jnp.asarray(pos))


def transformer_layer(p, consts, query, values, n_heads, need_attn):
    """CL4KTTransformerLayer forward (apply_pos=True, eval mode, kq_same).
    Every CL4KT call site uses key == query, so q/k projections coincide."""
    B, S, d = query.shape
    Dk = d // n_heads
    M = B * S
    xq = query.reshape(M, d)

    if values is query:
        # self-attention: Wk|Wv pre-concatenated into a single (d, 2d) matmul
        kv = dense(xq, p["Wkv"], p["bkv"])                 # (M, 2d) bf16
        k2, v2 = kv[:, :d], kv[:, d:]
    else:
        k2 = dense(xq, p["Wk"], p["bk"])
        v2 = dense(values.reshape(M, d), p["Wv"], p["bv"])

    def to_heads(t):   # (M, d) -> (B*H, S, Dk)
        return t.reshape(B, S, n_heads, Dk).transpose(0, 2, 1, 3).reshape(
            B * n_heads, S, Dk)

    qh = to_heads(k2)       # q == k projection (kq_same, key == query)
    vh = to_heads(v2)

    gamma_bh = jnp.tile(-jax.nn.softplus(p["gammas"]), B)  # (B*H,) f32

    out_h, attn = individual_attention(qh, qh, vh, consts, gamma_bh, Dk,
                                       need_attn)

    concat = out_h.reshape(B, n_heads, S, Dk).transpose(0, 2, 1, 3).reshape(M, d)

    # fused: out_proj matmul + residual + LayerNorm1
    x = dense_add_ln(concat, p["Wo"], p["bo"], xq, p["ln1_g"], p["ln1_b"])
    # FFN: linear1 with fused GELU, then fused linear2 + residual + LayerNorm2
    h = dense(x, p["W1"], p["b1"], activation="gelu")
    x = dense_add_ln(h, p["W2"], p["b2"], x, p["ln2_g"], p["ln2_b"])

    if attn is not None:
        attn = attn.reshape(B, n_heads, S, S)
    return x.reshape(B, S, d), attn


def cl4kt_forward(params, q, r, cfg):
    """Inference-mode CL4KT.forward."""
    B, S = q.shape
    num_skills = cfg["num_skills"]
    H = cfg["num_heads"]
    d = cfg["hidden_size"]

    q_embed = jnp.take(params["question_embed"], q, axis=0)          # bf16
    masked_r = r * (r > -1).astype(r.dtype)
    interactions = q + num_skills * masked_r
    i_embed = jnp.take(params["interaction_embed"], interactions, axis=0)

    s_pad = ((S + 7) // 8) * 8
    consts1 = build_attention_constants(S, 1, s_pad)   # encoders
    consts0 = build_attention_constants(S, 0, s_pad)   # knowledge retriever

    x = q_embed
    for lp in params["question_encoder"]:
        x, _ = transformer_layer(lp, consts1, x, x, H, need_attn=False)

    y = i_embed
    for lp in params["interaction_encoder"]:
        y, _ = transformer_layer(lp, consts1, y, y, H, need_attn=False)

    attn = None
    n_kr = len(params["knowledge_retriever"])
    for li, lp in enumerate(params["knowledge_retriever"]):
        x, a = transformer_layer(lp, consts0, x, y, H,
                                 need_attn=(li == n_kr - 1))
        if a is not None:
            attn = a

    retrieved = jnp.concatenate([x, q_embed], axis=-1).reshape(B * S, 2 * d)
    pred = output_head(retrieved, params["out"]).reshape(B, S)

    return {
        "pred": pred[:, 1:],
        "true": r[:, 1:].astype(jnp.float32),
        "attn": attn,
        "question": q[:, 1:],
        "x": x.astype(jnp.float32),
    }


# ----------------------------------------------------------------------------
# Deterministic parameter init (weights pre-cast to bf16; biases/LN f32)
# ----------------------------------------------------------------------------

def xavier_uniform(key, shape, dtype=jnp.float32):
    fan_in, fan_out = shape[0], shape[-1]
    limit = float(np.sqrt(6.0 / (fan_in + fan_out)))
    return jax.random.uniform(key, shape, jnp.float32, -limit, limit).astype(dtype)


def init_layer_params(key, d, n_heads, d_ff):
    ks = jax.random.split(key, 8)
    Wk = xavier_uniform(ks[0], (d, d), jnp.bfloat16)
    Wv = xavier_uniform(ks[1], (d, d), jnp.bfloat16)
    bk = jnp.zeros((d,), jnp.float32)
    bv = jnp.zeros((d,), jnp.float32)
    return {
        "Wk": Wk, "bk": bk, "Wv": Wv, "bv": bv,
        "Wkv": jnp.concatenate([Wk, Wv], axis=1),
        "bkv": jnp.concatenate([bk, bv], axis=0),
        "Wo": xavier_uniform(ks[2], (d, d), jnp.bfloat16),
        "bo": jnp.zeros((d,), jnp.float32),
        "gammas": 0.1 * jax.random.normal(ks[3], (n_heads,), jnp.float32),
        "ln1_g": jnp.ones((d,), jnp.float32),
        "ln1_b": jnp.zeros((d,), jnp.float32),
        "W1": xavier_uniform(ks[4], (d, d_ff), jnp.bfloat16),
        "b1": jnp.zeros((d_ff,), jnp.float32),
        "W2": xavier_uniform(ks[5], (d_ff, d), jnp.bfloat16),
        "b2": jnp.zeros((d,), jnp.float32),
        "ln2_g": jnp.ones((d,), jnp.float32),
        "ln2_b": jnp.zeros((d,), jnp.float32),
    }


def init_params(key, cfg):
    num_skills = cfg["num_skills"]
    d = cfg["hidden_size"]
    H = cfg["num_heads"]
    d_ff = cfg["d_ff"]
    n_blocks = cfg["n_blocks"]
    final_fc = cfg["final_fc_dim"]

    keys = jax.random.split(key, 16)

    q_emb = jax.random.normal(keys[0], (num_skills + 2, d), jnp.float32)
    q_emb = q_emb.at[0].set(0.0).astype(jnp.bfloat16)        # padding_idx=0
    i_emb = jax.random.normal(keys[1], (2 * (num_skills + 2), d), jnp.float32)
    i_emb = i_emb.at[0].set(0.0).astype(jnp.bfloat16)

    def stack(base_key):
        ks = jax.random.split(base_key, n_blocks)
        return [init_layer_params(k, d, H, d_ff) for k in ks]

    out_params = {
        "Wout1": xavier_uniform(keys[5], (2 * d, final_fc), jnp.bfloat16),
        "bout1": jnp.zeros((final_fc,), jnp.float32),
        "Wout2": xavier_uniform(keys[6], (final_fc, final_fc // 2), jnp.bfloat16),
        "bout2": jnp.zeros((final_fc // 2,), jnp.float32),
        "Wout3": xavier_uniform(keys[7], (final_fc // 2, 1), jnp.float32),
        "bout3": jnp.zeros((1,), jnp.float32),
    }

    return {
        "question_embed": q_emb,
        "interaction_embed": i_emb,
        "question_encoder": stack(keys[2]),
        "interaction_encoder": stack(keys[3]),
        "knowledge_retriever": stack(keys[4]),
        "out": out_params,
    }


# ----------------------------------------------------------------------------
# Main
# ----------------------------------------------------------------------------

if __name__ == "__main__":
    cfg = {
        "num_skills": 10,
        "num_questions": 10,
        "seq_len": 8,
        "hidden_size": 32,
        "n_blocks": 1,
        "num_heads": 2,
        "d_ff": 64,
        "final_fc_dim": 512,
    }
    B, S = 2, cfg["seq_len"]

    root = jax.random.PRNGKey(0)
    k_params, k_q, k_r = jax.random.split(root, 3)

    params = init_params(k_params, cfg)

    q = jax.random.randint(k_q, (B, S), 1, cfg["num_skills"] + 2, dtype=jnp.int32)
    r = jax.random.randint(k_r, (B, S), 0, 2, dtype=jnp.int32)

    fwd = jax.jit(functools.partial(cl4kt_forward, cfg=cfg))
    out = fwd(params, q, r)
    jax.block_until_ready(out["pred"])

    assert out["pred"].shape == (B, S - 1)
    assert out["attn"].shape == (B, cfg["num_heads"], S, S)
    assert out["x"].shape == (B, S, cfg["hidden_size"])
    assert bool(jnp.all(jnp.isfinite(out["pred"])))
    assert bool(jnp.all(jnp.isfinite(out["attn"])))

    print("KERNEL_OK")
</pallas_src>

<mosaic_0001>
module attributes {stable_mosaic.version = 11 : i64} {
  func.func @_dense_kernel(%arg0: i32, %arg1: i32, %arg2: i32, %arg3: memref<16x32xbf16, #tpu.memory_space<vmem>>, %arg4: memref<32x64xbf16, #tpu.memory_space<vmem>>, %arg5: memref<1x64xf32, #tpu.memory_space<vmem>>, %arg6: memref<16x64xbf16, #tpu.memory_space<vmem>>, %arg7: memref<16x64xf32, #tpu.memory_space<vmem>>) attributes {dimension_semantics = [#tpu.dimension_semantics<parallel>, #tpu.dimension_semantics<parallel>, #tpu.dimension_semantics<arbitrary>], iteration_bounds = array<i64: 1, 1, 1>, scalar_prefetch = 0 : i64, scratch_operands = 1 : i64, tpu.core_type = #tpu.core_type<tc>, window_params = [{transform_indices = @transform_0, window_bounds = array<i64: 16, 32>}, {transform_indices = @transform_1, window_bounds = array<i64: 32, 64>}, {transform_indices = @transform_2, window_bounds = array<i64: 1, 64>}, {transform_indices = @transform_3, window_bounds = array<i64: 16, 64>}]} {
    %c0_i32 = arith.constant 0 : i32
    %0 = arith.cmpi eq, %arg2, %c0_i32 : i32
    %1 = arith.extui %0 : i1 to i32
    %c0_i32_0 = arith.constant 0 : i32
    %2 = arith.cmpi ne, %1, %c0_i32_0 : i32
    scf.if %2 {
      %cst_10 = arith.constant 0.000000e+00 : f32
      %12 = vector.broadcast %cst_10 : f32 to vector<16x64xf32>
      %c0_11 = arith.constant 0 : index
      %c0_12 = arith.constant 0 : index
      %13 = vector.load %arg7[%c0_11, %c0_12] : memref<16x64xf32, #tpu.memory_space<vmem>>, vector<16x64xf32>
      tpu.vector_store %arg7[%c0_11, %c0_12], %12 {strides = array<i32>} : memref<16x64xf32, #tpu.memory_space<vmem>>, vector<16x64xf32>,
    } else {
    }
    %c0 = arith.constant 0 : index
    %c0_1 = arith.constant 0 : index
    %3 = vector.load %arg7[%c0, %c0_1] : memref<16x64xf32, #tpu.memory_space<vmem>>, vector<16x64xf32>
    %c0_2 = arith.constant 0 : index
    %c0_3 = arith.constant 0 : index
    %4 = vector.load %arg3[%c0_2, %c0_3] : memref<16x32xbf16, #tpu.memory_space<vmem>>, vector<16x32xbf16>
    %c0_4 = arith.constant 0 : index
    %c0_5 = arith.constant 0 : index
    %5 = vector.load %arg4[%c0_4, %c0_5] : memref<32x64xbf16, #tpu.memory_space<vmem>>, vector<32x64xbf16>
    %cst = arith.constant dense<0.000000e+00> : vector<16x64xf32>
    %6 = tpu.matmul %4, %5, %cst {dimension_numbers = #tpu.dot_dimension_numbers<[1], [0], [0], [1], [0, 0, 1, 1], [], []>} : vector<16x32xbf16>, vector<32x64xbf16>, vector<16x64xf32> -> vector<16x64xf32>
    %7 = arith.addf %3, %6 : vector<16x64xf32>
    %c0_6 = arith.constant 0 : index
    %c0_7 = arith.constant 0 : index
    %8 = vector.load %arg7[%c0_6, %c0_7] : memref<16x64xf32, #tpu.memory_space<vmem>>, vector<16x64xf32>
    tpu.vector_store %arg7[%c0_6, %c0_7], %7 {strides = array<i32>} : memref<16x64xf32, #tpu.memory_space<vmem>>, vector<16x64xf32>,
    %c0_i32_8 = arith.constant 0 : i32
    %9 = arith.cmpi eq, %arg2, %c0_i32_8 : i32
    %10 = arith.extui %9 : i1 to i32
    %c0_i32_9 = arith.constant 0 : i32
    %11 = arith.cmpi ne, %10, %c0_i32_9 : i32
    scf.if %11 {
      %c0_10 = arith.constant 0 : index
      %c0_11 = arith.constant 0 : index
      %12 = vector.load %arg7[%c0_10, %c0_11] : memref<16x64xf32, #tpu.memory_space<vmem>>, vector<16x64xf32>
      %c0_12 = arith.constant 0 : index
      %c0_13 = arith.constant 0 : index
      %13 = vector.load %arg5[%c0_12, %c0_13] : memref<1x64xf32, #tpu.memory_space<vmem>>, vector<1x64xf32>
      %14 = vector.broadcast %13 : vector<1x64xf32> to vector<16x64xf32>
      %15 = arith.addf %12, %14 : vector<16x64xf32>
      %16 = arith.truncf %15 : vector<16x64xf32> to vector<16x64xbf16>
      %c0_14 = arith.constant 0 : index
      %c0_15 = arith.constant 0 : index
      %17 = vector.load %arg6[%c0_14, %c0_15] : memref<16x64xbf16, #tpu.memory_space<vmem>>, vector<16x64xbf16>
      tpu.vector_store %arg6[%c0_14, %c0_15], %16 {strides = array<i32>} : memref<16x64xbf16, #tpu.memory_space<vmem>>, vector<16x64xbf16>,
    } else {
    }
    return
  }
  func.func @transform_0(%arg0: i32, %arg1: i32, %arg2: i32) -> (i32, i32) {
    %c0_i32 = arith.constant 0 : i32
    return %arg0, %arg2 : i32, i32
  }
  func.func @transform_1(%arg0: i32, %arg1: i32, %arg2: i32) -> (i32, i32) {
    %c0_i32 = arith.constant 0 : i32
    return %arg2, %arg1 : i32, i32
  }
  func.func @transform_2(%arg0: i32, %arg1: i32, %arg2: i32) -> (i32, i32) {
    %c0_i32 = arith.constant 0 : i32
    %c0_i32_0 = arith.constant 0 : i32
    return %c0_i32, %arg1 : i32, i32
  }
  func.func @transform_3(%arg0: i32, %arg1: i32, %arg2: i32) -> (i32, i32) {
    %c0_i32 = arith.constant 0 : i32
    return %arg0, %arg1 : i32, i32
  }
}

module attributes {stable_mosaic.version = 11 : i64} {
  func.func @_attention_kernel(%arg0: i32, %arg1: memref<4xf32, #tpu.memory_space<smem>>, %arg2: memref<2x8x16xbf16, #tpu.memory_space<vmem>>, %arg3: memref<2x8x16xbf16, #tpu.memory_space<vmem>>, %arg4: memref<2x8x16xbf16, #tpu.memory_space<vmem>>, %arg5: memref<8x8xf32, #tpu.memory_space<vmem>>, %arg6: memref<8x8xf32, #tpu.memory_space<vmem>>, %arg7: memref<8x8xbf16, #tpu.memory_space<vmem>>, %arg8: memref<8x8xf32, #tpu.memory_space<vmem>>, %arg9: memref<2x8x16xbf16, #tpu.memory_space<vmem>>) attributes {dimension_semantics = [#tpu.dimension_semantics<parallel>], iteration_bounds = array<i64: 2>, scalar_prefetch = 0 : i64, scratch_operands = 0 : i64, tpu.core_type = #tpu.core_type<tc>, window_params = [{transform_indices = @transform_0, window_bounds = array<i64: 4>}, {transform_indices = @transform_1, window_bounds = array<i64: 2, 8, 16>}, {transform_indices = @transform_2, window_bounds = array<i64: 2, 8, 16>}, {transform_indices = @transform_3, window_bounds = array<i64: 2, 8, 16>}, {pipeline_mode = #tpu.pipeline_mode<synchronous>, transform_indices = @transform_4, window_bounds = array<i64: 8, 8>}, {pipeline_mode = #tpu.pipeline_mode<synchronous>, transform_indices = @transform_5, window_bounds = array<i64: 8, 8>}, {pipeline_mode = #tpu.pipeline_mode<synchronous>, transform_indices = @transform_6, window_bounds = array<i64: 8, 8>}, {pipeline_mode = #tpu.pipeline_mode<synchronous>, transform_indices = @transform_7, window_bounds = array<i64: 8, 8>}, {transform_indices = @transform_8, window_bounds = array<i64: 2, 8, 16>}]} {
    %c0 = arith.constant 0 : index
    %c0_0 = arith.constant 0 : index
    %c0_1 = arith.constant 0 : index
    %0 = vector.load %arg2[%c0, %c0_0, %c0_1] : memref<2x8x16xbf16, #tpu.memory_space<vmem>>, vector<2x8x16xbf16>
    %c0_2 = arith.constant 0 : index
    %c0_3 = arith.constant 0 : index
    %c0_4 = arith.constant 0 : index
    %1 = vector.load %arg3[%c0_2, %c0_3, %c0_4] : memref<2x8x16xbf16, #tpu.memory_space<vmem>>, vector<2x8x16xbf16>
    %c0_5 = arith.constant 0 : index
    %c0_6 = arith.constant 0 : index
    %c0_7 = arith.constant 0 : index
    %2 = vector.load %arg4[%c0_5, %c0_6, %c0_7] : memref<2x8x16xbf16, #tpu.memory_space<vmem>>, vector<2x8x16xbf16>
    %c0_8 = arith.constant 0 : index
    %c0_9 = arith.constant 0 : index
    %3 = vector.load %arg5[%c0_8, %c0_9] : memref<8x8xf32, #tpu.memory_space<vmem>>, vector<8x8xf32>
    %4 = vector.shape_cast %3 : vector<8x8xf32> to vector<1x8x8xf32>
    %c0_10 = arith.constant 0 : index
    %c0_11 = arith.constant 0 : index
    %5 = vector.load %arg6[%c0_10, %c0_11] : memref<8x8xf32, #tpu.memory_space<vmem>>, vector<8x8xf32>
    %6 = vector.shape_cast %5 : vector<8x8xf32> to vector<1x8x8xf32>
    %c0_12 = arith.constant 0 : index
    %c0_13 = arith.constant 0 : index
    %7 = vector.load %arg8[%c0_12, %c0_13] : memref<8x8xf32, #tpu.memory_space<vmem>>, vector<8x8xf32>
    %8 = vector.shape_cast %7 : vector<8x8xf32> to vector<1x8x8xf32>
    "tpu.trace_start"() <{level = 10 : i32, message = "bqd,bkd->bqk"}> : () -> ()
    %cst = arith.constant dense<0.000000e+00> : vector<2x8x8xf32>
    %9 = tpu.matmul %0, %1, %cst {dimension_numbers = #tpu.dot_dimension_numbers<[2], [2], [1], [1], [0, 0, 0, 1, 1, 1], [0], [0]>} : vector<2x8x16xbf16>, vector<2x8x16xbf16>, vector<2x8x8xf32> -> vector<2x8x8xf32>
    "tpu.trace_stop"() : () -> ()
    %cst_14 = arith.constant 2.500000e-01 : f32
    %10 = vector.broadcast %cst_14 : f32 to vector<2x8x8xf32>
    %11 = arith.mulf %9, %10 : vector<2x8x8xf32>
    %12 = vector.broadcast %4 : vector<1x8x8xf32> to vector<2x8x8xf32>
    %13 = arith.addf %11, %12 : vector<2x8x8xf32>
    %cst_15 = arith.constant dense<0xFF800000> : vector<2x8xf32>
    %14 = vector.multi_reduction <maximumf>, %13, %cst_15 [2] : vector<2x8x8xf32> to vector<2x8xf32>
    %15 = vector.shape_cast %14 : vector<2x8xf32> to vector<2x8x1xf32>
    %16 = vector.broadcast %15 : vector<2x8x1xf32> to vector<2x8x8xf32>
    %17 = arith.subf %13, %16 : vector<2x8x8xf32>
    %18 = math.exp %17 : vector<2x8x8xf32>
    %cst_16 = arith.constant dense<0.000000e+00> : vector<2x8xf32>
    %19 = vector.multi_reduction <add>, %18, %cst_16 [2] : vector<2x8x8xf32> to vector<2x8xf32>
    %20 = vector.shape_cast %19 : vector<2x8xf32> to vector<2x8x1xf32>
    %21 = tpu.reciprocal %20 {approx = true} : vector<2x8x1xf32> -> vector<2x8x1xf32>
    %22 = vector.broadcast %21 : vector<2x8x1xf32> to vector<2x8x8xf32>
    %23 = arith.mulf %18, %22 : vector<2x8x8xf32>
    %24 = vector.broadcast %6 : vector<1x8x8xf32> to vector<2x8x8xf32>
    %25 = arith.mulf %23, %24 : vector<2x8x8xf32>
    %26 = arith.truncf %25 : vector<2x8x8xf32> to vector<2x8x8xbf16>
    %27 = vector.shape_cast %26 : vector<2x8x8xbf16> to vector<16x8xbf16>
    %c0_17 = arith.constant 0 : index
    %c0_18 = arith.constant 0 : index
    %28 = vector.load %arg7[%c0_17, %c0_18] : memref<8x8xbf16, #tpu.memory_space<vmem>>, vector<8x8xbf16>
    %cst_19 = arith.constant dense<0.000000e+00> : vector<16x8xf32>
    %29 = tpu.matmul %27, %28, %cst_19 {dimension_numbers = #tpu.dot_dimension_numbers<[1], [0], [0], [1], [0, 0, 1, 1], [], []>} : vector<16x8xbf16>, vector<8x8xbf16>, vector<16x8xf32> -> vector<16x8xf32>
    %30 = vector.shape_cast %29 : vector<16x8xf32> to vector<2x8x8xf32>
    %cst_20 = arith.constant dense<0.000000e+00> : vector<2x8xf32>
    %31 = vector.multi_reduction <add>, %25, %cst_20 [2] : vector<2x8x8xf32> to vector<2x8xf32>
    %32 = vector.shape_cast %31 : vector<2x8xf32> to vector<2x8x1xf32>
    %33 = vector.broadcast %32 : vector<2x8x1xf32> to vector<2x8x8xf32>
    %34 = arith.subf %33, %30 : vector<2x8x8xf32>
    %35 = vector.broadcast %8 : vector<1x8x8xf32> to vector<2x8x8xf32>
    %36 = arith.mulf %34, %35 : vector<2x8x8xf32>
    %cst_21 = arith.constant 0.000000e+00 : f32
    %37 = vector.broadcast %cst_21 : f32 to vector<2x8x8xf32>
    %38 = arith.maximumf %36, %37 : vector<2x8x8xf32>
    %39 = math.sqrt %38 : vector<2x8x8xf32>
    %c2_i32 = arith.constant 2 : i32
    %40 = arith.muli %arg0, %c2_i32 : i32
    %41 = tpu.iota {dimensions = array<i32: 0>} : vector<2x1x1xi32>
    %42 = arith.index_cast %40 : i32 to index
    %43 = memref.load %arg1[%42] : memref<4xf32, #tpu.memory_space<smem>>
    %44 = vector.broadcast %43 : f32 to vector<2x1x1xf32>
    %c1_i32 = arith.constant 1 : i32
    %45 = vector.broadcast %c1_i32 : i32 to vector<2x1x1xi32>
    %46 = arith.cmpi eq, %41, %45 : vector<2x1x1xi32>
    %c1_i32_22 = arith.constant 1 : i32
    %47 = arith.addi %40, %c1_i32_22 : i32
    %48 = arith.index_cast %47 : i32 to index
    %49 = memref.load %arg1[%48] : memref<4xf32, #tpu.memory_space<smem>>
    %50 = vector.broadcast %49 : f32 to vector<2x1x1xf32>
    %51 = arith.select %46, %50, %44 : vector<2x1x1xi1>, vector<2x1x1xf32>
    %52 = vector.broadcast %51 : vector<2x1x1xf32> to vector<2x8x8xf32>
    %53 = arith.mulf %39, %52 : vector<2x8x8xf32>
    %54 = math.exp %53 : vector<2x8x8xf32>
    %cst_23 = arith.constant 9.99999974E-6 : f32
    %cst_24 = arith.constant 1.000000e+05 : f32
    %55 = vector.broadcast %cst_23 : f32 to vector<2x8x8xf32>
    %56 = arith.maximumf %55, %54 : vector<2x8x8xf32>
    %57 = vector.broadcast %cst_24 : f32 to vector<2x8x8xf32>
    %58 = arith.minimumf %57, %56 : vector<2x8x8xf32>
    %59 = arith.mulf %11, %58 : vector<2x8x8xf32>
    %60 = vector.broadcast %4 : vector<1x8x8xf32> to vector<2x8x8xf32>
    %61 = arith.addf %59, %60 : vector<2x8x8xf32>
    %cst_25 = arith.constant dense<0xFF800000> : vector<2x8xf32>
    %62 = vector.multi_reduction <maximumf>, %61, %cst_25 [2] : vector<2x8x8xf32> to vector<2x8xf32>
    %63 = vector.shape_cast %62 : vector<2x8xf32> to vector<2x8x1xf32>
    %64 = vector.broadcast %63 : vector<2x8x1xf32> to vector<2x8x8xf32>
    %65 = arith.subf %61, %64 : vector<2x8x8xf32>
    %66 = math.exp %65 : vector<2x8x8xf32>
    %cst_26 = arith.constant dense<0.000000e+00> : vector<2x8xf32>
    %67 = vector.multi_reduction <add>, %66, %cst_26 [2] : vector<2x8x8xf32> to vector<2x8xf32>
    %68 = vector.shape_cast %67 : vector<2x8xf32> to vector<2x8x1xf32>
    %69 = tpu.reciprocal %68 {approx = true} : vector<2x8x1xf32> -> vector<2x8x1xf32>
    %70 = vector.broadcast %69 : vector<2x8x1xf32> to vector<2x8x8xf32>
    %71 = arith.mulf %66, %70 : vector<2x8x8xf32>
    %72 = arith.truncf %71 : vector<2x8x8xf32> to vector<2x8x8xbf16>
    "tpu.trace_start"() <{level = 10 : i32, message = "bqk,bkd->bqd"}> : () -> ()
    %cst_27 = arith.constant dense<0.000000e+00> : vector<2x8x16xf32>
    %73 = tpu.matmul %72, %2, %cst_27 {dimension_numbers = #tpu.dot_dimension_numbers<[2], [1], [1], [2], [0, 0, 0, 1, 1, 2], [0], [0]>} : vector<2x8x8xbf16>, vector<2x8x16xbf16>, vector<2x8x16xf32> -> vector<2x8x16xf32>
    "tpu.trace_stop"() : () -> ()
    %74 = arith.truncf %73 : vector<2x8x16xf32> to vector<2x8x16xbf16>
    %c0_28 = arith.constant 0 : index
    %c0_29 = arith.constant 0 : index
    %c0_30 = arith.constant 0 : index
    %75 = vector.load %arg9[%c0_28, %c0_29, %c0_30] : memref<2x8x16xbf16, #tpu.memory_space<vmem>>, vector<2x8x16xbf16>
    tpu.vector_store %arg9[%c0_28, %c0_29, %c0_30], %74 {strides = array<i32>} : memref<2x8x16xbf16, #tpu.memory_space<vmem>>, vector<2x8x16xbf16>,
    return
  }
  func.func @transform_0(%arg0: i32) -> i32 {
    %c0_i32 = arith.constant 0 : i32
    %c0_i32_0 = arith.constant 0 : i32
    return %c0_i32 : i32
  }
  func.func @transform_1(%arg0: i32) -> (i32, i32, i32) {
    %c0_i32 = arith.constant 0 : i32
    %c0_i32_0 = arith.constant 0 : i32
    %c0_i32_1 = arith.constant 0 : i32
    return %arg0, %c0_i32, %c0_i32_0 : i32, i32, i32
  }
  func.func @transform_2(%arg0: i32) -> (i32, i32, i32) {
    %c0_i32 = arith.constant 0 : i32
    %c0_i32_0 = arith.constant 0 : i32
    %c0_i32_1 = arith.constant 0 : i32
    return %arg0, %c0_i32, %c0_i32_0 : i32, i32, i32
  }
  func.func @transform_3(%arg0: i32) -> (i32, i32, i32) {
    %c0_i32 = arith.constant 0 : i32
    %c0_i32_0 = arith.constant 0 : i32
    %c0_i32_1 = arith.constant 0 : i32
    return %arg0, %c0_i32, %c0_i32_0 : i32, i32, i32
  }
  func.func @transform_4(%arg0: i32) -> (i32, i32) {
    %c0_i32 = arith.constant 0 : i32
    %c0_i32_0 = arith.constant 0 : i32
    %c0_i32_1 = arith.constant 0 : i32
    return %c0_i32, %c0_i32_0 : i32, i32
  }
  func.func @transform_5(%arg0: i32) -> (i32, i32) {
    %c0_i32 = arith.constant 0 : i32
    %c0_i32_0 = arith.constant 0 : i32
    %c0_i32_1 = arith.constant 0 : i32
    return %c0_i32, %c0_i32_0 : i32, i32
  }
  func.func @transform_6(%arg0: i32) -> (i32, i32) {
    %c0_i32 = arith.constant 0 : i32
    %c0_i32_0 = arith.constant 0 : i32
    %c0_i32_1 = arith.constant 0 : i32
    return %c0_i32, %c0_i32_0 : i32, i32
  }
  func.func @transform_7(%arg0: i32) -> (i32, i32) {
    %c0_i32 = arith.constant 0 : i32
    %c0_i32_0 = arith.constant 0 : i32
    %c0_i32_1 = arith.constant 0 : i32
    return %c0_i32, %c0_i32_0 : i32, i32
  }
  func.func @transform_8(%arg0: i32) -> (i32, i32, i32) {
    %c0_i32 = arith.constant 0 : i32
    %c0_i32_0 = arith.constant 0 : i32
    %c0_i32_1 = arith.constant 0 : i32
    return %arg0, %c0_i32, %c0_i32_0 : i32, i32, i32
  }
}

module attributes {stable_mosaic.version = 11 : i64} {
  func.func @_dense_kernel(%arg0: i32, %arg1: i32, %arg2: i32, %arg3: memref<16x32xbf16, #tpu.memory_space<vmem>>, %arg4: memref<32x64xbf16, #tpu.memory_space<vmem>>, %arg5: memref<1x64xf32, #tpu.memory_space<vmem>>, %arg6: memref<16x64xbf16, #tpu.memory_space<vmem>>, %arg7: memref<16x64xf32, #tpu.memory_space<vmem>>) attributes {dimension_semantics = [#tpu.dimension_semantics<parallel>, #tpu.dimension_semantics<parallel>, #tpu.dimension_semantics<arbitrary>], iteration_bounds = array<i64: 1, 1, 1>, scalar_prefetch = 0 : i64, scratch_operands = 1 : i64, tpu.core_type = #tpu.core_type<tc>, window_params = [{transform_indices = @transform_0, window_bounds = array<i64: 16, 32>}, {transform_indices = @transform_1, window_bounds = array<i64: 32, 64>}, {transform_indices = @transform_2, window_bounds = array<i64: 1, 64>}, {transform_indices = @transform_3, window_bounds = array<i64: 16, 64>}]} {
    %c0_i32 = arith.constant 0 : i32
    %0 = arith.cmpi eq, %arg2, %c0_i32 : i32
    %1 = arith.extui %0 : i1 to i32
    %c0_i32_0 = arith.constant 0 : i32
    %2 = arith.cmpi ne, %1, %c0_i32_0 : i32
    scf.if %2 {
      %cst_10 = arith.constant 0.000000e+00 : f32
      %12 = vector.broadcast %cst_10 : f32 to vector<16x64xf32>
      %c0_11 = arith.constant 0 : index
      %c0_12 = arith.constant 0 : index
      %13 = vector.load %arg7[%c0_11, %c0_12] : memref<16x64xf32, #tpu.memory_space<vmem>>, vector<16x64xf32>
      tpu.vector_store %arg7[%c0_11, %c0_12], %12 {strides = array<i32>} : memref<16x64xf32, #tpu.memory_space<vmem>>, vector<16x64xf32>,
    } else {
    }
    %c0 = arith.constant 0 : index
    %c0_1 = arith.constant 0 : index
    %3 = vector.load %arg7[%c0, %c0_1] : memref<16x64xf32, #tpu.memory_space<vmem>>, vector<16x64xf32>
    %c0_2 = arith.constant 0 : index
    %c0_3 = arith.constant 0 : index
    %4 = vector.load %arg3[%c0_2, %c0_3] : memref<16x32xbf16, #tpu.memory_space<vmem>>, vector<16x32xbf16>
    %c0_4 = arith.constant 0 : index
    %c0_5 = arith.constant 0 : index
    %5 = vector.load %arg4[%c0_4, %c0_5] : memref<32x64xbf16, #tpu.memory_space<vmem>>, vector<32x64xbf16>
    %cst = arith.constant dense<0.000000e+00> : vector<16x64xf32>
    %6 = tpu.matmul %4, %5, %cst {dimension_numbers = #tpu.dot_dimension_numbers<[1], [0], [0], [1], [0, 0, 1, 1], [], []>} : vector<16x32xbf16>, vector<32x64xbf16>, vector<16x64xf32> -> vector<16x64xf32>
    %7 = arith.addf %3, %6 : vector<16x64xf32>
    %c0_6 = arith.constant 0 : index
    %c0_7 = arith.constant 0 : index
    %8 = vector.load %arg7[%c0_6, %c0_7] : memref<16x64xf32, #tpu.memory_space<vmem>>, vector<16x64xf32>
    tpu.vector_store %arg7[%c0_6, %c0_7], %7 {strides = array<i32>} : memref<16x64xf32, #tpu.memory_space<vmem>>, vector<16x64xf32>,
    %c0_i32_8 = arith.constant 0 : i32
    %9 = arith.cmpi eq, %arg2, %c0_i32_8 : i32
    %10 = arith.extui %9 : i1 to i32
    %c0_i32_9 = arith.constant 0 : i32
    %11 = arith.cmpi ne, %10, %c0_i32_9 : i32
    scf.if %11 {
      %c0_10 = arith.constant 0 : index
      %c0_11 = arith.constant 0 : index
      %12 = vector.load %arg7[%c0_10, %c0_11] : memref<16x64xf32, #tpu.memory_space<vmem>>, vector<16x64xf32>
      %c0_12 = arith.constant 0 : index
      %c0_13 = arith.constant 0 : index
      %13 = vector.load %arg5[%c0_12, %c0_13] : memref<1x64xf32, #tpu.memory_space<vmem>>, vector<1x64xf32>
      %14 = vector.broadcast %13 : vector<1x64xf32> to vector<16x64xf32>
      %15 = arith.addf %12, %14 : vector<16x64xf32>
      %cst_14 = arith.constant 5.000000e-01 : f32
      %16 = vector.broadcast %cst_14 : f32 to vector<16x64xf32>
      %17 = arith.mulf %16, %15 : vector<16x64xf32>
      %cst_15 = arith.constant 0.707106769 : f32
      %18 = vector.broadcast %cst_15 : f32 to vector<16x64xf32>
      %19 = arith.mulf %15, %18 : vector<16x64xf32>
      %cst_16 = arith.constant 0.000000e+00 : f32
      %20 = vector.broadcast %cst_16 : f32 to vector<16x64xf32>
      %21 = arith.cmpf oge, %19, %20 : vector<16x64xf32>
      %cst_17 = arith.constant 1.000000e+00 : f32
      %cst_18 = arith.constant -1.000000e+00 : f32
      %22 = vector.broadcast %cst_17 : f32 to vector<16x64xf32>
      %23 = vector.broadcast %cst_18 : f32 to vector<16x64xf32>
      %24 = arith.select %21, %22, %23 : vector<16x64xi1>, vector<16x64xf32>
      %25 = math.absf %19 : vector<16x64xf32>
      %cst_19 = arith.constant 0.327591091 : f32
      %26 = vector.broadcast %cst_19 : f32 to vector<16x64xf32>
      %27 = arith.mulf %26, %25 : vector<16x64xf32>
      %cst_20 = arith.constant 1.000000e+00 : f32
      %28 = vector.broadcast %cst_20 : f32 to vector<16x64xf32>
      %29 = arith.addf %28, %27 : vector<16x64xf32>
      %30 = tpu.reciprocal %29 {approx = true} : vector<16x64xf32> -> vector<16x64xf32>
      %cst_21 = arith.constant 1.06140542 : f32
      %31 = vector.broadcast %cst_21 : f32 to vector<16x64xf32>
      %32 = arith.mulf %30, %31 : vector<16x64xf32>
      %cst_22 = arith.constant -1.45315206 : f32
      %33 = vector.broadcast %cst_22 : f32 to vector<16x64xf32>
      %34 = arith.addf %33, %32 : vector<16x64xf32>
      %35 = arith.mulf %30, %34 : vector<16x64xf32>
      %cst_23 = arith.constant 1.42141378 : f32
      %36 = vector.broadcast %cst_23 : f32 to vector<16x64xf32>
      %37 = arith.addf %36, %35 : vector<16x64xf32>
      %38 = arith.mulf %30, %37 : vector<16x64xf32>
      %cst_24 = arith.constant -0.284496725 : f32
      %39 = vector.broadcast %cst_24 : f32 to vector<16x64xf32>
      %40 = arith.addf %39, %38 : vector<16x64xf32>
      %41 = arith.mulf %30, %40 : vector<16x64xf32>
      %cst_25 = arith.constant 0.254829586 : f32
      %42 = vector.broadcast %cst_25 : f32 to vector<16x64xf32>
      %43 = arith.addf %42, %41 : vector<16x64xf32>
      %44 = arith.mulf %30, %43 : vector<16x64xf32>
      %cst_26 = arith.constant 0.000000e+00 : f32
      %45 = vector.broadcast %cst_26 : f32 to vector<16x64xf32>
      %46 = arith.subf %45, %25 : vector<16x64xf32>
      %47 = arith.mulf %46, %25 : vector<16x64xf32>
      %48 = math.exp %47 : vector<16x64xf32>
      %49 = arith.mulf %44, %48 : vector<16x64xf32>
      %cst_27 = arith.constant 1.000000e+00 : f32
      %50 = vector.broadcast %cst_27 : f32 to vector<16x64xf32>
      %51 = arith.subf %50, %49 : vector<16x64xf32>
      %52 = arith.mulf %24, %51 : vector<16x64xf32>
      %cst_28 = arith.constant 1.000000e+00 : f32
      %53 = vector.broadcast %cst_28 : f32 to vector<16x64xf32>
      %54 = arith.addf %53, %52 : vector<16x64xf32>
      %55 = arith.mulf %17, %54 : vector<16x64xf32>
      %56 = arith.truncf %55 : vector<16x64xf32> to vector<16x64xbf16>
      %c0_29 = arith.constant 0 : index
      %c0_30 = arith.constant 0 : index
      %57 = vector.load %arg6[%c0_29, %c0_30] : memref<16x64xbf16, #tpu.memory_space<vmem>>, vector<16x64xbf16>
      tpu.vector_store %arg6[%c0_29, %c0_30], %56 {strides = array<i32>} : memref<16x64xbf16, #tpu.memory_space<vmem>>, vector<16x64xbf16>,
    } else {
    }
    return
  }
  func.func @transform_0(%arg0: i32, %arg1: i32, %arg2: i32) -> (i32, i32) {
    %c0_i32 = arith.constant 0 : i32
    return %arg0, %arg2 : i32, i32
  }
  func.func @transform_1(%arg0: i32, %arg1: i32, %arg2: i32) -> (i32, i32) {
    %c0_i32 = arith.constant 0 : i32
    return %arg2, %arg1 : i32, i32
  }
  func.func @transform_2(%arg0: i32, %arg1: i32, %arg2: i32) -> (i32, i32) {
    %c0_i32 = arith.constant 0 : i32
    %c0_i32_0 = arith.constant 0 : i32
    return %c0_i32, %arg1 : i32, i32
  }
  func.func @transform_3(%arg0: i32, %arg1: i32, %arg2: i32) -> (i32, i32) {
    %c0_i32 = arith.constant 0 : i32
    return %arg0, %arg1 : i32, i32
  }
}

module attributes {stable_mosaic.version = 11 : i64} {
  func.func @_dense_add_ln_kernel(%arg0: i32, %arg1: i32, %arg2: memref<16x32xbf16, #tpu.memory_space<vmem>>, %arg3: memref<32x32xbf16, #tpu.memory_space<vmem>>, %arg4: memref<1x32xf32, #tpu.memory_space<vmem>>, %arg5: memref<16x32xbf16, #tpu.memory_space<vmem>>, %arg6: memref<1x32xf32, #tpu.memory_space<vmem>>, %arg7: memref<1x32xf32, #tpu.memory_space<vmem>>, %arg8: memref<16x32xbf16, #tpu.memory_space<vmem>>, %arg9: memref<16x32xf32, #tpu.memory_space<vmem>>) attributes {dimension_semantics = [#tpu.dimension_semantics<parallel>, #tpu.dimension_semantics<arbitrary>], iteration_bounds = array<i64: 1, 1>, scalar_prefetch = 0 : i64, scratch_operands = 1 : i64, tpu.core_type = #tpu.core_type<tc>, window_params = [{transform_indices = @transform_0, window_bounds = array<i64: 16, 32>}, {transform_indices = @transform_1, window_bounds = array<i64: 32, 32>}, {pipeline_mode = #tpu.pipeline_mode<synchronous>, transform_indices = @transform_2, window_bounds = array<i64: 1, 32>}, {transform_indices = @transform_3, window_bounds = array<i64: 16, 32>}, {pipeline_mode = #tpu.pipeline_mode<synchronous>, transform_indices = @transform_4, window_bounds = array<i64: 1, 32>}, {pipeline_mode = #tpu.pipeline_mode<synchronous>, transform_indices = @transform_5, window_bounds = array<i64: 1, 32>}, {transform_indices = @transform_6, window_bounds = array<i64: 16, 32>}]} {
    %c0_i32 = arith.constant 0 : i32
    %0 = arith.cmpi eq, %arg1, %c0_i32 : i32
    %1 = arith.extui %0 : i1 to i32
    %c0_i32_0 = arith.constant 0 : i32
    %2 = arith.cmpi ne, %1, %c0_i32_0 : i32
    scf.if %2 {
      %cst_10 = arith.constant 0.000000e+00 : f32
      %12 = vector.broadcast %cst_10 : f32 to vector<16x32xf32>
      %c0_11 = arith.constant 0 : index
      %c0_12 = arith.constant 0 : index
      %13 = vector.load %arg9[%c0_11, %c0_12] : memref<16x32xf32, #tpu.memory_space<vmem>>, vector<16x32xf32>
      tpu.vector_store %arg9[%c0_11, %c0_12], %12 {strides = array<i32>} : memref<16x32xf32, #tpu.memory_space<vmem>>, vector<16x32xf32>,
    } else {
    }
    %c0 = arith.constant 0 : index
    %c0_1 = arith.constant 0 : index
    %3 = vector.load %arg9[%c0, %c0_1] : memref<16x32xf32, #tpu.memory_space<vmem>>, vector<16x32xf32>
    %c0_2 = arith.constant 0 : index
    %c0_3 = arith.constant 0 : index
    %4 = vector.load %arg2[%c0_2, %c0_3] : memref<16x32xbf16, #tpu.memory_space<vmem>>, vector<16x32xbf16>
    %c0_4 = arith.constant 0 : index
    %c0_5 = arith.constant 0 : index
    %5 = vector.load %arg3[%c0_4, %c0_5] : memref<32x32xbf16, #tpu.memory_space<vmem>>, vector<32x32xbf16>
    %cst = arith.constant dense<0.000000e+00> : vector<16x32xf32>
    %6 = tpu.matmul %4, %5, %cst {dimension_numbers = #tpu.dot_dimension_numbers<[1], [0], [0], [1], [0, 0, 1, 1], [], []>} : vector<16x32xbf16>, vector<32x32xbf16>, vector<16x32xf32> -> vector<16x32xf32>
    %7 = arith.addf %3, %6 : vector<16x32xf32>
    %c0_6 = arith.constant 0 : index
    %c0_7 = arith.constant 0 : index
    %8 = vector.load %arg9[%c0_6, %c0_7] : memref<16x32xf32, #tpu.memory_space<vmem>>, vector<16x32xf32>
    tpu.vector_store %arg9[%c0_6, %c0_7], %7 {strides = array<i32>} : memref<16x32xf32, #tpu.memory_space<vmem>>, vector<16x32xf32>,
    %c0_i32_8 = arith.constant 0 : i32
    %9 = arith.cmpi eq, %arg1, %c0_i32_8 : i32
    %10 = arith.extui %9 : i1 to i32
    %c0_i32_9 = arith.constant 0 : i32
    %11 = arith.cmpi ne, %10, %c0_i32_9 : i32
    scf.if %11 {
      %c0_10 = arith.constant 0 : index
      %c0_11 = arith.constant 0 : index
      %12 = vector.load %arg9[%c0_10, %c0_11] : memref<16x32xf32, #tpu.memory_space<vmem>>, vector<16x32xf32>
      %c0_12 = arith.constant 0 : index
      %c0_13 = arith.constant 0 : index
      %13 = vector.load %arg4[%c0_12, %c0_13] : memref<1x32xf32, #tpu.memory_space<vmem>>, vector<1x32xf32>
      %14 = vector.broadcast %13 : vector<1x32xf32> to vector<16x32xf32>
      %15 = arith.addf %12, %14 : vector<16x32xf32>
      %c0_14 = arith.constant 0 : index
      %c0_15 = arith.constant 0 : index
      %16 = vector.load %arg5[%c0_14, %c0_15] : memref<16x32xbf16, #tpu.memory_space<vmem>>, vector<16x32xbf16>
      %17 = arith.extf %16 : vector<16x32xbf16> to vector<16x32xf32>
      %18 = arith.addf %15, %17 : vector<16x32xf32>
      %cst_16 = arith.constant dense<0.000000e+00> : vector<16xf32>
      %19 = vector.multi_reduction <add>, %18, %cst_16 [1] : vector<16x32xf32> to vector<16xf32>
      %20 = vector.shape_cast %19 : vector<16xf32> to vector<16x1xf32>
      %cst_17 = arith.constant 3.200000e+01 : f32
      %21 = vector.broadcast %cst_17 : f32 to vector<16x1xf32>
      %22 = arith.divf %20, %21 : vector<16x1xf32>
      %23 = vector.broadcast %22 : vector<16x1xf32> to vector<16x32xf32>
      %24 = arith.subf %18, %23 : vector<16x32xf32>
      %25 = arith.mulf %24, %24 : vector<16x32xf32>
      %cst_18 = arith.constant dense<0.000000e+00> : vector<16xf32>
      %26 = vector.multi_reduction <add>, %25, %cst_18 [1] : vector<16x32xf32> to vector<16xf32>
      %27 = vector.shape_cast %26 : vector<16xf32> to vector<16x1xf32>
      %cst_19 = arith.constant 3.200000e+01 : f32
      %28 = vector.broadcast %cst_19 : f32 to vector<16x1xf32>
      %29 = arith.divf %27, %28 : vector<16x1xf32>
      %30 = vector.broadcast %22 : vector<16x1xf32> to vector<16x32xf32>
      %31 = arith.subf %18, %30 : vector<16x32xf32>
      %cst_20 = arith.constant 9.99999974E-6 : f32
      %32 = vector.broadcast %cst_20 : f32 to vector<16x1xf32>
      %33 = arith.addf %29, %32 : vector<16x1xf32>
      %34 = math.rsqrt %33 : vector<16x1xf32>
      %35 = vector.broadcast %34 : vector<16x1xf32> to vector<16x32xf32>
      %36 = arith.mulf %31, %35 : vector<16x32xf32>
      %c0_21 = arith.constant 0 : index
      %c0_22 = arith.constant 0 : index
      %37 = vector.load %arg6[%c0_21, %c0_22] : memref<1x32xf32, #tpu.memory_space<vmem>>, vector<1x32xf32>
      %38 = vector.broadcast %37 : vector<1x32xf32> to vector<16x32xf32>
      %39 = arith.mulf %36, %38 : vector<16x32xf32>
      %c0_23 = arith.constant 0 : index
      %c0_24 = arith.constant 0 : index
      %40 = vector.load %arg7[%c0_23, %c0_24] : memref<1x32xf32, #tpu.memory_space<vmem>>, vector<1x32xf32>
      %41 = vector.broadcast %40 : vector<1x32xf32> to vector<16x32xf32>
      %42 = arith.addf %39, %41 : vector<16x32xf32>
      %43 = arith.truncf %42 : vector<16x32xf32> to vector<16x32xbf16>
      %c0_25 = arith.constant 0 : index
      %c0_26 = arith.constant 0 : index
      %44 = vector.load %arg8[%c0_25, %c0_26] : memref<16x32xbf16, #tpu.memory_space<vmem>>, vector<16x32xbf16>
      tpu.vector_store %arg8[%c0_25, %c0_26], %43 {strides = array<i32>} : memref<16x32xbf16, #tpu.memory_space<vmem>>, vector<16x32xbf16>,
    } else {
    }
    return
  }
  func.func @transform_0(%arg0: i32, %arg1: i32) -> (i32, i32) {
    %c0_i32 = arith.constant 0 : i32
    return %arg0, %arg1 : i32, i32
  }
  func.func @transform_1(%arg0: i32, %arg1: i32) -> (i32, i32) {
    %c0_i32 = arith.constant 0 : i32
    %c0_i32_0 = arith.constant 0 : i32
    return %arg1, %c0_i32 : i32, i32
  }
  func.func @transform_2(%arg0: i32, %arg1: i32) -> (i32, i32) {
    %c0_i32 = arith.constant 0 : i32
    %c0_i32_0 = arith.constant 0 : i32
    %c0_i32_1 = arith.constant 0 : i32
    return %c0_i32, %c0_i32_0 : i32, i32
  }
  func.func @transform_3(%arg0: i32, %arg1: i32) -> (i32, i32) {
    %c0_i32 = arith.constant 0 : i32
    %c0_i32_0 = arith.constant 0 : i32
    return %arg0, %c0_i32 : i32, i32
  }
  func.func @transform_4(%arg0: i32, %arg1: i32) -> (i32, i32) {
    %c0_i32 = arith.constant 0 : i32
    %c0_i32_0 = arith.constant 0 : i32
    %c0_i32_1 = arith.constant 0 : i32
    return %c0_i32, %c0_i32_0 : i32, i32
  }
  func.func @transform_5(%arg0: i32, %arg1: i32) -> (i32, i32) {
    %c0_i32 = arith.constant 0 : i32
    %c0_i32_0 = arith.constant 0 : i32
    %c0_i32_1 = arith.constant 0 : i32
    return %c0_i32, %c0_i32_0 : i32, i32
  }
  func.func @transform_6(%arg0: i32, %arg1: i32) -> (i32, i32) {
    %c0_i32 = arith.constant 0 : i32
    %c0_i32_0 = arith.constant 0 : i32
    return %arg0, %c0_i32 : i32, i32
  }
}

module attributes {stable_mosaic.version = 11 : i64} {
  func.func @_dense_add_ln_kernel(%arg0: i32, %arg1: i32, %arg2: memref<16x64xbf16, #tpu.memory_space<vmem>>, %arg3: memref<64x32xbf16, #tpu.memory_space<vmem>>, %arg4: memref<1x32xf32, #tpu.memory_space<vmem>>, %arg5: memref<16x32xbf16, #tpu.memory_space<vmem>>, %arg6: memref<1x32xf32, #tpu.memory_space<vmem>>, %arg7: memref<1x32xf32, #tpu.memory_space<vmem>>, %arg8: memref<16x32xbf16, #tpu.memory_space<vmem>>, %arg9: memref<16x32xf32, #tpu.memory_space<vmem>>) attributes {dimension_semantics = [#tpu.dimension_semantics<parallel>, #tpu.dimension_semantics<arbitrary>], iteration_bounds = array<i64: 1, 1>, scalar_prefetch = 0 : i64, scratch_operands = 1 : i64, tpu.core_type = #tpu.core_type<tc>, window_params = [{transform_indices = @transform_0, window_bounds = array<i64: 16, 64>}, {transform_indices = @transform_1, window_bounds = array<i64: 64, 32>}, {pipeline_mode = #tpu.pipeline_mode<synchronous>, transform_indices = @transform_2, window_bounds = array<i64: 1, 32>}, {transform_indices = @transform_3, window_bounds = array<i64: 16, 32>}, {pipeline_mode = #tpu.pipeline_mode<synchronous>, transform_indices = @transform_4, window_bounds = array<i64: 1, 32>}, {pipeline_mode = #tpu.pipeline_mode<synchronous>, transform_indices = @transform_5, window_bounds = array<i64: 1, 32>}, {transform_indices = @transform_6, window_bounds = array<i64: 16, 32>}]} {
    %c0_i32 = arith.constant 0 : i32
    %0 = arith.cmpi eq, %arg1, %c0_i32 : i32
    %1 = arith.extui %0 : i1 to i32
    %c0_i32_0 = arith.constant 0 : i32
    %2 = arith.cmpi ne, %1, %c0_i32_0 : i32
    scf.if %2 {
      %cst_10 = arith.constant 0.000000e+00 : f32
      %12 = vector.broadcast %cst_10 : f32 to vector<16x32xf32>
      %c0_11 = arith.constant 0 : index
      %c0_12 = arith.constant 0 : index
      %13 = vector.load %arg9[%c0_11, %c0_12] : memref<16x32xf32, #tpu.memory_space<vmem>>, vector<16x32xf32>
      tpu.vector_store %arg9[%c0_11, %c0_12], %12 {strides = array<i32>} : memref<16x32xf32, #tpu.memory_space<vmem>>, vector<16x32xf32>,
    } else {
    }
    %c0 = arith.constant 0 : index
    %c0_1 = arith.constant 0 : index
    %3 = vector.load %arg9[%c0, %c0_1] : memref<16x32xf32, #tpu.memory_space<vmem>>, vector<16x32xf32>
    %c0_2 = arith.constant 0 : index
    %c0_3 = arith.constant 0 : index
    %4 = vector.load %arg2[%c0_2, %c0_3] : memref<16x64xbf16, #tpu.memory_space<vmem>>, vector<16x64xbf16>
    %c0_4 = arith.constant 0 : index
    %c0_5 = arith.constant 0 : index
    %5 = vector.load %arg3[%c0_4, %c0_5] : memref<64x32xbf16, #tpu.memory_space<vmem>>, vector<64x32xbf16>
    %cst = arith.constant dense<0.000000e+00> : vector<16x32xf32>
    %6 = tpu.matmul %4, %5, %cst {dimension_numbers = #tpu.dot_dimension_numbers<[1], [0], [0], [1], [0, 0, 1, 1], [], []>} : vector<16x64xbf16>, vector<64x32xbf16>, vector<16x32xf32> -> vector<16x32xf32>
    %7 = arith.addf %3, %6 : vector<16x32xf32>
    %c0_6 = arith.constant 0 : index
    %c0_7 = arith.constant 0 : index
    %8 = vector.load %arg9[%c0_6, %c0_7] : memref<16x32xf32, #tpu.memory_space<vmem>>, vector<16x32xf32>
    tpu.vector_store %arg9[%c0_6, %c0_7], %7 {strides = array<i32>} : memref<16x32xf32, #tpu.memory_space<vmem>>, vector<16x32xf32>,
    %c0_i32_8 = arith.constant 0 : i32
    %9 = arith.cmpi eq, %arg1, %c0_i32_8 : i32
    %10 = arith.extui %9 : i1 to i32
    %c0_i32_9 = arith.constant 0 : i32
    %11 = arith.cmpi ne, %10, %c0_i32_9 : i32
    scf.if %11 {
      %c0_10 = arith.constant 0 : index
      %c0_11 = arith.constant 0 : index
      %12 = vector.load %arg9[%c0_10, %c0_11] : memref<16x32xf32, #tpu.memory_space<vmem>>, vector<16x32xf32>
      %c0_12 = arith.constant 0 : index
      %c0_13 = arith.constant 0 : index
      %13 = vector.load %arg4[%c0_12, %c0_13] : memref<1x32xf32, #tpu.memory_space<vmem>>, vector<1x32xf32>
      %14 = vector.broadcast %13 : vector<1x32xf32> to vector<16x32xf32>
      %15 = arith.addf %12, %14 : vector<16x32xf32>
      %c0_14 = arith.constant 0 : index
      %c0_15 = arith.constant 0 : index
      %16 = vector.load %arg5[%c0_14, %c0_15] : memref<16x32xbf16, #tpu.memory_space<vmem>>, vector<16x32xbf16>
      %17 = arith.extf %16 : vector<16x32xbf16> to vector<16x32xf32>
      %18 = arith.addf %15, %17 : vector<16x32xf32>
      %cst_16 = arith.constant dense<0.000000e+00> : vector<16xf32>
      %19 = vector.multi_reduction <add>, %18, %cst_16 [1] : vector<16x32xf32> to vector<16xf32>
      %20 = vector.shape_cast %19 : vector<16xf32> to vector<16x1xf32>
      %cst_17 = arith.constant 3.200000e+01 : f32
      %21 = vector.broadcast %cst_17 : f32 to vector<16x1xf32>
      %22 = arith.divf %20, %21 : vector<16x1xf32>
      %23 = vector.broadcast %22 : vector<16x1xf32> to vector<16x32xf32>
      %24 = arith.subf %18, %23 : vector<16x32xf32>
      %25 = arith.mulf %24, %24 : vector<16x32xf32>
      %cst_18 = arith.constant dense<0.000000e+00> : vector<16xf32>
      %26 = vector.multi_reduction <add>, %25, %cst_18 [1] : vector<16x32xf32> to vector<16xf32>
      %27 = vector.shape_cast %26 : vector<16xf32> to vector<16x1xf32>
      %cst_19 = arith.constant 3.200000e+01 : f32
      %28 = vector.broadcast %cst_19 : f32 to vector<16x1xf32>
      %29 = arith.divf %27, %28 : vector<16x1xf32>
      %30 = vector.broadcast %22 : vector<16x1xf32> to vector<16x32xf32>
      %31 = arith.subf %18, %30 : vector<16x32xf32>
      %cst_20 = arith.constant 9.99999974E-6 : f32
      %32 = vector.broadcast %cst_20 : f32 to vector<16x1xf32>
      %33 = arith.addf %29, %32 : vector<16x1xf32>
      %34 = math.rsqrt %33 : vector<16x1xf32>
      %35 = vector.broadcast %34 : vector<16x1xf32> to vector<16x32xf32>
      %36 = arith.mulf %31, %35 : vector<16x32xf32>
      %c0_21 = arith.constant 0 : index
      %c0_22 = arith.constant 0 : index
      %37 = vector.load %arg6[%c0_21, %c0_22] : memref<1x32xf32, #tpu.memory_space<vmem>>, vector<1x32xf32>
      %38 = vector.broadcast %37 : vector<1x32xf32> to vector<16x32xf32>
      %39 = arith.mulf %36, %38 : vector<16x32xf32>
      %c0_23 = arith.constant 0 : index
      %c0_24 = arith.constant 0 : index
      %40 = vector.load %arg7[%c0_23, %c0_24] : memref<1x32xf32, #tpu.memory_space<vmem>>, vector<1x32xf32>
      %41 = vector.broadcast %40 : vector<1x32xf32> to vector<16x32xf32>
      %42 = arith.addf %39, %41 : vector<16x32xf32>
      %43 = arith.truncf %42 : vector<16x32xf32> to vector<16x32xbf16>
      %c0_25 = arith.constant 0 : index
      %c0_26 = arith.constant 0 : index
      %44 = vector.load %arg8[%c0_25, %c0_26] : memref<16x32xbf16, #tpu.memory_space<vmem>>, vector<16x32xbf16>
      tpu.vector_store %arg8[%c0_25, %c0_26], %43 {strides = array<i32>} : memref<16x32xbf16, #tpu.memory_space<vmem>>, vector<16x32xbf16>,
    } else {
    }
    return
  }
  func.func @transform_0(%arg0: i32, %arg1: i32) -> (i32, i32) {
    %c0_i32 = arith.constant 0 : i32
    return %arg0, %arg1 : i32, i32
  }
  func.func @transform_1(%arg0: i32, %arg1: i32) -> (i32, i32) {
    %c0_i32 = arith.constant 0 : i32
    %c0_i32_0 = arith.constant 0 : i32
    return %arg1, %c0_i32 : i32, i32
  }
  func.func @transform_2(%arg0: i32, %arg1: i32) -> (i32, i32) {
    %c0_i32 = arith.constant 0 : i32
    %c0_i32_0 = arith.constant 0 : i32
    %c0_i32_1 = arith.constant 0 : i32
    return %c0_i32, %c0_i32_0 : i32, i32
  }
  func.func @transform_3(%arg0: i32, %arg1: i32) -> (i32, i32) {
    %c0_i32 = arith.constant 0 : i32
    %c0_i32_0 = arith.constant 0 : i32
    return %arg0, %c0_i32 : i32, i32
  }
  func.func @transform_4(%arg0: i32, %arg1: i32) -> (i32, i32) {
    %c0_i32 = arith.constant 0 : i32
    %c0_i32_0 = arith.constant 0 : i32
    %c0_i32_1 = arith.constant 0 : i32
    return %c0_i32, %c0_i32_0 : i32, i32
  }
  func.func @transform_5(%arg0: i32, %arg1: i32) -> (i32, i32) {
    %c0_i32 = arith.constant 0 : i32
    %c0_i32_0 = arith.constant 0 : i32
    %c0_i32_1 = arith.constant 0 : i32
    return %c0_i32, %c0_i32_0 : i32, i32
  }
  func.func @transform_6(%arg0: i32, %arg1: i32) -> (i32, i32) {
    %c0_i32 = arith.constant 0 : i32
    %c0_i32_0 = arith.constant 0 : i32
    return %arg0, %c0_i32 : i32, i32
  }
}

module attributes {stable_mosaic.version = 11 : i64} {
  func.func @_dense_kernel(%arg0: i32, %arg1: i32, %arg2: i32, %arg3: memref<16x32xbf16, #tpu.memory_space<vmem>>, %arg4: memref<32x32xbf16, #tpu.memory_space<vmem>>, %arg5: memref<1x32xf32, #tpu.memory_space<vmem>>, %arg6: memref<16x32xbf16, #tpu.memory_space<vmem>>, %arg7: memref<16x32xf32, #tpu.memory_space<vmem>>) attributes {dimension_semantics = [#tpu.dimension_semantics<parallel>, #tpu.dimension_semantics<parallel>, #tpu.dimension_semantics<arbitrary>], iteration_bounds = array<i64: 1, 1, 1>, scalar_prefetch = 0 : i64, scratch_operands = 1 : i64, tpu.core_type = #tpu.core_type<tc>, window_params = [{transform_indices = @transform_0, window_bounds = array<i64: 16, 32>}, {transform_indices = @transform_1, window_bounds = array<i64: 32, 32>}, {transform_indices = @transform_2, window_bounds = array<i64: 1, 32>}, {transform_indices = @transform_3, window_bounds = array<i64: 16, 32>}]} {
    %c0_i32 = arith.constant 0 : i32
    %0 = arith.cmpi eq, %arg2, %c0_i32 : i32
    %1 = arith.extui %0 : i1 to i32
    %c0_i32_0 = arith.constant 0 : i32
    %2 = arith.cmpi ne, %1, %c0_i32_0 : i32
    scf.if %2 {
      %cst_10 = arith.constant 0.000000e+00 : f32
      %12 = vector.broadcast %cst_10 : f32 to vector<16x32xf32>
      %c0_11 = arith.constant 0 : index
      %c0_12 = arith.constant 0 : index
      %13 = vector.load %arg7[%c0_11, %c0_12] : memref<16x32xf32, #tpu.memory_space<vmem>>, vector<16x32xf32>
      tpu.vector_store %arg7[%c0_11, %c0_12], %12 {strides = array<i32>} : memref<16x32xf32, #tpu.memory_space<vmem>>, vector<16x32xf32>,
    } else {
    }
    %c0 = arith.constant 0 : index
    %c0_1 = arith.constant 0 : index
    %3 = vector.load %arg7[%c0, %c0_1] : memref<16x32xf32, #tpu.memory_space<vmem>>, vector<16x32xf32>
    %c0_2 = arith.constant 0 : index
    %c0_3 = arith.constant 0 : index
    %4 = vector.load %arg3[%c0_2, %c0_3] : memref<16x32xbf16, #tpu.memory_space<vmem>>, vector<16x32xbf16>
    %c0_4 = arith.constant 0 : index
    %c0_5 = arith.constant 0 : index
    %5 = vector.load %arg4[%c0_4, %c0_5] : memref<32x32xbf16, #tpu.memory_space<vmem>>, vector<32x32xbf16>
    %cst = arith.constant dense<0.000000e+00> : vector<16x32xf32>
    %6 = tpu.matmul %4, %5, %cst {dimension_numbers = #tpu.dot_dimension_numbers<[1], [0], [0], [1], [0, 0, 1, 1], [], []>} : vector<16x32xbf16>, vector<32x32xbf16>, vector<16x32xf32> -> vector<16x32xf32>
    %7 = arith.addf %3, %6 : vector<16x32xf32>
    %c0_6 = arith.constant 0 : index
    %c0_7 = arith.constant 0 : index
    %8 = vector.load %arg7[%c0_6, %c0_7] : memref<16x32xf32, #tpu.memory_space<vmem>>, vector<16x32xf32>
    tpu.vector_store %arg7[%c0_6, %c0_7], %7 {strides = array<i32>} : memref<16x32xf32, #tpu.memory_space<vmem>>, vector<16x32xf32>,
    %c0_i32_8 = arith.constant 0 : i32
    %9 = arith.cmpi eq, %arg2, %c0_i32_8 : i32
    %10 = arith.extui %9 : i1 to i32
    %c0_i32_9 = arith.constant 0 : i32
    %11 = arith.cmpi ne, %10, %c0_i32_9 : i32
    scf.if %11 {
      %c0_10 = arith.constant 0 : index
      %c0_11 = arith.constant 0 : index
      %12 = vector.load %arg7[%c0_10, %c0_11] : memref<16x32xf32, #tpu.memory_space<vmem>>, vector<16x32xf32>
      %c0_12 = arith.constant 0 : index
      %c0_13 = arith.constant 0 : index
      %13 = vector.load %arg5[%c0_12, %c0_13] : memref<1x32xf32, #tpu.memory_space<vmem>>, vector<1x32xf32>
      %14 = vector.broadcast %13 : vector<1x32xf32> to vector<16x32xf32>
      %15 = arith.addf %12, %14 : vector<16x32xf32>
      %16 = arith.truncf %15 : vector<16x32xf32> to vector<16x32xbf16>
      %c0_14 = arith.constant 0 : index
      %c0_15 = arith.constant 0 : index
      %17 = vector.load %arg6[%c0_14, %c0_15] : memref<16x32xbf16, #tpu.memory_space<vmem>>, vector<16x32xbf16>
      tpu.vector_store %arg6[%c0_14, %c0_15], %16 {strides = array<i32>} : memref<16x32xbf16, #tpu.memory_space<vmem>>, vector<16x32xbf16>,
    } else {
    }
    return
  }
  func.func @transform_0(%arg0: i32, %arg1: i32, %arg2: i32) -> (i32, i32) {
    %c0_i32 = arith.constant 0 : i32
    return %arg0, %arg2 : i32, i32
  }
  func.func @transform_1(%arg0: i32, %arg1: i32, %arg2: i32) -> (i32, i32) {
    %c0_i32 = arith.constant 0 : i32
    return %arg2, %arg1 : i32, i32
  }
  func.func @transform_2(%arg0: i32, %arg1: i32, %arg2: i32) -> (i32, i32) {
    %c0_i32 = arith.constant 0 : i32
    %c0_i32_0 = arith.constant 0 : i32
    return %c0_i32, %arg1 : i32, i32
  }
  func.func @transform_3(%arg0: i32, %arg1: i32, %arg2: i32) -> (i32, i32) {
    %c0_i32 = arith.constant 0 : i32
    return %arg0, %arg1 : i32, i32
  }
}

module attributes {stable_mosaic.version = 11 : i64} {
  func.func @_attention_kernel(%arg0: i32, %arg1: memref<4xf32, #tpu.memory_space<smem>>, %arg2: memref<2x8x16xbf16, #tpu.memory_space<vmem>>, %arg3: memref<2x8x16xbf16, #tpu.memory_space<vmem>>, %arg4: memref<2x8x16xbf16, #tpu.memory_space<vmem>>, %arg5: memref<8x8xf32, #tpu.memory_space<vmem>>, %arg6: memref<8x8xf32, #tpu.memory_space<vmem>>, %arg7: memref<8x8xbf16, #tpu.memory_space<vmem>>, %arg8: memref<8x8xf32, #tpu.memory_space<vmem>>, %arg9: memref<2x8x16xbf16, #tpu.memory_space<vmem>>, %arg10: memref<2x8x8xf32, #tpu.memory_space<vmem>>) attributes {dimension_semantics = [#tpu.dimension_semantics<parallel>], iteration_bounds = array<i64: 2>, scalar_prefetch = 0 : i64, scratch_operands = 0 : i64, tpu.core_type = #tpu.core_type<tc>, window_params = [{transform_indices = @transform_0, window_bounds = array<i64: 4>}, {transform_indices = @transform_1, window_bounds = array<i64: 2, 8, 16>}, {transform_indices = @transform_2, window_bounds = array<i64: 2, 8, 16>}, {transform_indices = @transform_3, window_bounds = array<i64: 2, 8, 16>}, {pipeline_mode = #tpu.pipeline_mode<synchronous>, transform_indices = @transform_4, window_bounds = array<i64: 8, 8>}, {pipeline_mode = #tpu.pipeline_mode<synchronous>, transform_indices = @transform_5, window_bounds = array<i64: 8, 8>}, {pipeline_mode = #tpu.pipeline_mode<synchronous>, transform_indices = @transform_6, window_bounds = array<i64: 8, 8>}, {pipeline_mode = #tpu.pipeline_mode<synchronous>, transform_indices = @transform_7, window_bounds = array<i64: 8, 8>}, {transform_indices = @transform_8, window_bounds = array<i64: 2, 8, 16>}, {transform_indices = @transform_9, window_bounds = array<i64: 2, 8, 8>}]} {
    %c0 = arith.constant 0 : index
    %c0_0 = arith.constant 0 : index
    %c0_1 = arith.constant 0 : index
    %0 = vector.load %arg2[%c0, %c0_0, %c0_1] : memref<2x8x16xbf16, #tpu.memory_space<vmem>>, vector<2x8x16xbf16>
    %c0_2 = arith.constant 0 : index
    %c0_3 = arith.constant 0 : index
    %c0_4 = arith.constant 0 : index
    %1 = vector.load %arg3[%c0_2, %c0_3, %c0_4] : memref<2x8x16xbf16, #tpu.memory_space<vmem>>, vector<2x8x16xbf16>
    %c0_5 = arith.constant 0 : index
    %c0_6 = arith.constant 0 : index
    %c0_7 = arith.constant 0 : index
    %2 = vector.load %arg4[%c0_5, %c0_6, %c0_7] : memref<2x8x16xbf16, #tpu.memory_space<vmem>>, vector<2x8x16xbf16>
    %c0_8 = arith.constant 0 : index
    %c0_9 = arith.constant 0 : index
    %3 = vector.load %arg5[%c0_8, %c0_9] : memref<8x8xf32, #tpu.memory_space<vmem>>, vector<8x8xf32>
    %4 = vector.shape_cast %3 : vector<8x8xf32> to vector<1x8x8xf32>
    %c0_10 = arith.constant 0 : index
    %c0_11 = arith.constant 0 : index
    %5 = vector.load %arg6[%c0_10, %c0_11] : memref<8x8xf32, #tpu.memory_space<vmem>>, vector<8x8xf32>
    %6 = vector.shape_cast %5 : vector<8x8xf32> to vector<1x8x8xf32>
    %c0_12 = arith.constant 0 : index
    %c0_13 = arith.constant 0 : index
    %7 = vector.load %arg8[%c0_12, %c0_13] : memref<8x8xf32, #tpu.memory_space<vmem>>, vector<8x8xf32>
    %8 = vector.shape_cast %7 : vector<8x8xf32> to vector<1x8x8xf32>
    "tpu.trace_start"() <{level = 10 : i32, message = "bqd,bkd->bqk"}> : () -> ()
    %cst = arith.constant dense<0.000000e+00> : vector<2x8x8xf32>
    %9 = tpu.matmul %0, %1, %cst {dimension_numbers = #tpu.dot_dimension_numbers<[2], [2], [1], [1], [0, 0, 0, 1, 1, 1], [0], [0]>} : vector<2x8x16xbf16>, vector<2x8x16xbf16>, vector<2x8x8xf32> -> vector<2x8x8xf32>
    "tpu.trace_stop"() : () -> ()
    %cst_14 = arith.constant 2.500000e-01 : f32
    %10 = vector.broadcast %cst_14 : f32 to vector<2x8x8xf32>
    %11 = arith.mulf %9, %10 : vector<2x8x8xf32>
    %12 = vector.broadcast %4 : vector<1x8x8xf32> to vector<2x8x8xf32>
    %13 = arith.addf %11, %12 : vector<2x8x8xf32>
    %cst_15 = arith.constant dense<0xFF800000> : vector<2x8xf32>
    %14 = vector.multi_reduction <maximumf>, %13, %cst_15 [2] : vector<2x8x8xf32> to vector<2x8xf32>
    %15 = vector.shape_cast %14 : vector<2x8xf32> to vector<2x8x1xf32>
    %16 = vector.broadcast %15 : vector<2x8x1xf32> to vector<2x8x8xf32>
    %17 = arith.subf %13, %16 : vector<2x8x8xf32>
    %18 = math.exp %17 : vector<2x8x8xf32>
    %cst_16 = arith.constant dense<0.000000e+00> : vector<2x8xf32>
    %19 = vector.multi_reduction <add>, %18, %cst_16 [2] : vector<2x8x8xf32> to vector<2x8xf32>
    %20 = vector.shape_cast %19 : vector<2x8xf32> to vector<2x8x1xf32>
    %21 = tpu.reciprocal %20 {approx = true} : vector<2x8x1xf32> -> vector<2x8x1xf32>
    %22 = vector.broadcast %21 : vector<2x8x1xf32> to vector<2x8x8xf32>
    %23 = arith.mulf %18, %22 : vector<2x8x8xf32>
    %24 = vector.broadcast %6 : vector<1x8x8xf32> to vector<2x8x8xf32>
    %25 = arith.mulf %23, %24 : vector<2x8x8xf32>
    %26 = arith.truncf %25 : vector<2x8x8xf32> to vector<2x8x8xbf16>
    %27 = vector.shape_cast %26 : vector<2x8x8xbf16> to vector<16x8xbf16>
    %c0_17 = arith.constant 0 : index
    %c0_18 = arith.constant 0 : index
    %28 = vector.load %arg7[%c0_17, %c0_18] : memref<8x8xbf16, #tpu.memory_space<vmem>>, vector<8x8xbf16>
    %cst_19 = arith.constant dense<0.000000e+00> : vector<16x8xf32>
    %29 = tpu.matmul %27, %28, %cst_19 {dimension_numbers = #tpu.dot_dimension_numbers<[1], [0], [0], [1], [0, 0, 1, 1], [], []>} : vector<16x8xbf16>, vector<8x8xbf16>, vector<16x8xf32> -> vector<16x8xf32>
    %30 = vector.shape_cast %29 : vector<16x8xf32> to vector<2x8x8xf32>
    %cst_20 = arith.constant dense<0.000000e+00> : vector<2x8xf32>
    %31 = vector.multi_reduction <add>, %25, %cst_20 [2] : vector<2x8x8xf32> to vector<2x8xf32>
    %32 = vector.shape_cast %31 : vector<2x8xf32> to vector<2x8x1xf32>
    %33 = vector.broadcast %32 : vector<2x8x1xf32> to vector<2x8x8xf32>
    %34 = arith.subf %33, %30 : vector<2x8x8xf32>
    %35 = vector.broadcast %8 : vector<1x8x8xf32> to vector<2x8x8xf32>
    %36 = arith.mulf %34, %35 : vector<2x8x8xf32>
    %cst_21 = arith.constant 0.000000e+00 : f32
    %37 = vector.broadcast %cst_21 : f32 to vector<2x8x8xf32>
    %38 = arith.maximumf %36, %37 : vector<2x8x8xf32>
    %39 = math.sqrt %38 : vector<2x8x8xf32>
    %c2_i32 = arith.constant 2 : i32
    %40 = arith.muli %arg0, %c2_i32 : i32
    %41 = tpu.iota {dimensions = array<i32: 0>} : vector<2x1x1xi32>
    %42 = arith.index_cast %40 : i32 to index
    %43 = memref.load %arg1[%42] : memref<4xf32, #tpu.memory_space<smem>>
    %44 = vector.broadcast %43 : f32 to vector<2x1x1xf32>
    %c1_i32 = arith.constant 1 : i32
    %45 = vector.broadcast %c1_i32 : i32 to vector<2x1x1xi32>
    %46 = arith.cmpi eq, %41, %45 : vector<2x1x1xi32>
    %c1_i32_22 = arith.constant 1 : i32
    %47 = arith.addi %40, %c1_i32_22 : i32
    %48 = arith.index_cast %47 : i32 to index
    %49 = memref.load %arg1[%48] : memref<4xf32, #tpu.memory_space<smem>>
    %50 = vector.broadcast %49 : f32 to vector<2x1x1xf32>
    %51 = arith.select %46, %50, %44 : vector<2x1x1xi1>, vector<2x1x1xf32>
    %52 = vector.broadcast %51 : vector<2x1x1xf32> to vector<2x8x8xf32>
    %53 = arith.mulf %39, %52 : vector<2x8x8xf32>
    %54 = math.exp %53 : vector<2x8x8xf32>
    %cst_23 = arith.constant 9.99999974E-6 : f32
    %cst_24 = arith.constant 1.000000e+05 : f32
    %55 = vector.broadcast %cst_23 : f32 to vector<2x8x8xf32>
    %56 = arith.maximumf %55, %54 : vector<2x8x8xf32>
    %57 = vector.broadcast %cst_24 : f32 to vector<2x8x8xf32>
    %58 = arith.minimumf %57, %56 : vector<2x8x8xf32>
    %59 = arith.mulf %11, %58 : vector<2x8x8xf32>
    %60 = vector.broadcast %4 : vector<1x8x8xf32> to vector<2x8x8xf32>
    %61 = arith.addf %59, %60 : vector<2x8x8xf32>
    %cst_25 = arith.constant dense<0xFF800000> : vector<2x8xf32>
    %62 = vector.multi_reduction <maximumf>, %61, %cst_25 [2] : vector<2x8x8xf32> to vector<2x8xf32>
    %63 = vector.shape_cast %62 : vector<2x8xf32> to vector<2x8x1xf32>
    %64 = vector.broadcast %63 : vector<2x8x1xf32> to vector<2x8x8xf32>
    %65 = arith.subf %61, %64 : vector<2x8x8xf32>
    %66 = math.exp %65 : vector<2x8x8xf32>
    %cst_26 = arith.constant dense<0.000000e+00> : vector<2x8xf32>
    %67 = vector.multi_reduction <add>, %66, %cst_26 [2] : vector<2x8x8xf32> to vector<2x8xf32>
    %68 = vector.shape_cast %67 : vector<2x8xf32> to vector<2x8x1xf32>
    %69 = tpu.reciprocal %68 {approx = true} : vector<2x8x1xf32> -> vector<2x8x1xf32>
    %70 = vector.broadcast %69 : vector<2x8x1xf32> to vector<2x8x8xf32>
    %71 = arith.mulf %66, %70 : vector<2x8x8xf32>
    %72 = arith.truncf %71 : vector<2x8x8xf32> to vector<2x8x8xbf16>
    "tpu.trace_start"() <{level = 10 : i32, message = "bqk,bkd->bqd"}> : () -> ()
    %cst_27 = arith.constant dense<0.000000e+00> : vector<2x8x16xf32>
    %73 = tpu.matmul %72, %2, %cst_27 {dimension_numbers = #tpu.dot_dimension_numbers<[2], [1], [1], [2], [0, 0, 0, 1, 1, 2], [0], [0]>} : vector<2x8x8xbf16>, vector<2x8x16xbf16>, vector<2x8x16xf32> -> vector<2x8x16xf32>
    "tpu.trace_stop"() : () -> ()
    %74 = arith.truncf %73 : vector<2x8x16xf32> to vector<2x8x16xbf16>
    %c0_28 = arith.constant 0 : index
    %c0_29 = arith.constant 0 : index
    %c0_30 = arith.constant 0 : index
    %75 = vector.load %arg9[%c0_28, %c0_29, %c0_30] : memref<2x8x16xbf16, #tpu.memory_space<vmem>>, vector<2x8x16xbf16>
    tpu.vector_store %arg9[%c0_28, %c0_29, %c0_30], %74 {strides = array<i32>} : memref<2x8x16xbf16, #tpu.memory_space<vmem>>, vector<2x8x16xbf16>,
    %c0_31 = arith.constant 0 : index
    %c0_32 = arith.constant 0 : index
    %c0_33 = arith.constant 0 : index
    %76 = vector.load %arg10[%c0_31, %c0_32, %c0_33] : memref<2x8x8xf32, #tpu.memory_space<vmem>>, vector<2x8x8xf32>
    tpu.vector_store %arg10[%c0_31, %c0_32, %c0_33], %71 {strides = array<i32>} : memref<2x8x8xf32, #tpu.memory_space<vmem>>, vector<2x8x8xf32>,
    return
  }
  func.func @transform_0(%arg0: i32) -> i32 {
    %c0_i32 = arith.constant 0 : i32
    %c0_i32_0 = arith.constant 0 : i32
    return %c0_i32 : i32
  }
  func.func @transform_1(%arg0: i32) -> (i32, i32, i32) {
    %c0_i32 = arith.constant 0 : i32
    %c0_i32_0 = arith.constant 0 : i32
    %c0_i32_1 = arith.constant 0 : i32
    return %arg0, %c0_i32, %c0_i32_0 : i32, i32, i32
  }
  func.func @transform_2(%arg0: i32) -> (i32, i32, i32) {
    %c0_i32 = arith.constant 0 : i32
    %c0_i32_0 = arith.constant 0 : i32
    %c0_i32_1 = arith.constant 0 : i32
    return %arg0, %c0_i32, %c0_i32_0 : i32, i32, i32
  }
  func.func @transform_3(%arg0: i32) -> (i32, i32, i32) {
    %c0_i32 = arith.constant 0 : i32
    %c0_i32_0 = arith.constant 0 : i32
    %c0_i32_1 = arith.constant 0 : i32
    return %arg0, %c0_i32, %c0_i32_0 : i32, i32, i32
  }
  func.func @transform_4(%arg0: i32) -> (i32, i32) {
    %c0_i32 = arith.constant 0 : i32
    %c0_i32_0 = arith.constant 0 : i32
    %c0_i32_1 = arith.constant 0 : i32
    return %c0_i32, %c0_i32_0 : i32, i32
  }
  func.func @transform_5(%arg0: i32) -> (i32, i32) {
    %c0_i32 = arith.constant 0 : i32
    %c0_i32_0 = arith.constant 0 : i32
    %c0_i32_1 = arith.constant 0 : i32
    return %c0_i32, %c0_i32_0 : i32, i32
  }
  func.func @transform_6(%arg0: i32) -> (i32, i32) {
    %c0_i32 = arith.constant 0 : i32
    %c0_i32_0 = arith.constant 0 : i32
    %c0_i32_1 = arith.constant 0 : i32
    return %c0_i32, %c0_i32_0 : i32, i32
  }
  func.func @transform_7(%arg0: i32) -> (i32, i32) {
    %c0_i32 = arith.constant 0 : i32
    %c0_i32_0 = arith.constant 0 : i32
    %c0_i32_1 = arith.constant 0 : i32
    return %c0_i32, %c0_i32_0 : i32, i32
  }
  func.func @transform_8(%arg0: i32) -> (i32, i32, i32) {
    %c0_i32 = arith.constant 0 : i32
    %c0_i32_0 = arith.constant 0 : i32
    %c0_i32_1 = arith.constant 0 : i32
    return %arg0, %c0_i32, %c0_i32_0 : i32, i32, i32
  }
  func.func @transform_9(%arg0: i32) -> (i32, i32, i32) {
    %c0_i32 = arith.constant 0 : i32
    %c0_i32_0 = arith.constant 0 : i32
    %c0_i32_1 = arith.constant 0 : i32
    return %arg0, %c0_i32, %c0_i32_0 : i32, i32, i32
  }
}

module attributes {stable_mosaic.version = 11 : i64} {
  func.func @_out_head_kernel(%arg0: i32, %arg1: memref<16x64xbf16, #tpu.memory_space<vmem>>, %arg2: memref<64x512xbf16, #tpu.memory_space<vmem>>, %arg3: memref<1x512xf32, #tpu.memory_space<vmem>>, %arg4: memref<512x256xbf16, #tpu.memory_space<vmem>>, %arg5: memref<1x256xf32, #tpu.memory_space<vmem>>, %arg6: memref<1x256xf32, #tpu.memory_space<vmem>>, %arg7: memref<1x1xf32, #tpu.memory_space<vmem>>, %arg8: memref<16x1xf32, #tpu.memory_space<vmem>>) attributes {dimension_semantics = [#tpu.dimension_semantics<parallel>], iteration_bounds = array<i64: 1>, scalar_prefetch = 0 : i64, scratch_operands = 0 : i64, tpu.core_type = #tpu.core_type<tc>, window_params = [{transform_indices = @transform_0, window_bounds = array<i64: 16, 64>}, {pipeline_mode = #tpu.pipeline_mode<synchronous>, transform_indices = @transform_1, window_bounds = array<i64: 64, 512>}, {pipeline_mode = #tpu.pipeline_mode<synchronous>, transform_indices = @transform_2, window_bounds = array<i64: 1, 512>}, {pipeline_mode = #tpu.pipeline_mode<synchronous>, transform_indices = @transform_3, window_bounds = array<i64: 512, 256>}, {pipeline_mode = #tpu.pipeline_mode<synchronous>, transform_indices = @transform_4, window_bounds = array<i64: 1, 256>}, {pipeline_mode = #tpu.pipeline_mode<synchronous>, transform_indices = @transform_5, window_bounds = array<i64: 1, 256>}, {pipeline_mode = #tpu.pipeline_mode<synchronous>, transform_indices = @transform_6, window_bounds = array<i64: 1, 1>}, {transform_indices = @transform_7, window_bounds = array<i64: 16, 1>}]} {
    %c0 = arith.constant 0 : index
    %c0_0 = arith.constant 0 : index
    %0 = vector.load %arg1[%c0, %c0_0] : memref<16x64xbf16, #tpu.memory_space<vmem>>, vector<16x64xbf16>
    %c0_1 = arith.constant 0 : index
    %c0_2 = arith.constant 0 : index
    %1 = vector.load %arg2[%c0_1, %c0_2] : memref<64x512xbf16, #tpu.memory_space<vmem>>, vector<64x512xbf16>
    %cst = arith.constant dense<0.000000e+00> : vector<16x512xf32>
    %2 = tpu.matmul %0, %1, %cst {dimension_numbers = #tpu.dot_dimension_numbers<[1], [0], [0], [1], [0, 0, 1, 1], [], []>} : vector<16x64xbf16>, vector<64x512xbf16>, vector<16x512xf32> -> vector<16x512xf32>
    %c0_3 = arith.constant 0 : index
    %c0_4 = arith.constant 0 : index
    %3 = vector.load %arg3[%c0_3, %c0_4] : memref<1x512xf32, #tpu.memory_space<vmem>>, vector<1x512xf32>
    %4 = vector.broadcast %3 : vector<1x512xf32> to vector<16x512xf32>
    %5 = arith.addf %2, %4 : vector<16x512xf32>
    %cst_5 = arith.constant 5.000000e-01 : f32
    %6 = vector.broadcast %cst_5 : f32 to vector<16x512xf32>
    %7 = arith.mulf %6, %5 : vector<16x512xf32>
    %cst_6 = arith.constant 0.707106769 : f32
    %8 = vector.broadcast %cst_6 : f32 to vector<16x512xf32>
    %9 = arith.mulf %5, %8 : vector<16x512xf32>
    %cst_7 = arith.constant 0.000000e+00 : f32
    %10 = vector.broadcast %cst_7 : f32 to vector<16x512xf32>
    %11 = arith.cmpf oge, %9, %10 : vector<16x512xf32>
    %cst_8 = arith.constant 1.000000e+00 : f32
    %cst_9 = arith.constant -1.000000e+00 : f32
    %12 = vector.broadcast %cst_8 : f32 to vector<16x512xf32>
    %13 = vector.broadcast %cst_9 : f32 to vector<16x512xf32>
    %14 = arith.select %11, %12, %13 : vector<16x512xi1>, vector<16x512xf32>
    %15 = math.absf %9 : vector<16x512xf32>
    %cst_10 = arith.constant 0.327591091 : f32
    %16 = vector.broadcast %cst_10 : f32 to vector<16x512xf32>
    %17 = arith.mulf %16, %15 : vector<16x512xf32>
    %cst_11 = arith.constant 1.000000e+00 : f32
    %18 = vector.broadcast %cst_11 : f32 to vector<16x512xf32>
    %19 = arith.addf %18, %17 : vector<16x512xf32>
    %20 = tpu.reciprocal %19 {approx = true} : vector<16x512xf32> -> vector<16x512xf32>
    %cst_12 = arith.constant 1.06140542 : f32
    %21 = vector.broadcast %cst_12 : f32 to vector<16x512xf32>
    %22 = arith.mulf %20, %21 : vector<16x512xf32>
    %cst_13 = arith.constant -1.45315206 : f32
    %23 = vector.broadcast %cst_13 : f32 to vector<16x512xf32>
    %24 = arith.addf %23, %22 : vector<16x512xf32>
    %25 = arith.mulf %20, %24 : vector<16x512xf32>
    %cst_14 = arith.constant 1.42141378 : f32
    %26 = vector.broadcast %cst_14 : f32 to vector<16x512xf32>
    %27 = arith.addf %26, %25 : vector<16x512xf32>
    %28 = arith.mulf %20, %27 : vector<16x512xf32>
    %cst_15 = arith.constant -0.284496725 : f32
    %29 = vector.broadcast %cst_15 : f32 to vector<16x512xf32>
    %30 = arith.addf %29, %28 : vector<16x512xf32>
    %31 = arith.mulf %20, %30 : vector<16x512xf32>
    %cst_16 = arith.constant 0.254829586 : f32
    %32 = vector.broadcast %cst_16 : f32 to vector<16x512xf32>
    %33 = arith.addf %32, %31 : vector<16x512xf32>
    %34 = arith.mulf %20, %33 : vector<16x512xf32>
    %cst_17 = arith.constant 0.000000e+00 : f32
    %35 = vector.broadcast %cst_17 : f32 to vector<16x512xf32>
    %36 = arith.subf %35, %15 : vector<16x512xf32>
    %37 = arith.mulf %36, %15 : vector<16x512xf32>
    %38 = math.exp %37 : vector<16x512xf32>
    %39 = arith.mulf %34, %38 : vector<16x512xf32>
    %cst_18 = arith.constant 1.000000e+00 : f32
    %40 = vector.broadcast %cst_18 : f32 to vector<16x512xf32>
    %41 = arith.subf %40, %39 : vector<16x512xf32>
    %42 = arith.mulf %14, %41 : vector<16x512xf32>
    %cst_19 = arith.constant 1.000000e+00 : f32
    %43 = vector.broadcast %cst_19 : f32 to vector<16x512xf32>
    %44 = arith.addf %43, %42 : vector<16x512xf32>
    %45 = arith.mulf %7, %44 : vector<16x512xf32>
    %46 = arith.truncf %45 : vector<16x512xf32> to vector<16x512xbf16>
    %c0_20 = arith.constant 0 : index
    %c0_21 = arith.constant 0 : index
    %47 = vector.load %arg4[%c0_20, %c0_21] : memref<512x256xbf16, #tpu.memory_space<vmem>>, vector<512x256xbf16>
    %cst_22 = arith.constant dense<0.000000e+00> : vector<16x256xf32>
    %48 = tpu.matmul %46, %47, %cst_22 {dimension_numbers = #tpu.dot_dimension_numbers<[1], [0], [0], [1], [0, 0, 1, 1], [], []>} : vector<16x512xbf16>, vector<512x256xbf16>, vector<16x256xf32> -> vector<16x256xf32>
    %c0_23 = arith.constant 0 : index
    %c0_24 = arith.constant 0 : index
    %49 = vector.load %arg5[%c0_23, %c0_24] : memref<1x256xf32, #tpu.memory_space<vmem>>, vector<1x256xf32>
    %50 = vector.broadcast %49 : vector<1x256xf32> to vector<16x256xf32>
    %51 = arith.addf %48, %50 : vector<16x256xf32>
    %cst_25 = arith.constant 5.000000e-01 : f32
    %52 = vector.broadcast %cst_25 : f32 to vector<16x256xf32>
    %53 = arith.mulf %52, %51 : vector<16x256xf32>
    %cst_26 = arith.constant 0.707106769 : f32
    %54 = vector.broadcast %cst_26 : f32 to vector<16x256xf32>
    %55 = arith.mulf %51, %54 : vector<16x256xf32>
    %cst_27 = arith.constant 0.000000e+00 : f32
    %56 = vector.broadcast %cst_27 : f32 to vector<16x256xf32>
    %57 = arith.cmpf oge, %55, %56 : vector<16x256xf32>
    %cst_28 = arith.constant 1.000000e+00 : f32
    %cst_29 = arith.constant -1.000000e+00 : f32
    %58 = vector.broadcast %cst_28 : f32 to vector<16x256xf32>
    %59 = vector.broadcast %cst_29 : f32 to vector<16x256xf32>
    %60 = arith.select %57, %58, %59 : vector<16x256xi1>, vector<16x256xf32>
    %61 = math.absf %55 : vector<16x256xf32>
    %cst_30 = arith.constant 0.327591091 : f32
    %62 = vector.broadcast %cst_30 : f32 to vector<16x256xf32>
    %63 = arith.mulf %62, %61 : vector<16x256xf32>
    %cst_31 = arith.constant 1.000000e+00 : f32
    %64 = vector.broadcast %cst_31 : f32 to vector<16x256xf32>
    %65 = arith.addf %64, %63 : vector<16x256xf32>
    %66 = tpu.reciprocal %65 {approx = true} : vector<16x256xf32> -> vector<16x256xf32>
    %cst_32 = arith.constant 1.06140542 : f32
    %67 = vector.broadcast %cst_32 : f32 to vector<16x256xf32>
    %68 = arith.mulf %66, %67 : vector<16x256xf32>
    %cst_33 = arith.constant -1.45315206 : f32
    %69 = vector.broadcast %cst_33 : f32 to vector<16x256xf32>
    %70 = arith.addf %69, %68 : vector<16x256xf32>
    %71 = arith.mulf %66, %70 : vector<16x256xf32>
    %cst_34 = arith.constant 1.42141378 : f32
    %72 = vector.broadcast %cst_34 : f32 to vector<16x256xf32>
    %73 = arith.addf %72, %71 : vector<16x256xf32>
    %74 = arith.mulf %66, %73 : vector<16x256xf32>
    %cst_35 = arith.constant -0.284496725 : f32
    %75 = vector.broadcast %cst_35 : f32 to vector<16x256xf32>
    %76 = arith.addf %75, %74 : vector<16x256xf32>
    %77 = arith.mulf %66, %76 : vector<16x256xf32>
    %cst_36 = arith.constant 0.254829586 : f32
    %78 = vector.broadcast %cst_36 : f32 to vector<16x256xf32>
    %79 = arith.addf %78, %77 : vector<16x256xf32>
    %80 = arith.mulf %66, %79 : vector<16x256xf32>
    %cst_37 = arith.constant 0.000000e+00 : f32
    %81 = vector.broadcast %cst_37 : f32 to vector<16x256xf32>
    %82 = arith.subf %81, %61 : vector<16x256xf32>
    %83 = arith.mulf %82, %61 : vector<16x256xf32>
    %84 = math.exp %83 : vector<16x256xf32>
    %85 = arith.mulf %80, %84 : vector<16x256xf32>
    %cst_38 = arith.constant 1.000000e+00 : f32
    %86 = vector.broadcast %cst_38 : f32 to vector<16x256xf32>
    %87 = arith.subf %86, %85 : vector<16x256xf32>
    %88 = arith.mulf %60, %87 : vector<16x256xf32>
    %cst_39 = arith.constant 1.000000e+00 : f32
    %89 = vector.broadcast %cst_39 : f32 to vector<16x256xf32>
    %90 = arith.addf %89, %88 : vector<16x256xf32>
    %91 = arith.mulf %53, %90 : vector<16x256xf32>
    %c0_40 = arith.constant 0 : index
    %c0_41 = arith.constant 0 : index
    %92 = vector.load %arg6[%c0_40, %c0_41] : memref<1x256xf32, #tpu.memory_space<vmem>>, vector<1x256xf32>
    %93 = vector.broadcast %92 : vector<1x256xf32> to vector<16x256xf32>
    %94 = arith.mulf %91, %93 : vector<16x256xf32>
    %cst_42 = arith.constant dense<0.000000e+00> : vector<16xf32>
    %95 = vector.multi_reduction <add>, %94, %cst_42 [1] : vector<16x256xf32> to vector<16xf32>
    %96 = vector.shape_cast %95 : vector<16xf32> to vector<16x1xf32>
    %c0_43 = arith.constant 0 : index
    %c0_44 = arith.constant 0 : index
    %97 = vector.load %arg7[%c0_43, %c0_44] : memref<1x1xf32, #tpu.memory_space<vmem>>, vector<1x1xf32>
    %98 = vector.broadcast %97 : vector<1x1xf32> to vector<16x1xf32>
    %99 = arith.addf %96, %98 : vector<16x1xf32>
    %100 = arith.negf %99 : vector<16x1xf32>
    %101 = math.exp %100 : vector<16x1xf32>
    %cst_45 = arith.constant 1.000000e+00 : f32
    %102 = vector.broadcast %cst_45 : f32 to vector<16x1xf32>
    %103 = arith.addf %102, %101 : vector<16x1xf32>
    %104 = arith.divf %102, %103 : vector<16x1xf32>
    %c0_46 = arith.constant 0 : index
    %c0_47 = arith.constant 0 : index
    %105 = vector.load %arg8[%c0_46, %c0_47] : memref<16x1xf32, #tpu.memory_space<vmem>>, vector<16x1xf32>
    tpu.vector_store %arg8[%c0_46, %c0_47], %104 {strides = array<i32>} : memref<16x1xf32, #tpu.memory_space<vmem>>, vector<16x1xf32>,
    return
  }
  func.func @transform_0(%arg0: i32) -> (i32, i32) {
    %c0_i32 = arith.constant 0 : i32
    %c0_i32_0 = arith.constant 0 : i32
    return %arg0, %c0_i32 : i32, i32
  }
  func.func @transform_1(%arg0: i32) -> (i32, i32) {
    %c0_i32 = arith.constant 0 : i32
    %c0_i32_0 = arith.constant 0 : i32
    %c0_i32_1 = arith.constant 0 : i32
    return %c0_i32, %c0_i32_0 : i32, i32
  }
  func.func @transform_2(%arg0: i32) -> (i32, i32) {
    %c0_i32 = arith.constant 0 : i32
    %c0_i32_0 = arith.constant 0 : i32
    %c0_i32_1 = arith.constant 0 : i32
    return %c0_i32, %c0_i32_0 : i32, i32
  }
  func.func @transform_3(%arg0: i32) -> (i32, i32) {
    %c0_i32 = arith.constant 0 : i32
    %c0_i32_0 = arith.constant 0 : i32
    %c0_i32_1 = arith.constant 0 : i32
    return %c0_i32, %c0_i32_0 : i32, i32
  }
  func.func @transform_4(%arg0: i32) -> (i32, i32) {
    %c0_i32 = arith.constant 0 : i32
    %c0_i32_0 = arith.constant 0 : i32
    %c0_i32_1 = arith.constant 0 : i32
    return %c0_i32, %c0_i32_0 : i32, i32
  }
  func.func @transform_5(%arg0: i32) -> (i32, i32) {
    %c0_i32 = arith.constant 0 : i32
    %c0_i32_0 = arith.constant 0 : i32
    %c0_i32_1 = arith.constant 0 : i32
    return %c0_i32, %c0_i32_0 : i32, i32
  }
  func.func @transform_6(%arg0: i32) -> (i32, i32) {
    %c0_i32 = arith.constant 0 : i32
    %c0_i32_0 = arith.constant 0 : i32
    %c0_i32_1 = arith.constant 0 : i32
    return %c0_i32, %c0_i32_0 : i32, i32
  }
  func.func @transform_7(%arg0: i32) -> (i32, i32) {
    %c0_i32 = arith.constant 0 : i32
    %c0_i32_0 = arith.constant 0 : i32
    return %arg0, %c0_i32 : i32, i32
  }
}

</mosaic_0001>

<bundles_post_ra>
// kernel: tile.23
= control target key start
LH: loop header
LB: loop body
LE: loop exit
PB: predicated region body
PF: predicated region fallthrough
CT: control target
= control target key end

     0   :  { %s22_s0 = inlined_call_operand.vmem [shape: f32[2], index: 0, kind: input, shape index: {}]   ;;  %s23_s1 = inlined_call_operand.vmem [shape: f32[2,2], index: 1, kind: output, shape index: {}]  }
   0x1   :  { %v4_v0 = vld [vmem:[%s22_s0] ss:$0 sm:$0xff] }
   0x2   :  { %5 = vst [vmem:[%s23_s1] sm:$0x3] %v4_v0 }

// kernel: tile.24
= control target key start
LH: loop header
LB: loop body
LE: loop exit
PB: predicated region body
PF: predicated region fallthrough
CT: control target
= control target key end

     0   :  { %vm7_vm0 = vcmask 15360   ;;  %vm13_vm1 = vcmask 31760   ;;  %s39_s0 = inlined_call_operand.vmem [shape: f32[2,2], index: 0, kind: input, shape index: {}]   ;;  %s40_s1 = inlined_call_operand.vmem [shape: f32[4], index: 1, kind: output, shape index: {}]  }
   0x1   :  { %v4_v0 = vld [vmem:[%s39_s0] sm:$0x3]  ;;  %s22_s0 = smov 2  }
   0x2   :  { %5 = vst [vmem:[#allocation1] sm:$0x3] %v4_v0 }
   0x9   :  { %v10_v1 = vld [vmem:[#allocation1 + $0x1] sm:$0x1]   ;;  %v6_v2 = vld [vmem:[#allocation1] sm:$0x1]  }
   0xa   :  { %11 = vrot.lane.b32.xlu0 %v10_v1, %s22_s0  ;;  %8 = vst.msk [vmem:[#allocation0] sm:$0x1] %vm7_vm0, %v6_v2  }
  0x7c   :  { %v12_v3 = vpop.permute.xlu0 %11  }
  0x7d   :  { %14 = vst.msk [vmem:[#allocation0] sm:$0x1] %vm13_vm1, %v12_v3  }
  0x84   :  { %v17_v4 = vld [vmem:[#allocation0] sm:$0x1] }
  0x85   :  { %20 = vst [vmem:[%s40_s1] sm:$0x1] %v17_v4 }

// kernel: cl4kt_forward.22
= control target key start
LH: loop header
LB: loop body
LE: loop exit
PB: predicated region body
PF: predicated region fallthrough
CT: control target
= control target key end

     0   :  { %vm19_vm0 = vcmask 523264   ;;  %v108_v1 = vmov 0.0   ;;  %vm47_vm1 = vcmask 261120   ;;  %vm83_vm2 = vcmask 519168   ;;  %s151_s1 = inlined_call_operand.vmem [shape: bf16[32,64], index: 1, kind: input, shape index: {}]   ;;  %s152_s2 = inlined_call_operand.vmem [shape: f32[1,64], index: 2, kind: input, shape index: {}]   ;;  %s153_s0 = inlined_call_operand.vmem [shape: bf16[16,32], index: 0, kind: input, shape index: {}]   ;;  %s154_s3 = inlined_call_operand.vmem [shape: bf16[16,64], index: 3, kind: output, shape index: {}]  }
   0x1   :  { %v105_v0 = vld [vmem:[%s151_s1 + $0x8] sm:$0xff]  ;;  %20 = vst.msk [vmem:[#allocation2] sm:$0xff] %vm19_vm0, %v108_v1  ;;  %v104_v2 = vld [vmem:[%s151_s1] sm:$0xff] }
   0x2   :  { %21 = vst.msk [vmem:[#allocation2 + $0x8] sm:$0xff] %vm19_vm0, %v108_v1  ;;  %57 = vmatpush.bf16.msra.mxu0 %v105_v0  ;;  %v103_v3 = vld [vmem:[%s153_s0] sm:$0xff] }
   0x3   :  { %v107_v8 = vld [vmem:[%s152_s2] ss:$0 sm:$0xff] }
   0x6   :  { %58 = vmatpush.bf16.msra.mxu0 %v104_v2 }
   0x8   :  { %v22_v4 = vld [vmem:[#allocation2] sm:$0xff] }
   0x9   :  { %102 = vmatmul.msk.bf16.vlgmr.msra.gmra.mxu0 %vm47_vm1, %v103_v3  ;;  %v23_v7 = vld [vmem:[#allocation2 + $0x8] sm:$0xff] }
  0x86   :  { %v60_v5 = vpop.f32.mrf.mxu0 }
  0x87   :  { %v65_v6 = vadd.f32 %v60_v5, %v22_v4 }
  0x89   :  { %68 = vst.msk [vmem:[#allocation2] sm:$0xff] %vm19_vm0, %v65_v6 }
  0x8e   :  { %v62_v9 = vpop.f32.mrf.mxu0 }
  0x8f   :  { %v66_v10 = vadd.f32 %v62_v9, %v23_v7 }
  0x90   :  { %v73_v11 = vld [vmem:[#allocation2] sm:$0xff] }
  0x91   :  { %v79_v12 = vadd.f32 %v107_v8, %v73_v11  ;;  %69 = vst.msk [vmem:[#allocation2 + $0x8] sm:$0xff] %vm19_vm0, %v66_v10 }
  0x93   :  { %v81_v13 = vpack.c.bf16 %v79_v12, %v79_v12 }
  0x95   :  { %84 = vst.msk [vmem:[%s154_s3] sm:$0xf] %vm83_vm2, %v81_v13 }
  0x98   :  { %v74_v14 = vld [vmem:[#allocation2 + $0x8] sm:$0xff] }
  0x99   :  { %v80_v15 = vadd.f32 %v107_v8, %v74_v14 }
  0x9b   :  { %v82_v16 = vpack.c.bf16 %v80_v15, %v80_v15 }
  0x9d   :  { %85 = vst.msk [vmem:[%s154_s3 + $0x4] sm:$0xf] %vm83_vm2, %v82_v16 }

// kernel: cl4kt_forward.23
= control target key start
LH: loop header
LB: loop body
LE: loop exit
PB: predicated region body
PF: predicated region fallthrough
CT: control target
= control target key end

     0   :  { %13 = vsyncpa [#allocation3], 0  ;;  %s828_s27 = smov 0   ;;  %s908_s0 = inlined_call_operand.vmem [shape: f32[4], index: 0, kind: input, shape index: {}]   ;;  %s909_s1 = inlined_call_operand.vmem [shape: bf16[4,8,16], index: 1, kind: input, shape index: {}, may-alias: {1,2}]   ;;  %s910_s2 = inlined_call_operand.vmem [shape: bf16[4,8,16], index: 2, kind: input, shape index: {}, may-alias: {1,2}]   ;;  %s911_s3 = inlined_call_operand.vmem [shape: bf16[4,8,16], index: 3, kind: input, shape index: {}]   ;;  %s912_s4 = inlined_call_operand.vmem [shape: f32[8,8], index: 4, kind: input, shape index: {}]   ;;  %s913_s5 = inlined_call_operand.vmem [shape: f32[8,8], index: 5, kind: input, shape index: {}]   ;;  %s914_s6 = inlined_call_operand.vmem [shape: bf16[8,8], index: 6, kind: input, shape index: {}]   ;;  %s915_s7 = inlined_call_operand.vmem [shape: f32[8,8], index: 7, kind: input, shape index: {}]   ;;  %s916_s8 = inlined_call_operand.vmem [shape: bf16[4,8,16], index: 8, kind: output, shape index: {}]  }
   0x1 LB: > { %s689_s28 = sadd.s32 4294967295, %s780_s27   ;;  %p691_p0 = scmp.ge.s32.totalorder %s780_s27, 1  ;;  %s780_s27 = sphi %s828_s27, %s19_s27  }
   0x2   : > { %p233_p1 = scmp.lt.s32.totalorder %s780_s27, 3  ;;  %s245_s9 = sshll.u32 %s908_s0, 4  ;;  %s246_s9 = int_to_ptr.vmem [resolvable:$true] %s245_s9 }
   0x3   : > { %p720_p3 = scmp.eq.s32.totalorder %s689_s28, 0  ;;  %s782_s10 = smov [#allocation2]  }
   0x4   : > { %p234_p2 = pnand %p691_p0, %p233_p1 }
   0x6   : > { %p716_p4 = pneg %p234_p2  ;;  %297 = sbr.rel (%p234_p2) target bundleno = 1012 (0x3f4), region = 52 }
   0x8   : > { %p717_p5 = pnand %p720_p3, %p716_p4 }
   0xa   : > { %719 = dma.vmem_to_smem (!%p717_p5), %s246_s9, 16, %s782_s10, [#allocation3]  }
   0xb   : > { %775 = dma.done.wait (%p720_p3), [#allocation3], 16  }
   0xc   : > { %777 = vsyncadd (%p720_p3), [#allocation3], 4294967280 }
   0xd   : > { %304 = sfence }
   0xe   : > { %s839_s11 = sshll.u32 %s689_s28, 1  ;;  %vm377_vm0 = vcmask 130048   ;;  %v856_v8 = vld [vmem:[%s912_s4] sm:$0xff]  ;;  %vm420_vm1 = vcmask 64512   ;;  %vm456_vm2 = vcmask 1043456   ;;  %vm594_vm7 = vcmask 125952  }
   0xf   : > { %p344_p6 = scmp.lt.s32.totalorder %s839_s11, 3  ;;  %v447_v27 = vld [vmem:[%s914_s6] sm:$0xf]  ;;  %s511_s29 = sld [smem:[#allocation2 + %s839_s11]] }
  0x10   : > { %v458_v28 = vsel %vm456_vm2, %v447_v27, 0  ;;  %v375_v31 = vld [vmem:[%s913_s5] sm:$0xff]  ;;  %s513_s30 = sadd.s32 1, %s839_s11 }
  0x11   : > { %s345_s12 = scalar_select %p344_p6, %s839_s11, 3  ;;  %467 = vmatpush.bf16.msra.mxu2 %v458_v28  ;;  %v376_v46 = vld [vmem:[%s915_s7] sm:$0xff] }
  0x12   : > { %s514_s9 = sld [smem:[#allocation2 + %s513_s30]] }
  0x13   : > { %s843_s13 = sshll.u32 %s345_s12, 2 }
  0x14   : > { %s353_s16 = scalar_lea.vmem %s910_s2, %s843_s13  ;;  %s347_s19 = scalar_lea.vmem %s909_s1, %s843_s13 }
  0x15   : > { %v370_v0 = vld [vmem:[%s353_s16] sm:$0xf]  ;;  %v371_v1 = vld [vmem:[%s353_s16 + $0x4] sm:$0xf]  ;;  %s359_s12 = scalar_lea.vmem %s911_s3, %s843_s13  ;;  %s365_s16 = scalar_lea.vmem %s916_s8, %s843_s13 }
  0x16   : > { %v382_v2 = vsel %vm377_vm0, %v370_v0, 0  ;;  %v401_v3 = vsel %vm377_vm0, %v371_v1, 0  ;;  %v368_v4 = vld [vmem:[%s347_s19] sm:$0xf]  ;;  %v369_v5 = vld [vmem:[%s347_s19 + $0x4] sm:$0xf] }
  0x17   : > { %391 = vmatpush.bf16.xpose.msra.mxu0 %v382_v2  ;;  %410 = vmatpush.bf16.xpose.msra.mxu1 %v401_v3  ;;  %v512_v3 = vstv %s511_s29 }
  0x1e   : > { %704 = vmatmul.msk.bf16.vlgmr.msra.gmra.mxu0 %vm377_vm0, %v368_v4  ;;  %705 = vmatmul.msk.bf16.vlgmr.msra.gmra.mxu1 %vm377_vm0, %v369_v5 }
  0x9b   : > { %v393_v6 = vpop.f32.mrf.mxu0  ;;  %v412_v7 = vpop.f32.mrf.mxu1 }
  0x9c   : > { %v858_v9 = vmul.f32 0.25, %v393_v6  ;;  %v860_v10 = vmul.f32 0.25, %v412_v7 }
  0x9e   : > { %v418_v11 = vadd.f32 %v858_v9, %v856_v8  ;;  %v419_v13 = vadd.f32 %v860_v10, %v856_v8 }
  0xa0   : > { %v421_v12 = vsel %vm420_vm1, %v418_v11, -inf  ;;  %v424_v16 = vsel %vm420_vm1, %v419_v13, -inf }
  0xa1   : > { %422 = vmax.xlane.f32.xlu0 %v421_v12 }
  0xa3   : > { %v395_v14 = vpop.f32.mrf.mxu0  ;;  %v414_v15 = vpop.f32.mrf.mxu1 }
  0xa9   : > { %425 = vmax.xlane.f32.xlu0 %v424_v16  ;;  %v515_v16 = vstv %s514_s9 }
 0x114   : > { %v423_v17 = vpop.xlane.xlu0 %422 }
 0x115   : > { %v427_v18 = vsub.f32 %v418_v11, %v423_v17 }
 0x117   : > { %v429_v19 = vmul.f32 1.442695, %v427_v18 }
 0x119   : > { %731 = vpow2.f32 %v429_v19 }
 0x11c   : > { %v426_v20 = vpop.xlane.xlu0 %425 }
 0x11d   : > { %v428_v21 = vsub.f32 %v419_v13, %v426_v20 }
 0x11f   : > { %v732_v22 = vpop.eup %731  ;;  %v431_v23 = vmul.f32 1.442695, %v428_v21 }
 0x120   : > { %v433_v24 = vsel %vm420_vm1, %v732_v22, 0.0 }
 0x121   : > { %733 = vpow2.f32 %v431_v23  ;;  %434 = vadd.xlane.f32.xlu1 %v433_v24 }
 0x127   : > { %v734_v25 = vpop.eup %733 }
 0x128   : > { %v436_v26 = vsel %vm420_vm1, %v734_v25, 0.0 }
 0x129   : > { %437 = vadd.xlane.f32.xlu1 %v436_v26 }
 0x194   : > { %v435_v29 = vpop.xlane.xlu1 %434 }
 0x195   : > { %735 = vrcp.f32 %v435_v29 }
 0x19b   : > { %v736_v30 = vpop.eup %735 }
 0x19c   : > { %v438_v32 = vpop.xlane.xlu1 %437  ;;  %v441_v33 = vmul.f32 %v736_v30, %v732_v22 }
 0x19d   : > { %737 = vrcp.f32 %v438_v32 }
 0x19e   : > { %v443_v34 = vmul.f32 %v441_v33, %v375_v31 }
 0x1a0   : > { %v474_v35 = vsel %vm420_vm1, %v443_v34, 0.0  ;;  %v445_v38 = vpack.c.bf16 %v443_v34, %v443_v34 }
 0x1a1   : > { %475 = vadd.xlane.f32.xlu2 %v474_v35 }
 0x1a2   : > { %v450_v42 = vunpack.c.l.b16 %v445_v38 }
 0x1a3   : > { %v738_v36 = vpop.eup %737 }
 0x1a4   : > { %v442_v37 = vmul.f32 %v738_v36, %v734_v25 }
 0x1a6   : > { %v444_v39 = vmul.f32 %v442_v37, %v375_v31 }
 0x1a8   : > { %v477_v40 = vsel %vm420_vm1, %v444_v39, 0.0  ;;  %v446_v41 = vpack.c.bf16 %v444_v39, %v444_v39 }
 0x1a9   : > { %478 = vadd.xlane.f32.xlu2 %v477_v40 }
 0x1aa   : > { %v451_v43 = vunpack.c.l.b16 %v446_v41 }
 0x1ac   : > { %v452_v44 = vpack.c.b16 %v451_v43, %v450_v42  ;;  %v372_v42 = vld [vmem:[%s359_s12] sm:$0xf] }
 0x1ad   : > { %v558_v43 = vsel %vm456_vm2, %v372_v42, 0 }
 0x1ae   : > { %706 = vmatmul.msk.bf16.vlgmr.msra.gmra.mxu2 %vm420_vm1, %v452_v44  ;;  %567 = vmatpush.bf16.msra.mxu3 %v558_v43 }
 0x214   : > { %v476_v45 = vpop.xlane.xlu2 %475 }
 0x21c   : > { %v479_v51 = vpop.xlane.xlu2 %478 }
 0x231   : > { %v469_v47 = vpop.f32.mrf.mxu2 }
 0x232   : > { %v480_v48 = vsub.f32 %v476_v45, %v469_v47 }
 0x234   : > { %v482_v49 = vmul.f32 %v480_v48, %v376_v46 }
 0x236   : > { %v484_v50 = vmax.f32 %v482_v49, 0.0 }
 0x238   : > { %739 = vrsqrt.f32 %v484_v50  ;;  %vm493_vm3 = vcmp.eq.f32.partialorder %v484_v50, inf  ;;  %v496_v2 = vand.u32 2147483648, %v484_v50  ;;  %vm495_vm4 = vcmp.eq.f32.partialorder %v484_v50, 0.0 }
 0x239   : > { %v471_v52 = vpop.f32.mrf.mxu2 }
 0x23a   : > { %v481_v53 = vsub.f32 %v479_v51, %v471_v52 }
 0x23c   : > { %v483_v54 = vmul.f32 %v481_v53, %v376_v46 }
 0x23e   : > { %v740_v55 = vpop.eup %739  ;;  %v485_v56 = vmax.f32 %v483_v54, 0.0 }
 0x23f   : > { %v487_v57 = vmul.f32 %v740_v55, %v484_v50 }
 0x240   : > { %741 = vrsqrt.f32 %v485_v56  ;;  %vm505_vm5 = vcmp.eq.f32.partialorder %v485_v56, inf  ;;  %v508_v15 = vand.u32 2147483648, %v485_v56  ;;  %vm507_vm6 = vcmp.eq.f32.partialorder %v485_v56, 0.0 }
 0x241   : > { %v488_v58 = vmul.f32 %v740_v55, %v487_v57 }
 0x243   : > { %v489_v59 = vmul.f32 0.5, %v488_v58 }
 0x245   : > { %v490_v60 = vsub.f32 1.5, %v489_v59 }
 0x246   : > { %v742_v61 = vpop.eup %741 }
 0x247   : > { %v491_v62 = vmul.f32 %v740_v55, %v490_v60  ;;  %v499_v63 = vmul.f32 %v742_v61, %v485_v56 }
 0x249   : > { %v492_v0 = vmul.f32 %v491_v62, %v484_v50  ;;  %v500_v1 = vmul.f32 %v742_v61, %v499_v63 }
 0x24b   : > { %v494_v4 = vsel %vm493_vm3, %v484_v50, %v492_v0  ;;  %v501_v5 = vmul.f32 0.5, %v500_v1 }
 0x24c   : > { %v497_v6 = vsel %vm495_vm4, %v496_v2, %v494_v4 }
 0x24d   : > { %v516_v7 = vmul.f32 %v512_v3, %v497_v6  ;;  %v502_v11 = vsub.f32 1.5, %v501_v5 }
 0x24f   : > { %v518_v12 = vmul.f32 1.442695, %v516_v7  ;;  %v503_v13 = vmul.f32 %v742_v61, %v502_v11 }
 0x251   : > { %743 = vpow2.f32 %v518_v12  ;;  %v504_v14 = vmul.f32 %v503_v13, %v485_v56 }
 0x253   : > { %v506_v17 = vsel %vm505_vm5, %v485_v56, %v504_v14 }
 0x254   : > { %v509_v18 = vsel %vm507_vm6, %v508_v15, %v506_v17 }
 0x255   : > { %v517_v19 = vmul.f32 %v515_v16, %v509_v18 }
 0x257   : > { %v744_v20 = vpop.eup %743  ;;  %v520_v21 = vmul.f32 1.442695, %v517_v19 }
 0x258   : > { %v522_v22 = vmax.f32 %v744_v20, 1e-05 }
 0x259   : > { %745 = vpow2.f32 %v520_v21 }
 0x25a   : > { %v524_v23 = vmin.f32 %v522_v22, 100000.0 }
 0x25c   : > { %v526_v24 = vmul.f32 %v524_v23, %v858_v9 }
 0x25e   : > { %v528_v25 = vadd.f32 %v526_v24, %v856_v8 }
 0x25f   : > { %v746_v26 = vpop.eup %745 }
 0x260   : > { %v530_v27 = vsel %vm420_vm1, %v528_v25, -inf  ;;  %v523_v28 = vmax.f32 %v746_v26, 1e-05 }
 0x261   : > { %531 = vmax.xlane.f32.xlu0 %v530_v27 }
 0x262   : > { %v525_v29 = vmin.f32 %v523_v28, 100000.0 }
 0x264   : > { %v527_v30 = vmul.f32 %v525_v29, %v860_v10 }
 0x266   : > { %v529_v31 = vadd.f32 %v527_v30, %v856_v8  ;;  %v373_v8 = vld [vmem:[%s359_s12 + $0x4] sm:$0xf] }
 0x267   : > { %v577_v41 = vsel %vm456_vm2, %v373_v8, 0 }
 0x268   : > { %v533_v32 = vsel %vm420_vm1, %v529_v31, -inf  ;;  %586 = vmatpush.bf16.msrb.mxu2 %v577_v41 }
 0x269   : > { %534 = vmax.xlane.f32.xlu1 %v533_v32 }
 0x2d4   : > { %v532_v33 = vpop.xlane.xlu0 %531 }
 0x2d5   : > { %v536_v34 = vsub.f32 %v528_v25, %v532_v33 }
 0x2d7   : > { %v538_v35 = vmul.f32 1.442695, %v536_v34 }
 0x2d9   : > { %747 = vpow2.f32 %v538_v35 }
 0x2dc   : > { %v535_v9 = vpop.xlane.xlu1 %534 }
 0x2dd   : > { %v537_v36 = vsub.f32 %v529_v31, %v535_v9 }
 0x2df   : > { %v748_v37 = vpop.eup %747  ;;  %v540_v38 = vmul.f32 1.442695, %v537_v36 }
 0x2e0   : > { %v542_v39 = vsel %vm420_vm1, %v748_v37, 0.0 }
 0x2e1   : > { %749 = vpow2.f32 %v540_v38  ;;  %543 = vadd.xlane.f32.xlu2 %v542_v39 }
 0x2e7   : > { %v750_v40 = vpop.eup %749 }
 0x2e8   : > { %v545_v10 = vsel %vm420_vm1, %v750_v40, 0.0 }
 0x2e9   : > { %546 = vadd.xlane.f32.xlu0 %v545_v10 }
 0x354   : > { %v544_v44 = vpop.xlane.xlu2 %543 }
 0x355   : > { %751 = vrcp.f32 %v544_v44 }
 0x35b   : > { %v752_v45 = vpop.eup %751 }
 0x35c   : > { %v547_v46 = vpop.xlane.xlu0 %546  ;;  %v550_v47 = vmul.f32 %v752_v45, %v748_v37 }
 0x35d   : > { %753 = vrcp.f32 %v547_v46 }
 0x35e   : > { %v552_v48 = vpack.c.bf16 %v550_v47, %v550_v47 }
 0x360   : > { %708 = vmatmul.msk.bf16.vlgmr.msra.gmra.mxu3 %vm420_vm1, %v552_v48 }
 0x363   : > { %v754_v49 = vpop.eup %753 }
 0x364   : > { %v551_v50 = vmul.f32 %v754_v49, %v750_v40 }
 0x366   : > { %v553_v51 = vpack.c.bf16 %v551_v50, %v551_v50 }
 0x368   : > { %709 = vmatmul.msk.bf16.vlgmr.msrb.gmra.mxu2 %vm420_vm1, %v553_v51 }
 0x3e3   : > { %v569_v52 = vpop.f32.mrf.mxu3 }
 0x3e4   : > { %v592_v53 = vpack.c.bf16 %v569_v52, %v569_v52 }
 0x3e6   : > { %595 = vst.msk [vmem:[%s365_s16] sm:$0xf] %vm594_vm7, %v592_v53 }
 0x3eb   : > { %v571_v54 = vpop.f32.mrf.mxu3  ;;  %v588_v55 = vpop.f32.mrf.mxu2 }
 0x3ec   : > { %v593_v56 = vpack.c.bf16 %v588_v55, %v588_v55 }
 0x3ee   : > { %596 = vst.msk [vmem:[%s365_s16 + $0x4] sm:$0xf] %vm594_vm7, %v593_v56 }
 0x3f3   : > { %v590_v57 = vpop.f32.mrf.mxu2 }
 0x3f4 PF: > { %s19_s27 = sadd.s32 1, %s780_s27  }
 0x3f5   : > { %p16_p7 = scmp.ge.s32.totalorder %s19_s27, 4  }
 0x3f7   :  { %18 = sbr.rel (!%p16_p7) target bundleno = 1 (0x1), region = 93 }
 0x3fc   :  { %619 = vsyncpa [#allocation3], 1 }
 0x3fd   :  { %621 = vsyncpa [#allocation3 + $0x1], 1 }

// kernel: cl4kt_forward.25
= control target key start
LH: loop header
LB: loop body
LE: loop exit
PB: predicated region body
PF: predicated region fallthrough
CT: control target
= control target key end

     0   :  { %vm19_vm0 = vcmask 523264   ;;  %v169_v1 = vmov 0.0   ;;  %vm47_vm1 = vcmask 261120   ;;  %v170_v50 = vmov -1.0   ;;  %s213_s1 = inlined_call_operand.vmem [shape: bf16[32,64], index: 1, kind: input, shape index: {}]   ;;  %s214_s2 = inlined_call_operand.vmem [shape: f32[1,64], index: 2, kind: input, shape index: {}]   ;;  %s215_s0 = inlined_call_operand.vmem [shape: bf16[16,32], index: 0, kind: input, shape index: {}]   ;;  %s216_s3 = inlined_call_operand.vmem [shape: bf16[16,64], index: 3, kind: output, shape index: {}]  }
   0x1   :  { %v157_v0 = vld [vmem:[%s213_s1 + $0x8] sm:$0xff]  ;;  %20 = vst.msk [vmem:[#allocation2] sm:$0xff] %vm19_vm0, %v169_v1  ;;  %v156_v2 = vld [vmem:[%s213_s1] sm:$0xff]  ;;  %vm135_vm4 = vcmask 519168  }
   0x2   :  { %21 = vst.msk [vmem:[#allocation2 + $0x8] sm:$0xff] %vm19_vm0, %v169_v1  ;;  %57 = vmatpush.bf16.msra.mxu0 %v157_v0  ;;  %v155_v3 = vld [vmem:[%s215_s0] sm:$0xff] }
   0x3   :  { %v160_v8 = vld [vmem:[%s214_s2] ss:$0 sm:$0xff] }
   0x6   :  { %58 = vmatpush.bf16.msra.mxu0 %v156_v2 }
   0x8   :  { %v22_v4 = vld [vmem:[#allocation2] sm:$0xff] }
   0x9   :  { %154 = vmatmul.msk.bf16.vlgmr.msra.gmra.mxu0 %vm47_vm1, %v155_v3  ;;  %v23_v7 = vld [vmem:[#allocation2 + $0x8] sm:$0xff] }
  0x86   :  { %v60_v5 = vpop.f32.mrf.mxu0 }
  0x87   :  { %v65_v6 = vadd.f32 %v60_v5, %v22_v4 }
  0x89   :  { %68 = vst.msk [vmem:[#allocation2] sm:$0xff] %vm19_vm0, %v65_v6 }
  0x8e   :  { %v62_v9 = vpop.f32.mrf.mxu0 }
  0x8f   :  { %v66_v10 = vadd.f32 %v62_v9, %v23_v7 }
  0x90   :  { %v73_v11 = vld [vmem:[#allocation2] sm:$0xff] }
  0x91   :  { %v79_v12 = vadd.f32 %v160_v8, %v73_v11  ;;  %69 = vst.msk [vmem:[#allocation2 + $0x8] sm:$0xff] %vm19_vm0, %v66_v10 }
  0x93   :  { %v83_v13 = vmul.f32 0.70710677, %v79_v12  ;;  %v81_v54 = vmul.f32 0.5, %v79_v12 }
  0x95   :  { %v89_v14 = vand.u32 2147483647, %v83_v13  ;;  %vm85_vm2 = vcmp.ge.f32.partialorder %v83_v13, 0.0 }
  0x96   :  { %v87_v51 = vsel %vm85_vm2, 1.0, %v170_v50 }
  0x97   :  { %v91_v15 = vmul.f32 0.3275911, %v89_v14  ;;  %v115_v23 = vsub.f32 0.0, %v89_v14 }
  0x98   :  { %v74_v16 = vld [vmem:[#allocation2 + $0x8] sm:$0xff] }
  0x99   :  { %v93_v17 = vadd.f32 1.0, %v91_v15  ;;  %v80_v18 = vadd.f32 %v160_v8, %v74_v16  ;;  %v117_v27 = vmul.f32 %v115_v23, %v89_v14 }
  0x9b   :  { %161 = vrcp.f32 %v93_v17  ;;  %v84_v19 = vmul.f32 0.70710677, %v80_v18  ;;  %v119_v31 = vmul.f32 1.442695, %v117_v27  ;;  %v82_v0 = vmul.f32 0.5, %v80_v18 }
  0x9d   :  { %v90_v20 = vand.u32 2147483647, %v84_v19  ;;  %vm86_vm3 = vcmp.ge.f32.partialorder %v84_v19, 0.0 }
  0x9e   :  { %v88_v62 = vsel %vm86_vm3, 1.0, %v170_v50 }
  0x9f   :  { %v92_v21 = vmul.f32 0.3275911, %v90_v20  ;;  %v116_v32 = vsub.f32 0.0, %v90_v20 }
  0xa1   :  { %v162_v22 = vpop.eup %161  ;;  %v94_v24 = vadd.f32 1.0, %v92_v21  ;;  %v118_v37 = vmul.f32 %v116_v32, %v90_v20 }
  0xa2   :  { %v97_v25 = vmul.f32 1.0614054, %v162_v22 }
  0xa3   :  { %163 = vrcp.f32 %v94_v24  ;;  %v121_v42 = vmul.f32 1.442695, %v118_v37 }
  0xa4   :  { %v99_v26 = vadd.f32 -1.4531521, %v97_v25  ;;  %165 = vpow2.f32 %v119_v31 }
  0xa5   :  { %167 = vpow2.f32 %v121_v42 }
  0xa6   :  { %v101_v28 = vmul.f32 %v162_v22, %v99_v26 }
  0xa8   :  { %v103_v29 = vadd.f32 1.4214138, %v101_v28 }
  0xa9   :  { %v164_v30 = vpop.eup %163 }
  0xaa   :  { %v105_v33 = vmul.f32 %v162_v22, %v103_v29  ;;  %v98_v34 = vmul.f32 1.0614054, %v164_v30  ;;  %v166_v45 = vpop.eup %165 }
  0xab   :  { %v168_v57 = vpop.eup %167 }
  0xac   :  { %v107_v35 = vadd.f32 -0.28449672, %v105_v33  ;;  %v100_v36 = vadd.f32 -1.4531521, %v98_v34 }
  0xae   :  { %v109_v38 = vmul.f32 %v162_v22, %v107_v35  ;;  %v102_v39 = vmul.f32 %v164_v30, %v100_v36 }
  0xb0   :  { %v111_v40 = vadd.f32 0.2548296, %v109_v38  ;;  %v104_v41 = vadd.f32 1.4214138, %v102_v39 }
  0xb2   :  { %v113_v43 = vmul.f32 %v162_v22, %v111_v40  ;;  %v106_v44 = vmul.f32 %v164_v30, %v104_v41 }
  0xb4   :  { %v123_v46 = vmul.f32 %v166_v45, %v113_v43  ;;  %v108_v47 = vadd.f32 -0.28449672, %v106_v44 }
  0xb6   :  { %v125_v48 = vsub.f32 1.0, %v123_v46  ;;  %v110_v49 = vmul.f32 %v164_v30, %v108_v47 }
  0xb8   :  { %v127_v52 = vmul.f32 %v125_v48, %v87_v51  ;;  %v112_v53 = vadd.f32 0.2548296, %v110_v49 }
  0xba   :  { %v129_v55 = vadd.f32 1.0, %v127_v52  ;;  %v114_v56 = vmul.f32 %v164_v30, %v112_v53 }
  0xbc   :  { %v131_v58 = vmul.f32 %v129_v55, %v81_v54  ;;  %v124_v59 = vmul.f32 %v168_v57, %v114_v56 }
  0xbe   :  { %v133_v60 = vpack.c.bf16 %v131_v58, %v131_v58  ;;  %v126_v61 = vsub.f32 1.0, %v124_v59 }
  0xc0   :  { %136 = vst.msk [vmem:[%s216_s3] sm:$0xf] %vm135_vm4, %v133_v60  ;;  %v128_v63 = vmul.f32 %v126_v61, %v88_v62 }
  0xc2   :  { %v130_v1 = vadd.f32 1.0, %v128_v63 }
  0xc4   :  { %v132_v2 = vmul.f32 %v130_v1, %v82_v0 }
  0xc6   :  { %v134_v3 = vpack.c.bf16 %v132_v2, %v132_v2 }
  0xc8   :  { %137 = vst.msk [vmem:[%s216_s3 + $0x4] sm:$0xf] %vm135_vm4, %v134_v3 }

// kernel: cl4kt_forward.24
= control target key start
LH: loop header
LB: loop body
LE: loop exit
PB: predicated region body
PF: predicated region fallthrough
CT: control target
= control target key end

     0   :  { %vm28_vm0 = vcmask 261120   ;;  %v198_v1 = vmov 0.0   ;;  %v199_v22 = vmov 32.0   ;;  %vm160_vm6 = vcmask 257024   ;;  %s271_s1 = inlined_call_operand.vmem [shape: bf16[32,32], index: 1, kind: input, shape index: {}]   ;;  %s272_s0 = inlined_call_operand.vmem [shape: bf16[16,32], index: 0, kind: input, shape index: {}]   ;;  %s273_s2 = inlined_call_operand.vmem [shape: f32[1,32], index: 2, kind: input, shape index: {}]   ;;  %s274_s3 = inlined_call_operand.vmem [shape: bf16[16,32], index: 3, kind: input, shape index: {}]   ;;  %s275_s4 = inlined_call_operand.vmem [shape: f32[1,32], index: 4, kind: input, shape index: {}]   ;;  %s276_s5 = inlined_call_operand.vmem [shape: f32[1,32], index: 5, kind: input, shape index: {}]   ;;  %s277_s6 = inlined_call_operand.vmem [shape: bf16[16,32], index: 6, kind: output, shape index: {}]  }
   0x1   :  { %v182_v0 = vld [vmem:[%s271_s1 + $0x8] sm:$0xff]  ;;  %29 = vst.msk [vmem:[#allocation2] sm:$0xff] %vm28_vm0, %v198_v1  ;;  %v181_v2 = vld [vmem:[%s271_s1] sm:$0xff]  ;;  %192 = vrcp.f32 %v199_v22 }
   0x2   :  { %30 = vst.msk [vmem:[#allocation2 + $0x8] sm:$0xff] %vm28_vm0, %v198_v1  ;;  %66 = vmatpush.bf16.msra.mxu0 %v182_v0  ;;  %v180_v3 = vld [vmem:[%s272_s0] sm:$0xff] }
   0x3   :  { %v184_v8 = vld [vmem:[%s274_s3] sm:$0xff]  }
   0x4   :  { %v189_v9 = vld [vmem:[%s273_s2] ss:$0 sm:$0xff]  ;;  %v185_v12 = vunpack.c.l.bf16 %v184_v8  ;;  %v186_v17 = vunpack.c.h.bf16 %v184_v8 }
   0x5   :  { %v190_v53 = vld [vmem:[%s275_s4] ss:$0 sm:$0xff] }
   0x6   :  { %67 = vmatpush.bf16.msra.mxu0 %v181_v2  ;;  %v191_v56 = vld [vmem:[%s276_s5] ss:$0 sm:$0xff] }
   0x7   :  { %v193_v23 = vpop.eup %192 }
   0x8   :  { %v31_v4 = vld [vmem:[#allocation2] sm:$0xff]  ;;  %v102_v24 = vmul.f32 32.0, %v193_v23  ;;  %vm106_vm1 = vweird.f32 %v193_v23 }
   0x9   :  { %179 = vmatmul.msk.bf16.vlgmr.msra.gmra.mxu0 %vm28_vm0, %v180_v3  ;;  %v32_v7 = vld [vmem:[#allocation2 + $0x8] sm:$0xff] }
   0xa   :  { %v103_v25 = vsub.f32 1.0, %v102_v24 }
   0xc   :  { %v104_v26 = vmul.f32 %v193_v23, %v103_v25 }
   0xe   :  { %v105_v27 = vadd.f32 %v193_v23, %v104_v26 }
  0x10   :  { %v107_v28 = vsel %vm106_vm1, %v193_v23, %v105_v27 }
  0x86   :  { %v69_v5 = vpop.f32.mrf.mxu0 }
  0x87   :  { %v74_v6 = vadd.f32 %v69_v5, %v31_v4 }
  0x89   :  { %76 = vst.msk [vmem:[#allocation2] sm:$0xff] %vm28_vm0, %v74_v6 }
  0x8e   :  { %v71_v10 = vpop.f32.mrf.mxu0 }
  0x8f   :  { %v75_v11 = vadd.f32 %v71_v10, %v32_v7 }
  0x90   :  { %v81_v13 = vld [vmem:[#allocation2] sm:$0xff] }
  0x91   :  { %77 = vst.msk [vmem:[#allocation2 + $0x8] sm:$0xff] %vm28_vm0, %v75_v11  ;;  %v87_v14 = vadd.f32 %v189_v9, %v81_v13 }
  0x93   :  { %v93_v15 = vadd.f32 %v185_v12, %v87_v14 }
  0x95   :  { %v95_v16 = vsel %vm28_vm0, %v93_v15, 0.0 }
  0x96   :  { %96 = vadd.xlane.f32.xlu0 %v95_v16 }
  0x98   :  { %v82_v18 = vld [vmem:[#allocation2 + $0x8] sm:$0xff] }
  0x99   :  { %v88_v19 = vadd.f32 %v189_v9, %v82_v18 }
  0x9b   :  { %v94_v20 = vadd.f32 %v186_v17, %v88_v19 }
  0x9d   :  { %v98_v21 = vsel %vm28_vm0, %v94_v20, 0.0 }
  0x9e   :  { %99 = vadd.xlane.f32.xlu0 %v98_v21 }
 0x109   :  { %v97_v29 = vpop.xlane.xlu0 %96 }
 0x10a   :  { %v108_v30 = vmul.f32 %v107_v28, %v97_v29 }
 0x10c   :  { %v110_v31 = vsub.f32 %v93_v15, %v108_v30 }
 0x10e   :  { %v112_v32 = vmul.f32 %v110_v31, %v110_v31 }
 0x110   :  { %v114_v33 = vsel %vm28_vm0, %v112_v32, 0.0 }
 0x111   :  { %115 = vadd.xlane.f32.xlu1 %v114_v33  ;;  %v100_v34 = vpop.xlane.xlu0 %99 }
 0x112   :  { %v109_v35 = vmul.f32 %v107_v28, %v100_v34 }
 0x114   :  { %v111_v36 = vsub.f32 %v94_v20, %v109_v35 }
 0x116   :  { %v113_v37 = vmul.f32 %v111_v36, %v111_v36 }
 0x118   :  { %v117_v38 = vsel %vm28_vm0, %v113_v37, 0.0 }
 0x119   :  { %118 = vadd.xlane.f32.xlu1 %v117_v38 }
 0x184   :  { %v116_v39 = vpop.xlane.xlu1 %115 }
 0x185   :  { %v120_v40 = vmul.f32 %v116_v39, %v107_v28 }
 0x187   :  { %v122_v41 = vadd.f32 1e-05, %v120_v40 }
 0x189   :  { %194 = vrsqrt.f32 %v122_v41  ;;  %vm130_vm3 = vweird.f32 %v122_v41 }
 0x18c   :  { %v119_v42 = vpop.xlane.xlu1 %118 }
 0x18d   :  { %v121_v43 = vmul.f32 %v119_v42, %v107_v28 }
 0x18f   :  { %v195_v44 = vpop.eup %194  ;;  %v123_v45 = vadd.f32 1e-05, %v121_v43 }
 0x190   :  { %v125_v46 = vmul.f32 %v195_v44, %v122_v41  ;;  %vm131_vm2 = vweird.f32 %v195_v44 }
 0x191   :  { %196 = vrsqrt.f32 %v123_v45  ;;  %vm132_vm4 = vmor %vm130_vm3, %vm131_vm2  ;;  %vm140_vm7 = vweird.f32 %v123_v45 }
 0x192   :  { %v126_v47 = vmul.f32 %v195_v44, %v125_v46 }
 0x194   :  { %v127_v48 = vmul.f32 0.5, %v126_v47 }
 0x196   :  { %v128_v49 = vsub.f32 1.5, %v127_v48 }
 0x197   :  { %v197_v50 = vpop.eup %196 }
 0x198   :  { %v129_v51 = vmul.f32 %v195_v44, %v128_v49  ;;  %v135_v52 = vmul.f32 %v197_v50, %v123_v45  ;;  %vm141_vm5 = vweird.f32 %v197_v50 }
 0x199   :  { %vm142_vm8 = vmor %vm140_vm7, %vm141_vm5 }
 0x19a   :  { %v133_v54 = vsel %vm132_vm4, %v195_v44, %v129_v51  ;;  %v136_v55 = vmul.f32 %v197_v50, %v135_v52 }
 0x19b   :  { %v144_v57 = vmul.f32 %v133_v54, %v110_v31 }
 0x19c   :  { %v137_v58 = vmul.f32 0.5, %v136_v55 }
 0x19d   :  { %v150_v59 = vmul.f32 %v190_v53, %v144_v57 }
 0x19e   :  { %v138_v60 = vsub.f32 1.5, %v137_v58 }
 0x19f   :  { %v156_v61 = vadd.f32 %v191_v56, %v150_v59 }
 0x1a0   :  { %v139_v62 = vmul.f32 %v197_v50, %v138_v60 }
 0x1a1   :  { %v158_v63 = vpack.c.bf16 %v156_v61, %v156_v61 }
 0x1a2   :  { %v143_v0 = vsel %vm142_vm8, %v197_v50, %v139_v62 }
 0x1a3   :  { %161 = vst.msk [vmem:[%s277_s6] sm:$0xf] %vm160_vm6, %v158_v63  ;;  %v145_v1 = vmul.f32 %v143_v0, %v111_v36 }
 0x1a5   :  { %v151_v2 = vmul.f32 %v190_v53, %v145_v1 }
 0x1a7   :  { %v157_v3 = vadd.f32 %v191_v56, %v151_v2 }
 0x1a9   :  { %v159_v4 = vpack.c.bf16 %v157_v3, %v157_v3 }
 0x1ab   :  { %162 = vst.msk [vmem:[%s277_s6 + $0x4] sm:$0xf] %vm160_vm6, %v159_v4 }

// kernel: cl4kt_forward.28
= control target key start
LH: loop header
LB: loop body
LE: loop exit
PB: predicated region body
PF: predicated region fallthrough
CT: control target
= control target key end

     0   :  { %vm19_vm0 = vcmask 261120   ;;  %v107_v1 = vmov 0.0   ;;  %vm82_vm1 = vcmask 257024   ;;  %s151_s1 = inlined_call_operand.vmem [shape: bf16[32,32], index: 1, kind: input, shape index: {}]   ;;  %s152_s2 = inlined_call_operand.vmem [shape: f32[1,32], index: 2, kind: input, shape index: {}]   ;;  %s153_s0 = inlined_call_operand.vmem [shape: bf16[16,32], index: 0, kind: input, shape index: {}]   ;;  %s154_s3 = inlined_call_operand.vmem [shape: bf16[16,32], index: 3, kind: output, shape index: {}]  }
   0x1   :  { %v104_v0 = vld [vmem:[%s151_s1 + $0x8] sm:$0xff]  ;;  %20 = vst.msk [vmem:[#allocation2] sm:$0xff] %vm19_vm0, %v107_v1  ;;  %v103_v2 = vld [vmem:[%s151_s1] sm:$0xff] }
   0x2   :  { %21 = vst.msk [vmem:[#allocation2 + $0x8] sm:$0xff] %vm19_vm0, %v107_v1  ;;  %57 = vmatpush.bf16.msra.mxu0 %v104_v0  ;;  %v102_v3 = vld [vmem:[%s153_s0] sm:$0xff] }
   0x3   :  { %v106_v8 = vld [vmem:[%s152_s2] ss:$0 sm:$0xff] }
   0x6   :  { %58 = vmatpush.bf16.msra.mxu0 %v103_v2 }
   0x8   :  { %v22_v4 = vld [vmem:[#allocation2] sm:$0xff] }
   0x9   :  { %101 = vmatmul.msk.bf16.vlgmr.msra.gmra.mxu0 %vm19_vm0, %v102_v3  ;;  %v23_v7 = vld [vmem:[#allocation2 + $0x8] sm:$0xff] }
  0x86   :  { %v60_v5 = vpop.f32.mrf.mxu0 }
  0x87   :  { %v65_v6 = vadd.f32 %v60_v5, %v22_v4 }
  0x89   :  { %67 = vst.msk [vmem:[#allocation2] sm:$0xff] %vm19_vm0, %v65_v6 }
  0x8e   :  { %v62_v9 = vpop.f32.mrf.mxu0 }
  0x8f   :  { %v66_v10 = vadd.f32 %v62_v9, %v23_v7 }
  0x90   :  { %v72_v11 = vld [vmem:[#allocation2] sm:$0xff] }
  0x91   :  { %v78_v12 = vadd.f32 %v106_v8, %v72_v11  ;;  %68 = vst.msk [vmem:[#allocation2 + $0x8] sm:$0xff] %vm19_vm0, %v66_v10 }
  0x93   :  { %v80_v13 = vpack.c.bf16 %v78_v12, %v78_v12 }
  0x95   :  { %83 = vst.msk [vmem:[%s154_s3] sm:$0xf] %vm82_vm1, %v80_v13 }
  0x98   :  { %v73_v14 = vld [vmem:[#allocation2 + $0x8] sm:$0xff] }
  0x99   :  { %v79_v15 = vadd.f32 %v106_v8, %v73_v14 }
  0x9b   :  { %v81_v16 = vpack.c.bf16 %v79_v15, %v79_v15 }
  0x9d   :  { %84 = vst.msk [vmem:[%s154_s3 + $0x4] sm:$0xf] %vm82_vm1, %v81_v16 }

// kernel: cl4kt_forward.26
= control target key start
LH: loop header
LB: loop body
LE: loop exit
PB: predicated region body
PF: predicated region fallthrough
CT: control target
= control target key end

     0   :  { %vm28_vm0 = vcmask 261120   ;;  %v225_v1 = vmov 0.0   ;;  %vm72_vm1 = vcmask 523264   ;;  %v226_v24 = vmov 32.0   ;;  %s303_s1 = inlined_call_operand.vmem [shape: bf16[64,32], index: 1, kind: input, shape index: {}]   ;;  %s304_s0 = inlined_call_operand.vmem [shape: bf16[16,64], index: 0, kind: input, shape index: {}]   ;;  %s305_s2 = inlined_call_operand.vmem [shape: f32[1,32], index: 2, kind: input, shape index: {}]   ;;  %s306_s3 = inlined_call_operand.vmem [shape: bf16[16,32], index: 3, kind: input, shape index: {}]   ;;  %s307_s4 = inlined_call_operand.vmem [shape: f32[1,32], index: 4, kind: input, shape index: {}]   ;;  %s308_s5 = inlined_call_operand.vmem [shape: f32[1,32], index: 5, kind: input, shape index: {}]   ;;  %s309_s6 = inlined_call_operand.vmem [shape: bf16[16,32], index: 6, kind: output, shape index: {}]  }
   0x1   :  { %v209_v0 = vld [vmem:[%s303_s1 + $0x18] sm:$0xff]  ;;  %29 = vst.msk [vmem:[#allocation2] sm:$0xff] %vm28_vm0, %v225_v1  ;;  %v208_v2 = vld [vmem:[%s303_s1 + $0x10] sm:$0xff]  ;;  %v207_v3 = vld [vmem:[%s303_s1 + $0x8] sm:$0xff]  ;;  %219 = vrcp.f32 %v226_v24  ;;  %vm177_vm7 = vcmask 257024  }
   0x2   :  { %30 = vst.msk [vmem:[#allocation2 + $0x8] sm:$0xff] %vm28_vm0, %v225_v1  ;;  %80 = vmatpush.bf16.msra.mxu0 %v209_v0  ;;  %v206_v4 = vld [vmem:[%s303_s1] sm:$0xff] }
   0x3   :  { %v205_v5 = vld [vmem:[%s304_s0] sm:$0xff] }
   0x4   :  { %v211_v10 = vld [vmem:[%s306_s3] sm:$0xff]  }
   0x5   :  { %v216_v11 = vld [vmem:[%s305_s2] ss:$0 sm:$0xff]  ;;  %v212_v14 = vunpack.c.l.bf16 %v211_v10  ;;  %v213_v19 = vunpack.c.h.bf16 %v211_v10 }
   0x6   :  { %81 = vmatpush.bf16.msra.mxu0 %v208_v2  ;;  %v217_v55 = vld [vmem:[%s307_s4] ss:$0 sm:$0xff] }
   0x7   :  { %v220_v25 = vpop.eup %219  ;;  %v218_v58 = vld [vmem:[%s308_s5] ss:$0 sm:$0xff] }
   0x8   :  { %v31_v6 = vld [vmem:[#allocation2] sm:$0xff]  ;;  %v119_v26 = vmul.f32 32.0, %v220_v25  ;;  %vm123_vm2 = vweird.f32 %v220_v25 }
   0x9   :  { %v32_v9 = vld [vmem:[#allocation2 + $0x8] sm:$0xff] }
   0xa   :  { %82 = vmatpush.bf16.msra.mxu0 %v207_v3  ;;  %v120_v27 = vsub.f32 1.0, %v119_v26 }
   0xc   :  { %v121_v28 = vmul.f32 %v220_v25, %v120_v27 }
   0xe   :  { %83 = vmatpush.bf16.msra.mxu0 %v206_v4  ;;  %v122_v29 = vadd.f32 %v220_v25, %v121_v28 }
  0x10   :  { %v124_v30 = vsel %vm123_vm2, %v220_v25, %v122_v29 }
  0x11   :  { %204 = vmatmul.msk.bf16.vlgmr.msra.gmra.mxu0 %vm72_vm1, %v205_v5 }
  0x8e   :  { %v85_v7 = vpop.f32.mrf.mxu0 }
  0x8f   :  { %v90_v8 = vadd.f32 %v85_v7, %v31_v6 }
  0x91   :  { %93 = vst.msk [vmem:[#allocation2] sm:$0xff] %vm28_vm0, %v90_v8 }
  0x96   :  { %v87_v12 = vpop.f32.mrf.mxu0 }
  0x97   :  { %v91_v13 = vadd.f32 %v87_v12, %v32_v9 }
  0x98   :  { %v98_v15 = vld [vmem:[#allocation2] sm:$0xff] }
  0x99   :  { %94 = vst.msk [vmem:[#allocation2 + $0x8] sm:$0xff] %vm28_vm0, %v91_v13  ;;  %v104_v16 = vadd.f32 %v216_v11, %v98_v15 }
  0x9b   :  { %v110_v17 = vadd.f32 %v212_v14, %v104_v16 }
  0x9d   :  { %v112_v18 = vsel %vm28_vm0, %v110_v17, 0.0 }
  0x9e   :  { %113 = vadd.xlane.f32.xlu0 %v112_v18 }
  0xa0   :  { %v99_v20 = vld [vmem:[#allocation2 + $0x8] sm:$0xff] }
  0xa1   :  { %v105_v21 = vadd.f32 %v216_v11, %v99_v20 }
  0xa3   :  { %v111_v22 = vadd.f32 %v213_v19, %v105_v21 }
  0xa5   :  { %v115_v23 = vsel %vm28_vm0, %v111_v22, 0.0 }
  0xa6   :  { %116 = vadd.xlane.f32.xlu0 %v115_v23 }
 0x111   :  { %v114_v31 = vpop.xlane.xlu0 %113 }
 0x112   :  { %v125_v32 = vmul.f32 %v124_v30, %v114_v31 }
 0x114   :  { %v127_v33 = vsub.f32 %v110_v17, %v125_v32 }
 0x116   :  { %v129_v34 = vmul.f32 %v127_v33, %v127_v33 }
 0x118   :  { %v131_v35 = vsel %vm28_vm0, %v129_v34, 0.0 }
 0x119   :  { %132 = vadd.xlane.f32.xlu1 %v131_v35  ;;  %v117_v36 = vpop.xlane.xlu0 %116 }
 0x11a   :  { %v126_v37 = vmul.f32 %v124_v30, %v117_v36 }
 0x11c   :  { %v128_v38 = vsub.f32 %v111_v22, %v126_v37 }
 0x11e   :  { %v130_v39 = vmul.f32 %v128_v38, %v128_v38 }
 0x120   :  { %v134_v40 = vsel %vm28_vm0, %v130_v39, 0.0 }
 0x121   :  { %135 = vadd.xlane.f32.xlu1 %v134_v40 }
 0x18c   :  { %v133_v41 = vpop.xlane.xlu1 %132 }
 0x18d   :  { %v137_v42 = vmul.f32 %v133_v41, %v124_v30 }
 0x18f   :  { %v139_v43 = vadd.f32 1e-05, %v137_v42 }
 0x191   :  { %221 = vrsqrt.f32 %v139_v43  ;;  %vm147_vm4 = vweird.f32 %v139_v43 }
 0x194   :  { %v136_v44 = vpop.xlane.xlu1 %135 }
 0x195   :  { %v138_v45 = vmul.f32 %v136_v44, %v124_v30 }
 0x197   :  { %v222_v46 = vpop.eup %221  ;;  %v140_v47 = vadd.f32 1e-05, %v138_v45 }
 0x198   :  { %v142_v48 = vmul.f32 %v222_v46, %v139_v43  ;;  %vm148_vm3 = vweird.f32 %v222_v46 }
 0x199   :  { %223 = vrsqrt.f32 %v140_v47  ;;  %vm149_vm5 = vmor %vm147_vm4, %vm148_vm3  ;;  %vm157_vm8 = vweird.f32 %v140_v47 }
 0x19a   :  { %v143_v49 = vmul.f32 %v222_v46, %v142_v48 }
 0x19c   :  { %v144_v50 = vmul.f32 0.5, %v143_v49 }
 0x19e   :  { %v145_v51 = vsub.f32 1.5, %v144_v50 }
 0x19f   :  { %v224_v52 = vpop.eup %223 }
 0x1a0   :  { %v146_v53 = vmul.f32 %v222_v46, %v145_v51  ;;  %v152_v54 = vmul.f32 %v224_v52, %v140_v47  ;;  %vm158_vm6 = vweird.f32 %v224_v52 }
 0x1a1   :  { %vm159_vm9 = vmor %vm157_vm8, %vm158_vm6 }
 0x1a2   :  { %v150_v56 = vsel %vm149_vm5, %v222_v46, %v146_v53  ;;  %v153_v57 = vmul.f32 %v224_v52, %v152_v54 }
 0x1a3   :  { %v161_v59 = vmul.f32 %v150_v56, %v127_v33 }
 0x1a4   :  { %v154_v60 = vmul.f32 0.5, %v153_v57 }
 0x1a5   :  { %v167_v61 = vmul.f32 %v217_v55, %v161_v59 }
 0x1a6   :  { %v155_v62 = vsub.f32 1.5, %v154_v60 }
 0x1a7   :  { %v173_v63 = vadd.f32 %v218_v58, %v167_v61 }
 0x1a8   :  { %v156_v0 = vmul.f32 %v224_v52, %v155_v62 }
 0x1a9   :  { %v175_v1 = vpack.c.bf16 %v173_v63, %v173_v63 }
 0x1aa   :  { %v160_v2 = vsel %vm159_vm9, %v224_v52, %v156_v0 }
 0x1ab   :  { %178 = vst.msk [vmem:[%s309_s6] sm:$0xf] %vm177_vm7, %v175_v1  ;;  %v162_v3 = vmul.f32 %v160_v2, %v128_v38 }
 0x1ad   :  { %v168_v4 = vmul.f32 %v217_v55, %v162_v3 }
 0x1af   :  { %v174_v5 = vadd.f32 %v218_v58, %v168_v4 }
 0x1b1   :  { %v176_v6 = vpack.c.bf16 %v174_v5, %v174_v5 }
 0x1b3   :  { %179 = vst.msk [vmem:[%s309_s6 + $0x4] sm:$0xf] %vm177_vm7, %v176_v6 }

// kernel: cl4kt_forward.29
= control target key start
LH: loop header
LB: loop body
LE: loop exit
PB: predicated region body
PF: predicated region fallthrough
CT: control target
= control target key end

     0   :  { %s1178_s0 = inlined_call_operand.vmem [shape: f32[4], index: 0, kind: input, shape index: {}]   ;;  %s1179_s1 = inlined_call_operand.vmem [shape: bf16[4,8,16], index: 1, kind: input, shape index: {}, may-alias: {1,2}]   ;;  %s1180_s2 = inlined_call_operand.vmem [shape: bf16[4,8,16], index: 2, kind: input, shape index: {}, may-alias: {1,2}]   ;;  %s1181_s3 = inlined_call_operand.vmem [shape: bf16[4,8,16], index: 3, kind: input, shape index: {}]   ;;  %s1182_s4 = inlined_call_operand.vmem [shape: f32[8,8], index: 4, kind: input, shape index: {}]   ;;  %s1183_s5 = inlined_call_operand.vmem [shape: f32[8,8], index: 5, kind: input, shape index: {}]   ;;  %s1184_s6 = inlined_call_operand.vmem [shape: bf16[8,8], index: 6, kind: input, shape index: {}]   ;;  %s1185_s7 = inlined_call_operand.vmem [shape: f32[8,8], index: 7, kind: input, shape index: {}]   ;;  %s1186_s8 = inlined_call_operand.vmem [shape: bf16[4,8,16], index: 8, kind: output, shape index: {0}]   ;;  %s1187_s9 = inlined_call_operand.hbm [shape: f32[4,8,8], index: 9, kind: output, shape index: {1}]  }
   0x1   :  { %1188 = sst [smem:[#allocation8_spill]] %s1178_s0 }
   0x2   :  { %1189 = sst [smem:[#allocation9_spill]] %s1179_s1 }
   0x3   :  { %1190 = sst [smem:[#allocation10_spill]] %s1180_s2 }
   0x4   :  { %1191 = sst [smem:[#allocation11_spill]] %s1181_s3 }
   0x5   :  { %15 = vsyncpa [#allocation4], 0 }
   0x6   :  { %16 = vsyncpa [#allocation3], 0 }
   0x7   :  { %18 = vsyncpa [#allocation3 + $0x1], 0  ;;  %s1025_s30 = smov 0   ;;  %s1027_s10 = smov 0  }
   0x8   :  { %s1029_s11 = smov 0   ;;  %s1031_s12 = smov 0  }
   0x9 LB: > { %s1046_s13 = sadd.s32 4294967295, %s970_s12   ;;  %s786_s14 = sadd.s32 4294967294, %s970_s12   ;;  %s970_s12 = sphi %s1031_s12, %s1201_s12   ;;  %s966_s11 = sphi %s1029_s11, %s1200_s11   ;;  %s962_s10 = sphi %s1027_s10, %s1199_s10   ;;  %s958_s30 = sphi %s1025_s30, %s1198_s30  }
   0xa   : > { %s1050_s15 = sadd.s32 1, %s970_s12   ;;  %s240_s16 = sadd.s32 1, %s966_s11 }
   0xb   : > { %s237_s17 = ssub.s32 %s970_s12, %s1050_s15  ;;  %p250_p0 = scmp.ne.s32.totalorder %s966_s11, %s962_s10 }
   0xc   : > { %p238_p1 = scmp.eq.s32.totalorder %s237_s17, 0  ;;  %p251_p2 = scmp.eq.s32.totalorder %s1046_s13, 1 }
   0xd   : > { %p256_p3 = scmp.ne.s32.totalorder %s962_s10, %s958_s30  ;;  %p257_p4 = scmp.eq.s32.totalorder %s786_s14, 1 }
   0xe   : > { %s1061_s18 = scalar_select %p238_p1, %s966_s11, %s240_s16  }
   0xf   : > { %p1063_p5 = por %p251_p2, %p250_p0  ;;  %p1067_p6 = por %p257_p4, %p256_p3 }
  0x10   : > { %p787_p7 = scmp.ge.s32.totalorder %s970_s12, 1  ;;  %p264_p8 = scmp.lt.s32.totalorder %s970_s12, 3 }
  0x11   : > { %p827_p9 = scmp.eq.s32.totalorder %s1046_s13, 0  ;;  %s1194_s0 = sld [smem:[#allocation8_spill]] }
  0x12   : > { %p265_p10 = pnand %p787_p7, %p264_p8  ;;  %s972_s24 = smov [#allocation2]  }
  0x14   : > { %p819_p11 = pneg %p265_p10  ;;  %328 = sbr.rel (%p265_p10) target bundleno = 1026 (0x402), region = 52 }
  0x16   : > { %p820_p12 = pnand %p827_p9, %p819_p11 }
  0x17   : > { %s276_s23 = sshll.u32 %s1194_s0, 4  ;;  %s277_s23 = int_to_ptr.vmem [resolvable:$true] %s276_s23 }
  0x18   : > { %822 = dma.vmem_to_smem (!%p820_p12), %s277_s23, 16, %s972_s24, [#allocation4]  }
  0x19   : > { %949 = dma.done.wait (%p827_p9), [#allocation4], 16  }
  0x1a   : > { %951 = vsyncadd (%p827_p9), [#allocation4], 4294967280 }
  0x1b   : > { %335 = sfence }
  0x1c   : > { %s1078_s25 = sshll.u32 %s1046_s13, 1  ;;  %vm416_vm0 = vcmask 130048   ;;  %s1195_s2 = sld [smem:[#allocation10_spill]]  ;;  %v1095_v8 = vld [vmem:[%s1182_s4] sm:$0xff]  ;;  %vm459_vm1 = vcmask 64512   ;;  %vm495_vm2 = vcmask 1043456  }
  0x1d   : > { %p382_p13 = scmp.lt.s32.totalorder %s1078_s25, 3  ;;  %s1196_s1 = sld [smem:[#allocation9_spill]]  ;;  %v486_v27 = vld [vmem:[%s1184_s6] sm:$0xf] }
  0x1e   : > { %v497_v28 = vsel %vm495_vm2, %v486_v27, 0  ;;  %v414_v31 = vld [vmem:[%s1183_s5] sm:$0xff]  ;;  %s550_s17 = sld [smem:[#allocation2 + %s1078_s25]] }
  0x1f   : > { %s383_s26 = scalar_select %p382_p13, %s1078_s25, 3  ;;  %506 = vmatpush.bf16.msra.mxu2 %v497_v28  ;;  %v415_v46 = vld [vmem:[%s1185_s7] sm:$0xff] }
  0x20   : > { %s1197_s3 = sld [smem:[#allocation11_spill]] }
  0x21   : > { %s1082_s27 = sshll.u32 %s383_s26, 2  ;;  %s378_s26 = sand.u32 1, %s962_s10  }
  0x22   : > { %s391_s14 = scalar_lea.vmem %s1195_s2, %s1082_s27  ;;  %s792_s28 = sshll.u32 %s378_s26, 4 }
  0x23   : > { %v409_v0 = vld [vmem:[%s391_s14] sm:$0xf]  ;;  %v410_v1 = vld [vmem:[%s391_s14 + $0x4] sm:$0xf]  ;;  %s385_s21 = scalar_lea.vmem %s1196_s1, %s1082_s27  ;;  %s380_s29 = scalar_lea.vmem [#allocation5], %s792_s28 }
  0x24   : > { %v421_v2 = vsel %vm416_vm0, %v409_v0, 0  ;;  %v440_v3 = vsel %vm416_vm0, %v410_v1, 0  ;;  %v407_v4 = vld [vmem:[%s385_s21] sm:$0xf]  ;;  %v408_v5 = vld [vmem:[%s385_s21 + $0x4] sm:$0xf] }
  0x25   : > { %430 = vmatpush.bf16.xpose.msra.mxu0 %v421_v2  ;;  %449 = vmatpush.bf16.xpose.msra.mxu1 %v440_v3  ;;  %s552_s21 = sadd.s32 1, %s1078_s25  ;;  %v551_v3 = vstv %s550_s17  ;;  %s812_s14 = sshll.u32 %s1046_s13, 4 }
  0x26   : > { %s553_s22 = sld [smem:[#allocation2 + %s552_s21]]  ;;  %s397_s24 = scalar_lea.vmem %s1197_s3, %s1082_s27 }
  0x27   : > { %s659_s21 = scalar_lea.hbm %s1187_s9, %s812_s14  ;;  %s644_s23 = scalar_lea.sflag [#allocation3], %s378_s26 }
  0x28   : > { %s662_s25 = sshll.u32 %s659_s21, 4  ;;  %s924_s13 = scalar_lea.hbm %s1187_s9, 32  ;;  %s663_s25 = int_to_ptr.hbm [resolvable:$true] %s662_s25 }
  0x2c   : > { %801 = vmatmul.msk.bf16.vlgmr.msra.gmra.mxu0 %vm416_vm0, %v407_v4  ;;  %802 = vmatmul.msk.bf16.vlgmr.msra.gmra.mxu1 %vm416_vm0, %v408_v5 }
  0xa9   : > { %v432_v6 = vpop.f32.mrf.mxu0  ;;  %v451_v7 = vpop.f32.mrf.mxu1 }
  0xaa   : > { %v1097_v9 = vmul.f32 0.25, %v432_v6  ;;  %v1099_v10 = vmul.f32 0.25, %v451_v7 }
  0xac   : > { %v457_v11 = vadd.f32 %v1097_v9, %v1095_v8  ;;  %v458_v13 = vadd.f32 %v1099_v10, %v1095_v8 }
  0xae   : > { %v460_v12 = vsel %vm459_vm1, %v457_v11, -inf  ;;  %v463_v16 = vsel %vm459_vm1, %v458_v13, -inf }
  0xaf   : > { %461 = vmax.xlane.f32.xlu0 %v460_v12 }
  0xb1   : > { %v434_v14 = vpop.f32.mrf.mxu0  ;;  %v453_v15 = vpop.f32.mrf.mxu1 }
  0xb7   : > { %464 = vmax.xlane.f32.xlu0 %v463_v16  ;;  %v554_v16 = vstv %s553_s22  ;;  %s660_s22 = sshll.u32 %s380_s29, 4  ;;  %s661_s22 = int_to_ptr.vmem [resolvable:$true] %s660_s22 }
 0x122   : > { %v462_v17 = vpop.xlane.xlu0 %461 }
 0x123   : > { %v466_v18 = vsub.f32 %v457_v11, %v462_v17 }
 0x125   : > { %v468_v19 = vmul.f32 1.442695, %v466_v18 }
 0x127   : > { %865 = vpow2.f32 %v468_v19 }
 0x12a   : > { %v465_v20 = vpop.xlane.xlu0 %464 }
 0x12b   : > { %v467_v21 = vsub.f32 %v458_v13, %v465_v20 }
 0x12d   : > { %v866_v22 = vpop.eup %865  ;;  %v470_v23 = vmul.f32 1.442695, %v467_v21 }
 0x12e   : > { %v472_v24 = vsel %vm459_vm1, %v866_v22, 0.0 }
 0x12f   : > { %867 = vpow2.f32 %v470_v23  ;;  %473 = vadd.xlane.f32.xlu1 %v472_v24 }
 0x135   : > { %v868_v25 = vpop.eup %867 }
 0x136   : > { %v475_v26 = vsel %vm459_vm1, %v868_v25, 0.0 }
 0x137   : > { %476 = vadd.xlane.f32.xlu1 %v475_v26 }
 0x1a2   : > { %v474_v29 = vpop.xlane.xlu1 %473 }
 0x1a3   : > { %869 = vrcp.f32 %v474_v29 }
 0x1a9   : > { %v870_v30 = vpop.eup %869 }
 0x1aa   : > { %v477_v32 = vpop.xlane.xlu1 %476  ;;  %v480_v33 = vmul.f32 %v870_v30, %v866_v22 }
 0x1ab   : > { %871 = vrcp.f32 %v477_v32 }
 0x1ac   : > { %v482_v34 = vmul.f32 %v480_v33, %v414_v31 }
 0x1ae   : > { %v513_v35 = vsel %vm459_vm1, %v482_v34, 0.0  ;;  %v484_v38 = vpack.c.bf16 %v482_v34, %v482_v34 }
 0x1af   : > { %514 = vadd.xlane.f32.xlu2 %v513_v35 }
 0x1b0   : > { %v489_v42 = vunpack.c.l.b16 %v484_v38 }
 0x1b1   : > { %v872_v36 = vpop.eup %871 }
 0x1b2   : > { %v481_v37 = vmul.f32 %v872_v36, %v868_v25 }
 0x1b4   : > { %v483_v39 = vmul.f32 %v481_v37, %v414_v31 }
 0x1b6   : > { %v516_v40 = vsel %vm459_vm1, %v483_v39, 0.0  ;;  %v485_v41 = vpack.c.bf16 %v483_v39, %v483_v39 }
 0x1b7   : > { %517 = vadd.xlane.f32.xlu2 %v516_v40  ;;  %v412_v40 = vld [vmem:[%s397_s24 + $0x4] sm:$0xf] }
 0x1b8   : > { %v490_v43 = vunpack.c.l.b16 %v485_v41  ;;  %v616_v41 = vsel %vm495_vm2, %v412_v40, 0 }
 0x1b9   : > { %625 = vmatpush.bf16.msrb.mxu2 %v616_v41 }
 0x1ba   : > { %v491_v44 = vpack.c.b16 %v490_v43, %v489_v42  ;;  %v411_v42 = vld [vmem:[%s397_s24] sm:$0xf]  ;;  %s918_s24 = sshra.s32 %s663_s25, 4  ;;  %s919_s24 = int_to_ptr.hbm [resolvable:$true] %s918_s24 }
 0x1bb   : > { %v597_v43 = vsel %vm495_vm2, %v411_v42, 0  ;;  %s920_s28 = scalar_lea.hbm %s919_s24, 16  ;;  %p925_p3 = scmp.lt.s32.totalorder %s919_s24, %s1187_s9 }
 0x1bc   : > { %803 = vmatmul.msk.bf16.vlgmr.msra.gmra.mxu2 %vm459_vm1, %v491_v44  ;;  %606 = vmatpush.bf16.msra.mxu3 %v597_v43  ;;  %p921_p0 = scmp.ne.s32.totalorder %s919_s24, %s920_s28  ;;  %p926_p4 = scmp.lt.s32.totalorder %s924_s13, %s920_s28 }
 0x1be   : > { %p922_p1 = pnand %p921_p0, %p1063_p5  ;;  %p927_p7 = por %p926_p4, %p925_p3 }
 0x1c0   : > { %p923_p2 = pneg %p922_p1 }
 0x1c2   : > { %p928_p8 = pnand %p927_p7, %p923_p2 }
 0x222   : > { %v515_v45 = vpop.xlane.xlu2 %514 }
 0x22a   : > { %v518_v51 = vpop.xlane.xlu2 %517 }
 0x23f   : > { %v508_v47 = vpop.f32.mrf.mxu2 }
 0x240   : > { %v519_v48 = vsub.f32 %v515_v45, %v508_v47 }
 0x242   : > { %v521_v49 = vmul.f32 %v519_v48, %v415_v46 }
 0x244   : > { %v523_v50 = vmax.f32 %v521_v49, 0.0 }
 0x246   : > { %873 = vrsqrt.f32 %v523_v50  ;;  %vm532_vm3 = vcmp.eq.f32.partialorder %v523_v50, inf  ;;  %v535_v2 = vand.u32 2147483648, %v523_v50  ;;  %vm534_vm4 = vcmp.eq.f32.partialorder %v523_v50, 0.0 }
 0x247   : > { %v510_v52 = vpop.f32.mrf.mxu2 }
 0x248   : > { %v520_v53 = vsub.f32 %v518_v51, %v510_v52 }
 0x24a   : > { %v522_v54 = vmul.f32 %v520_v53, %v415_v46 }
 0x24c   : > { %v874_v55 = vpop.eup %873  ;;  %v524_v56 = vmax.f32 %v522_v54, 0.0 }
 0x24d   : > { %v526_v57 = vmul.f32 %v874_v55, %v523_v50 }
 0x24e   : > { %875 = vrsqrt.f32 %v524_v56  ;;  %vm544_vm5 = vcmp.eq.f32.partialorder %v524_v56, inf  ;;  %v547_v15 = vand.u32 2147483648, %v524_v56  ;;  %vm546_vm6 = vcmp.eq.f32.partialorder %v524_v56, 0.0 }
 0x24f   : > { %v527_v58 = vmul.f32 %v874_v55, %v526_v57 }
 0x251   : > { %v528_v59 = vmul.f32 0.5, %v527_v58 }
 0x253   : > { %v529_v60 = vsub.f32 1.5, %v528_v59 }
 0x254   : > { %v876_v61 = vpop.eup %875 }
 0x255   : > { %v530_v62 = vmul.f32 %v874_v55, %v529_v60  ;;  %v538_v63 = vmul.f32 %v876_v61, %v524_v56 }
 0x257   : > { %v531_v0 = vmul.f32 %v530_v62, %v523_v50  ;;  %v539_v1 = vmul.f32 %v876_v61, %v538_v63 }
 0x259   : > { %v533_v4 = vsel %vm532_vm3, %v523_v50, %v531_v0  ;;  %v540_v5 = vmul.f32 0.5, %v539_v1 }
 0x25a   : > { %v536_v6 = vsel %vm534_vm4, %v535_v2, %v533_v4 }
 0x25b   : > { %v555_v7 = vmul.f32 %v551_v3, %v536_v6  ;;  %v541_v11 = vsub.f32 1.5, %v540_v5 }
 0x25d   : > { %v557_v12 = vmul.f32 1.442695, %v555_v7  ;;  %v542_v13 = vmul.f32 %v876_v61, %v541_v11 }
 0x25f   : > { %877 = vpow2.f32 %v557_v12  ;;  %v543_v14 = vmul.f32 %v542_v13, %v524_v56 }
 0x261   : > { %v545_v17 = vsel %vm544_vm5, %v524_v56, %v543_v14 }
 0x262   : > { %v548_v18 = vsel %vm546_vm6, %v547_v15, %v545_v17 }
 0x263   : > { %v556_v19 = vmul.f32 %v554_v16, %v548_v18 }
 0x265   : > { %v878_v20 = vpop.eup %877  ;;  %v559_v21 = vmul.f32 1.442695, %v556_v19 }
 0x266   : > { %v561_v22 = vmax.f32 %v878_v20, 1e-05 }
 0x267   : > { %879 = vpow2.f32 %v559_v21 }
 0x268   : > { %v563_v23 = vmin.f32 %v561_v22, 100000.0 }
 0x26a   : > { %v565_v24 = vmul.f32 %v563_v23, %v1097_v9 }
 0x26c   : > { %v567_v25 = vadd.f32 %v565_v24, %v1095_v8 }
 0x26d   : > { %v880_v26 = vpop.eup %879 }
 0x26e   : > { %v569_v27 = vsel %vm459_vm1, %v567_v25, -inf  ;;  %v562_v28 = vmax.f32 %v880_v26, 1e-05 }
 0x26f   : > { %570 = vmax.xlane.f32.xlu0 %v569_v27 }
 0x270   : > { %v564_v29 = vmin.f32 %v562_v28, 100000.0 }
 0x272   : > { %v566_v30 = vmul.f32 %v564_v29, %v1099_v10 }
 0x274   : > { %v568_v31 = vadd.f32 %v566_v30, %v1095_v8 }
 0x276   : > { %v572_v32 = vsel %vm459_vm1, %v568_v31, -inf }
 0x277   : > { %573 = vmax.xlane.f32.xlu1 %v572_v32 }
 0x2e2   : > { %v571_v33 = vpop.xlane.xlu0 %570 }
 0x2e3   : > { %v575_v34 = vsub.f32 %v567_v25, %v571_v33 }
 0x2e5   : > { %v577_v35 = vmul.f32 1.442695, %v575_v34 }
 0x2e7   : > { %881 = vpow2.f32 %v577_v35 }
 0x2ea   : > { %v574_v9 = vpop.xlane.xlu1 %573 }
 0x2eb   : > { %v576_v36 = vsub.f32 %v568_v31, %v574_v9 }
 0x2ed   : > { %v882_v37 = vpop.eup %881  ;;  %v579_v38 = vmul.f32 1.442695, %v576_v36 }
 0x2ee   : > { %v581_v39 = vsel %vm459_vm1, %v882_v37, 0.0 }
 0x2ef   : > { %883 = vpow2.f32 %v579_v38  ;;  %582 = vadd.xlane.f32.xlu2 %v581_v39 }
 0x2f5   : > { %v884_v10 = vpop.eup %883 }
 0x2f6   : > { %v584_v8 = vsel %vm459_vm1, %v884_v10, 0.0 }
 0x2f7   : > { %585 = vadd.xlane.f32.xlu0 %v584_v8 }
 0x362   : > { %v583_v44 = vpop.xlane.xlu2 %582 }
 0x363   : > { %885 = vrcp.f32 %v583_v44 }
 0x369   : > { %v886_v45 = vpop.eup %885 }
 0x36a   : > { %v586_v46 = vpop.xlane.xlu0 %585  ;;  %v589_v47 = vmul.f32 %v886_v45, %v882_v37 }
 0x36b   : > { %887 = vrcp.f32 %v586_v46 }
 0x36c   : > { %v591_v48 = vpack.c.bf16 %v589_v47, %v589_v47  ;;  %636 = vst.msk [vmem:[%s380_s29] sm:$0xff] %vm459_vm1, %v589_v47 }
 0x36e   : > { %805 = vmatmul.msk.bf16.vlgmr.msra.gmra.mxu3 %vm459_vm1, %v591_v48 }
 0x371   : > { %v888_v49 = vpop.eup %887 }
 0x372   : > { %v590_v50 = vmul.f32 %v888_v49, %v884_v10 }
 0x374   : > { %637 = vst.msk [vmem:[%s380_s29 + $0x8] sm:$0xff] %vm459_vm1, %v590_v50  ;;  %v592_v51 = vpack.c.bf16 %v590_v50, %v590_v50 }
 0x376   : > { %806 = vmatmul.msk.bf16.vlgmr.msrb.gmra.mxu2 %vm459_vm1, %v592_v51 }
 0x377   : > { %931 = shalt.err (!%p928_p8)
}
 0x378   : > { %s973_s26 = smov 128   ;;  %s974_s29 = smov 8   ;;  %vm633_vm7 = vcmask 125952  }
 0x379   : > { %817 = dma.vmem_to_hbm [thread:$0]  (%p1063_p5), %s661_s22, 256, %s663_s25, %s644_s23, %s973_s26, %s973_s26, %s974_s29  }
 0x37a   : > { %s403_s17 = scalar_lea.vmem %s1186_s8, %s1082_s27 }
 0x3f1   : > { %v608_v52 = vpop.f32.mrf.mxu3 }
 0x3f2   : > { %v631_v53 = vpack.c.bf16 %v608_v52, %v608_v52 }
 0x3f4   : > { %634 = vst.msk [vmem:[%s403_s17] sm:$0xf] %vm633_vm7, %v631_v53 }
 0x3f9   : > { %v610_v54 = vpop.f32.mrf.mxu3  ;;  %v627_v55 = vpop.f32.mrf.mxu2 }
 0x3fa   : > { %v632_v56 = vpack.c.bf16 %v627_v55, %v627_v55 }
 0x3fc   : > { %635 = vst.msk [vmem:[%s403_s17 + $0x4] sm:$0xf] %vm633_vm7, %v632_v56 }
 0x401   : > { %v629_v57 = vpop.f32.mrf.mxu2 }
 0x402 PF: > { %p829_p9 = scmp.ge.s32.totalorder %s970_s12, 2  ;;  %s685_s0 = sand.u32 1, %s958_s30  }
 0x403   : > { %s686_s1 = scalar_lea.sflag [#allocation3], %s685_s0 }
 0x404   : > { %p824_p5 = pnand %p829_p9, %p1067_p6 }
 0x406   : > { %p825_p10 = pneg %p824_p5 }
 0x408   : > { %953 = dma.done.wait (%p825_p10), %s686_s1, 256  }
 0x409   : > { %955 = vsyncadd (%p825_p10), %s686_s1, 4294967040  ;;  %p21_p11 = scmp.ge.s32.totalorder %s1050_s15, 4   ;;  %s1198_s30 = smov %s962_s10 }
 0x40a   : > { %s1199_s10 = smov %s966_s11  ;;  %s1200_s11 = smov %s1061_s18 }
 0x40b   : > { %s1201_s12 = smov %s1050_s15  ;;  %23 = sbr.rel (!%p21_p11) target bundleno = 9 (0x9), region = 110 }
 0x410   :  { %692 = vsyncpa [#allocation3], 1 }
 0x411   :  { %694 = vsyncpa [#allocation3 + $0x1], 1 }
 0x412   :  { %695 = vsyncpa [#allocation4], 1 }
 0x413   :  { %697 = vsyncpa [#allocation4 + $0x1], 1 }

// kernel: cl4kt_forward.33
= control target key start
LH: loop header
LB: loop body
LE: loop exit
PB: predicated region body
PF: predicated region fallthrough
CT: control target
= control target key end

     0   :  { %s2004_s0 = inlined_call_operand.vmem [shape: bf16[16,64], index: 0, kind: input, shape index: {}]   ;;  %s2005_s1 = inlined_call_operand.vmem [shape: bf16[64,512], index: 1, kind: input, shape index: {}]   ;;  %s2006_s2 = inlined_call_operand.vmem [shape: f32[1,512], index: 2, kind: input, shape index: {}]   ;;  %s2007_s3 = inlined_call_operand.hbm [shape: bf16[512,256], index: 3, kind: input, shape index: {}]   ;;  %s2008_s4 = inlined_call_operand.vmem [shape: f32[1,256], index: 4, kind: input, shape index: {}]   ;;  %s2009_s5 = inlined_call_operand.vmem [shape: f32[1,256], index: 5, kind: input, shape index: {}]   ;;  %s2010_s6 = inlined_call_operand.<no memory space> [shape: f32[1,1], index: 6, kind: input, shape index: {}]   ;;  %s2011_s7 = inlined_call_operand.vmem [shape: f32[16,1], index: 7, kind: output, shape index: {}]  }
   0x1   :  { %v12_v0 = vstv %s2010_s6 }
   0x2   :  { %13 = vst [vmem:[#allocation2] sm:$0x1] %v12_v0 }
   0x3   :  { %14 = vsyncpa [#allocation4], 0  ;;  %s25_s28 = sshll.u32 %s2007_s3, 4  ;;  %s1602_s29 = smov [#allocation3]   ;;  %s26_s28 = int_to_ptr.hbm [resolvable:$true] %s25_s28 }
   0x4   :  { %s27_s30 = sshll.u32 %s1602_s29, 4  ;;  %s1603_s8 = smov 128   ;;  %s28_s30 = int_to_ptr.vmem [resolvable:$true] %s27_s30 }
   0x5   :  { %s1604_s9 = smov 8  }
   0x6   :  { %33 = dma.hbm_to_vmem [thread:$0]  %s26_s28, 8192, %s28_s30, [#allocation4], %s1603_s8, %s1603_s8, %s1604_s9  }
   0x7   :  { %1600 = dma.done.wait [#allocation4], 8192  }
   0x8   :  { %1601 = vsyncadd [#allocation4], 4294959104  ;;  %v1158_v1 = vld [vmem:[%s2005_s1 + $0x60] sm:$0xf]  ;;  %v1449_v2 = vld [vmem:[%s2005_s1 + $0x6c] sm:$0xf0] }
   0x9   :  { %v1447_v3 = vld [vmem:[%s2005_s1 + $0x64] sm:$0xf]  ;;  %v1159_v4 = vor.u32 %v1449_v2, %v1158_v1  ;;  %v1160_v5 = vld [vmem:[%s2005_s1 + $0x70] sm:$0xf0]  ;;  %v1166_v6 = vld [vmem:[%s2005_s1 + $0x68] sm:$0xf] }
   0xa   :  { %v1450_v7 = vld [vmem:[%s2005_s1 + $0x74] sm:$0xf0]  ;;  %v1163_v8 = vor.u32 %v1447_v3, %v1160_v5  ;;  %v1448_v10 = vld [vmem:[%s2005_s1 + $0x6c] sm:$0xf]  ;;  %v1168_v11 = vld [vmem:[%s2005_s1 + $0x78] sm:$0xf0] }
   0xb   :  { %v1167_v9 = vor.u32 %v1450_v7, %v1166_v6  ;;  %v1142_v12 = vld [vmem:[%s2005_s1 + $0x40] sm:$0xf]  ;;  %166 = vmatpush.bf16.msra.mxu0 %v1159_v4  ;;  %v1171_v13 = vor.u32 %v1448_v10, %v1168_v11  ;;  %v1445_v14 = vld [vmem:[%s2005_s1 + $0x4c] sm:$0xf0]  ;;  %v1443_v15 = vld [vmem:[%s2005_s1 + $0x44] sm:$0xf] }
   0xc   :  { %v1144_v16 = vld [vmem:[%s2005_s1 + $0x50] sm:$0xf0]  ;;  %180 = vmatpush.bf16.msra.mxu1 %v1163_v8  ;;  %v1143_v17 = vor.u32 %v1445_v14, %v1142_v12  ;;  %v1150_v19 = vld [vmem:[%s2005_s1 + $0x48] sm:$0xf]  ;;  %v1446_v20 = vld [vmem:[%s2005_s1 + $0x54] sm:$0xf0] }
   0xd   :  { %194 = vmatpush.bf16.msra.mxu2 %v1167_v9  ;;  %v1147_v18 = vor.u32 %v1443_v15, %v1144_v16  ;;  %v1444_v21 = vld [vmem:[%s2005_s1 + $0x4c] sm:$0xf]  ;;  %208 = vmatpush.bf16.msra.mxu3 %v1171_v13  ;;  %v1151_v22 = vor.u32 %v1446_v20, %v1150_v19  ;;  %v1152_v23 = vld [vmem:[%s2005_s1 + $0x58] sm:$0xf0]  ;;  %v1126_v24 = vld [vmem:[%s2005_s1 + $0x20] sm:$0xf] }
   0xe   :  { %v1441_v25 = vld [vmem:[%s2005_s1 + $0x2c] sm:$0xf0]  ;;  %v1155_v26 = vor.u32 %v1444_v21, %v1152_v23  ;;  %v1439_v27 = vld [vmem:[%s2005_s1 + $0x24] sm:$0xf]  ;;  %v1128_v28 = vld [vmem:[%s2005_s1 + $0x30] sm:$0xf0] }
   0xf   :  { %v1134_v29 = vld [vmem:[%s2005_s1 + $0x28] sm:$0xf]  ;;  %167 = vmatpush.bf16.msra.mxu0 %v1143_v17  ;;  %v1127_v30 = vor.u32 %v1441_v25, %v1126_v24  ;;  %v1442_v31 = vld [vmem:[%s2005_s1 + $0x34] sm:$0xf0]  ;;  %v1440_v32 = vld [vmem:[%s2005_s1 + $0x2c] sm:$0xf]  ;;  %v1131_v34 = vor.u32 %v1439_v27, %v1128_v28 }
  0x10   :  { %v1136_v33 = vld [vmem:[%s2005_s1 + $0x38] sm:$0xf0]  ;;  %181 = vmatpush.bf16.msra.mxu1 %v1147_v18  ;;  %v1135_v35 = vor.u32 %v1442_v31, %v1134_v29  ;;  %v1110_v36 = vld [vmem:[%s2005_s1] sm:$0xf]  ;;  %v1437_v37 = vld [vmem:[%s2005_s1 + $0xc] sm:$0xf0] }
  0x11   :  { %195 = vmatpush.bf16.msra.mxu2 %v1151_v22  ;;  %v1435_v38 = vld [vmem:[%s2005_s1 + $0x4] sm:$0xf]  ;;  %209 = vmatpush.bf16.msra.mxu3 %v1155_v26  ;;  %v1139_v39 = vor.u32 %v1440_v32, %v1136_v33  ;;  %v1112_v40 = vld [vmem:[%s2005_s1 + $0x10] sm:$0xf0]  ;;  %v1118_v41 = vld [vmem:[%s2005_s1 + $0x8] sm:$0xf]  ;;  %v1111_v45 = vor.u32 %v1437_v37, %v1110_v36 }
  0x12   :  { %v1438_v42 = vld [vmem:[%s2005_s1 + $0x14] sm:$0xf0]  ;;  %v1436_v43 = vld [vmem:[%s2005_s1 + $0xc] sm:$0xf]  ;;  %v1120_v44 = vld [vmem:[%s2005_s1 + $0x18] sm:$0xf0]  ;;  %v1115_v46 = vor.u32 %v1435_v38, %v1112_v40 }
  0x13   :  { %168 = vmatpush.bf16.msra.mxu0 %v1127_v30  ;;  %v1119_v47 = vor.u32 %v1438_v42, %v1118_v41  ;;  %v1123_v48 = vor.u32 %v1436_v43, %v1120_v44  ;;  %v1434_v49 = vld [vmem:[%s2004_s0] sm:$0xff]  ;;  %vm158_vm0 = vcmask 523264   ;;  %v1234_v50 = vld [vmem:[#allocation3 + $0x70] sm:$0xf]  ;;  %v1466_v51 = vld [vmem:[#allocation3 + $0x74] sm:$0xf0] }
  0x14   :  { %182 = vmatpush.bf16.msra.mxu1 %v1131_v34  ;;  %v1298_v52 = vld [vmem:[#allocation3 + $0xf0] sm:$0xf]  ;;  %v1235_v53 = vor.u32 %v1466_v51, %v1234_v50  ;;  %v1482_v54 = vld [vmem:[#allocation3 + $0xf4] sm:$0xf0]  ;;  %v1754_v56 = vld [vmem:[%s2006_s2] sm:$0xf] }
  0x15   :  { %196 = vmatpush.bf16.msra.mxu2 %v1135_v35  ;;  %210 = vmatpush.bf16.msra.mxu3 %v1139_v39  ;;  %v1299_v55 = vor.u32 %v1482_v54, %v1298_v52  ;;  %v65_v57 = vperm.slane %v1754_v56, 0  ;;  %v66_v58 = vperm.slane %v1754_v56, 1  ;;  %v67_v1 = vperm.slane %v1754_v56, 2  ;;  %v1226_v2 = vld [vmem:[#allocation3 + $0x60] sm:$0xf] }
  0x16   :  { %v68_v4 = vperm.slane %v1754_v56, 3  ;;  %v1464_v5 = vld [vmem:[#allocation3 + $0x64] sm:$0xf0]  ;;  %v1290_v8 = vld [vmem:[#allocation3 + $0xe0] sm:$0xf]  ;;  %v1605_v33 = vmov -1.0  }
  0x17   :  { %169 = vmatpush.bf16.msra.mxu0 %v1111_v45  ;;  %v1227_v7 = vor.u32 %v1464_v5, %v1226_v2  ;;  %v1480_v11 = vld [vmem:[#allocation3 + $0xe4] sm:$0xf0]  ;;  %vm1096_vm15 = vcmask 7168  }
  0x18   :  { %183 = vmatpush.bf16.msra.mxu1 %v1115_v46  ;;  %v1291_v16 = vor.u32 %v1480_v11, %v1290_v8 }
  0x19   :  { %197 = vmatpush.bf16.msra.mxu2 %v1119_v47  ;;  %211 = vmatpush.bf16.msra.mxu3 %v1123_v48 }
  0x1a   :  { %1172 = vmatmul.msk.bf16.vlgmr.msra.gmra.mxu0 %vm158_vm0, %v1434_v49 }
  0x1b   :  { %1173 = vmatmul.msk.bf16.vlgmr.msra.gmra.mxu1 %vm158_vm0, %v1434_v49  ;;  %820 = vmatpush.bf16.msrb.mxu0 %v1235_v53 }
  0x1c   :  { %1174 = vmatmul.msk.bf16.vlgmr.msra.gmra.mxu2 %vm158_vm0, %v1434_v49  ;;  %1175 = vmatmul.msk.bf16.vlgmr.msra.gmra.mxu3 %vm158_vm0, %v1434_v49 }
  0x1d   :  { %834 = vmatpush.bf16.msrb.mxu1 %v1299_v55 }
  0x1f   :  { %821 = vmatpush.bf16.msrb.mxu0 %v1227_v7 }
  0x21   :  { %835 = vmatpush.bf16.msrb.mxu1 %v1291_v16 }
  0x97   :  { %v171_v59 = vpop.f32.mrf.mxu0 }
  0x98   :  { %v172_v60 = vadd.f32 %v171_v59, %v65_v57  ;;  %v185_v61 = vpop.f32.mrf.mxu1 }
  0x99   :  { %v186_v62 = vadd.f32 %v185_v61, %v66_v58 }
  0x9a   :  { %v226_v63 = vmul.f32 0.70710677, %v172_v60  ;;  %v1767_v30 = vmul.f32 0.5, %v172_v60 }
  0x9b   :  { %v227_v0 = vmul.f32 0.70710677, %v186_v62  ;;  %v1773_v35 = vmul.f32 0.5, %v186_v62 }
  0x9c   :  { %v250_v3 = vand.u32 2147483647, %v226_v63  ;;  %vm234_vm1 = vcmp.ge.f32.partialorder %v226_v63, 0.0 }
  0x9d   :  { %v251_v6 = vand.u32 2147483647, %v227_v0  ;;  %vm235_vm2 = vcmp.ge.f32.partialorder %v227_v0, 0.0  ;;  %v1771_v34 = vsel %vm234_vm1, 1.0, %v1605_v33 }
  0x9e   :  { %v258_v9 = vmul.f32 0.3275911, %v250_v3  ;;  %v354_v19 = vsub.f32 0.0, %v250_v3  ;;  %v1778_v39 = vsel %vm235_vm2, 1.0, %v1605_v33 }
  0x9f   :  { %v199_v10 = vpop.f32.mrf.mxu2  ;;  %v259_v12 = vmul.f32 0.3275911, %v251_v6  ;;  %v213_v14 = vpop.f32.mrf.mxu3  ;;  %v355_v24 = vsub.f32 0.0, %v251_v6 }
  0xa0   :  { %v200_v13 = vadd.f32 %v199_v10, %v67_v1  ;;  %v173_v15 = vpop.f32.mrf.mxu0  ;;  %v266_v17 = vadd.f32 1.0, %v258_v9  ;;  %v1762_v18 = vadd.f32 %v213_v14, %v68_v4  ;;  %v362_v27 = vmul.f32 %v354_v19, %v250_v3  ;;  %v187_v29 = vpop.f32.mrf.mxu1 }
  0xa1   :  { %v267_v20 = vadd.f32 1.0, %v259_v12  ;;  %v174_v23 = vadd.f32 %v173_v15, %v65_v57  ;;  %v363_v36 = vmul.f32 %v355_v24, %v251_v6  ;;  %v1782_v42 = vadd.f32 %v187_v29, %v66_v58 }
  0xa2   :  { %v228_v21 = vmul.f32 0.70710677, %v200_v13  ;;  %1520 = vrcp.f32 %v266_v17  ;;  %v229_v22 = vmul.f32 0.70710677, %v1762_v18  ;;  %v370_v46 = vmul.f32 1.442695, %v362_v27 }
  0xa3   :  { %1522 = vrcp.f32 %v267_v20  ;;  %v230_v32 = vmul.f32 0.70710677, %v174_v23  ;;  %v372_v51 = vmul.f32 1.442695, %v363_v36  ;;  %v1791_v54 = vmul.f32 0.5, %v200_v13 }
  0xa4   :  { %v252_v25 = vand.u32 2147483647, %v228_v21  ;;  %v1765_v26 = vand.u32 2147483647, %v229_v22  ;;  %vm236_vm3 = vcmp.ge.f32.partialorder %v228_v21, 0.0  ;;  %vm237_vm4 = vcmp.ge.f32.partialorder %v229_v22, 0.0 }
  0xa5   :  { %v1780_v41 = vand.u32 2147483647, %v230_v32  ;;  %v1794_v57 = vmul.f32 0.70710677, %v1782_v42  ;;  %v1798_v59 = vsel %vm236_vm3, 1.0, %v1605_v33  ;;  %v1802_v62 = vsel %vm237_vm4, 1.0, %v1605_v33 }
  0xa6   :  { %v260_v28 = vmul.f32 0.3275911, %v252_v25  ;;  %v261_v31 = vmul.f32 0.3275911, %v1765_v26  ;;  %v356_v47 = vsub.f32 0.0, %v252_v25  ;;  %v357_v2 = vsub.f32 0.0, %v1765_v26 }
  0xa7   :  { %v201_v43 = vpop.f32.mrf.mxu2  ;;  %v262_v49 = vmul.f32 0.3275911, %v1780_v41  ;;  %v255_v63 = vand.u32 2147483647, %v1794_v57  ;;  %vm238_vm5 = vcmp.ge.f32.partialorder %v230_v32, 0.0  ;;  %v1816_v12 = vmul.f32 0.5, %v174_v23  ;;  %v215_v17 = vpop.f32.mrf.mxu3 }
  0xa8   :  { %v268_v37 = vadd.f32 1.0, %v260_v28  ;;  %v1775_v38 = vpop.eup %1520  ;;  %v269_v40 = vadd.f32 1.0, %v261_v31  ;;  %v1789_v52 = vadd.f32 %v201_v43, %v67_v1  ;;  %v364_v60 = vmul.f32 %v356_v47, %v252_v25 }
  0xa9   :  { %v1784_v44 = vpop.eup %1522  ;;  %v282_v45 = vmul.f32 1.0614054, %v1775_v38  ;;  %v270_v55 = vadd.f32 1.0, %v262_v49  ;;  %v263_v8 = vmul.f32 0.3275911, %v255_v63  ;;  %v1820_v15 = vsel %vm238_vm5, 1.0, %v1605_v33 }
  0xaa   :  { %1524 = vrcp.f32 %v268_v37  ;;  %v283_v48 = vmul.f32 1.0614054, %v1784_v44  ;;  %v1809_v3 = vmul.f32 0.70710677, %v1789_v52  ;;  %v374_v10 = vmul.f32 1.442695, %v364_v60 }
  0xab   :  { %1526 = vrcp.f32 %v269_v40  ;;  %v290_v50 = vadd.f32 -1.4531521, %v282_v45  ;;  %v271_v16 = vadd.f32 1.0, %v263_v8  ;;  %v365_v22 = vmul.f32 %v357_v2, %v1765_v26 }
  0xac   :  { %v291_v53 = vadd.f32 -1.4531521, %v283_v48  ;;  %1528 = vpow2.f32 %v370_v46  ;;  %v256_v24 = vand.u32 2147483647, %v1809_v3  ;;  %v358_v28 = vsub.f32 0.0, %v1780_v41 }
  0xad   :  { %v298_v58 = vmul.f32 %v1775_v38, %v290_v50  ;;  %1530 = vrcp.f32 %v270_v55  ;;  %v1833_v36 = vadd.f32 %v215_v17, %v68_v4  ;;  %v359_v43 = vsub.f32 0.0, %v255_v63 }
  0xae   :  { %v299_v61 = vmul.f32 %v1784_v44, %v291_v53  ;;  %1532 = vpow2.f32 %v372_v51  ;;  %v264_v45 = vmul.f32 0.3275911, %v256_v24  ;;  %v366_v51 = vmul.f32 %v358_v28, %v1780_v41 }
  0xaf   :  { %v306_v1 = vadd.f32 1.4214138, %v298_v58  ;;  %1534 = vrcp.f32 %v271_v16  ;;  %v376_v4 = vmul.f32 1.442695, %v365_v22  ;;  %v1845_v2 = vmul.f32 0.70710677, %v1833_v36 }
  0xb0   :  { %v1805_v0 = vpop.eup %1524  ;;  %v307_v6 = vadd.f32 1.4214138, %v299_v61  ;;  %v272_v53 = vadd.f32 1.0, %v264_v45  ;;  %v378_v8 = vmul.f32 1.442695, %v366_v51  ;;  %vm239_vm6 = vcmp.ge.f32.partialorder %v1794_v57, 0.0 }
  0xb1   :  { %v1811_v5 = vpop.eup %1526  ;;  %v284_v7 = vmul.f32 1.0614054, %v1805_v0  ;;  %v314_v9 = vmul.f32 %v1775_v38, %v306_v1  ;;  %vm240_vm7 = vcmp.ge.f32.partialorder %v1809_v3, 0.0  ;;  %v1462_v51 = vld [vmem:[#allocation3 + $0x54] sm:$0xf0]  ;;  %vm241_vm8 = vcmp.ge.f32.partialorder %v1845_v2, 0.0 }
  0xb2   :  { %v285_v11 = vmul.f32 1.0614054, %v1811_v5  ;;  %v315_v13 = vmul.f32 %v1784_v44, %v307_v6  ;;  %v1529_v19 = vpop.eup %1528  ;;  %1536 = vrcp.f32 %v272_v53  ;;  %v1282_v57 = vld [vmem:[#allocation3 + $0xd0] sm:$0xf] }
  0xb3   :  { %v292_v14 = vadd.f32 -1.4531521, %v284_v7  ;;  %v322_v20 = vadd.f32 -0.28449672, %v314_v9  ;;  %v1824_v25 = vpop.eup %1530  ;;  %1538 = vpow2.f32 %v374_v10  ;;  %v367_v7 = vmul.f32 %v359_v43, %v255_v63  ;;  %v1514_v43 = vld [vmem:[#allocation3 + $0x1f4] sm:$0xf0] }
  0xb4   :  { %v293_v21 = vadd.f32 -1.4531521, %v285_v11  ;;  %v323_v27 = vadd.f32 -0.28449672, %v315_v13  ;;  %v286_v32 = vmul.f32 1.0614054, %v1824_v25  ;;  %v1533_v26 = vpop.eup %1532  ;;  %1540 = vpow2.f32 %v376_v4 }
  0xb5   :  { %v300_v23 = vmul.f32 %v1805_v0, %v292_v14  ;;  %v330_v29 = vmul.f32 %v1775_v38, %v322_v20  ;;  %v1841_v60 = vpop.eup %1534  ;;  %v1849_v9 = vmul.f32 0.5, %v1782_v42  ;;  %v360_v11 = vsub.f32 0.0, %v256_v24 }
  0xb6   :  { %v301_v31 = vmul.f32 %v1811_v5, %v293_v21  ;;  %v331_v37 = vmul.f32 %v1784_v44, %v323_v27  ;;  %v294_v48 = vadd.f32 -1.4531521, %v286_v32  ;;  %v287_v41 = vmul.f32 1.0614054, %v1841_v60 }
  0xb7   :  { %v308_v40 = vadd.f32 1.4214138, %v300_v23  ;;  %v338_v46 = vadd.f32 0.2548296, %v330_v29  ;;  %v1854_v10 = vmul.f32 0.5, %v1789_v52  ;;  %1542 = vpow2.f32 %v378_v8 }
  0xb8   :  { %v309_v47 = vadd.f32 1.4214138, %v301_v31  ;;  %v339_v49 = vadd.f32 0.2548296, %v331_v37  ;;  %v302_v58 = vmul.f32 %v1824_v25, %v294_v48  ;;  %v295_v16 = vadd.f32 -1.4531521, %v287_v41  ;;  %v1861_v21 = vpop.eup %1536 }
  0xb9   :  { %v316_v50 = vmul.f32 %v1805_v0, %v308_v40  ;;  %v346_v55 = vmul.f32 %v1775_v38, %v338_v46  ;;  %v1857_v20 = vand.u32 2147483647, %v1845_v2  ;;  %v368_v27 = vmul.f32 %v360_v11, %v256_v24  ;;  %v1539_v28 = vpop.eup %1538  ;;  %v1498_v37 = vld [vmem:[#allocation3 + $0x174] sm:$0xf0]  ;;  %v1426_v40 = vld [vmem:[#allocation3 + $0x1f0] sm:$0xf] }
  0xba   :  { %v317_v56 = vmul.f32 %v1811_v5, %v309_v47  ;;  %v347_v61 = vmul.f32 %v1784_v44, %v339_v49  ;;  %v310_v6 = vadd.f32 1.4214138, %v302_v58  ;;  %v303_v42 = vmul.f32 %v1841_v60, %v295_v16  ;;  %v1541_v53 = vpop.eup %1540  ;;  %v1478_v41 = vld [vmem:[#allocation3 + $0xd4] sm:$0xf0]  ;;  %v1477_v2 = vld [vmem:[#allocation3 + $0xd4] sm:$0xf] }
  0xbb   :  { %v324_v1 = vadd.f32 -0.28449672, %v316_v50  ;;  %v386_v38 = vmul.f32 %v1529_v19, %v346_v55  ;;  %v380_v19 = vmul.f32 1.442695, %v367_v7  ;;  %v265_v23 = vmul.f32 0.3275911, %v1857_v20 }
  0xbc   :  { %v387_v13 = vmul.f32 %v1533_v26, %v347_v61  ;;  %v325_v14 = vadd.f32 -0.28449672, %v317_v56  ;;  %v318_v44 = vmul.f32 %v1824_v25, %v310_v6  ;;  %v311_v32 = vadd.f32 1.4214138, %v303_v42  ;;  %v1362_v26 = vld [vmem:[#allocation3 + $0x170] sm:$0xf] }
  0xbd   :  { %v332_v17 = vmul.f32 %v1805_v0, %v324_v1  ;;  %v394_v22 = vsub.f32 1.0, %v386_v38  ;;  %v1869_v46 = vsel %vm239_vm6, 1.0, %v1605_v33  ;;  %v288_v24 = vmul.f32 1.0614054, %v1861_v21  ;;  %v1218_v50 = vld [vmem:[#allocation3 + $0x50] sm:$0xf]  ;;  %v1543_v7 = vpop.eup %1542 }
  0xbe   :  { %v326_v63 = vadd.f32 -0.28449672, %v318_v44  ;;  %v395_v29 = vsub.f32 1.0, %v387_v13  ;;  %v333_v52 = vmul.f32 %v1811_v5, %v325_v14  ;;  %v273_v47 = vadd.f32 1.0, %v265_v23  ;;  %v1354_v14 = vld [vmem:[#allocation3 + $0x160] sm:$0xf] }
  0xbf   :  { %v340_v45 = vadd.f32 0.2548296, %v332_v17  ;;  %v319_v49 = vmul.f32 %v1841_v60, %v311_v32  ;;  %1544 = vpow2.f32 %v380_v19  ;;  %v402_v55 = vmul.f32 %v394_v22, %v1771_v34  ;;  %v1496_v34 = vld [vmem:[#allocation3 + $0x164] sm:$0xf0]  ;;  %v1418_v17 = vld [vmem:[#allocation3 + $0x1e0] sm:$0xf] }
  0xc0   :  { %v334_v31 = vmul.f32 %v1824_v25, %v326_v63  ;;  %v296_v56 = vadd.f32 -1.4531521, %v288_v24  ;;  %v382_v4 = vmul.f32 1.442695, %v368_v27  ;;  %1546 = vrcp.f32 %v273_v47  ;;  %v1512_v63 = vld [vmem:[#allocation3 + $0x1e4] sm:$0xf0] }
  0xc1   :  { %v403_v58 = vmul.f32 %v395_v29, %v1778_v39  ;;  %v341_v61 = vadd.f32 0.2548296, %v333_v52  ;;  %v327_v6 = vadd.f32 -0.28449672, %v319_v49  ;;  %v348_v38 = vmul.f32 %v1805_v0, %v340_v45  ;;  %v1210_v0 = vld [vmem:[#allocation3 + $0x40] sm:$0xf] }
  0xc2   :  { %v342_v48 = vadd.f32 0.2548296, %v334_v31  ;;  %v304_v8 = vmul.f32 %v1861_v21, %v296_v56  ;;  %v1363_v11 = vor.u32 %v1498_v37, %v1362_v26  ;;  %v1427_v13 = vor.u32 %v1514_v43, %v1426_v40  ;;  %v1460_v42 = vld [vmem:[#allocation3 + $0x44] sm:$0xf0]  ;;  %v1274_v19 = vld [vmem:[#allocation3 + $0xc0] sm:$0xf] }
  0xc3   :  { %v335_v16 = vmul.f32 %v1841_v60, %v327_v6  ;;  %v1885_v39 = vsel %vm240_vm7, 1.0, %v1605_v33  ;;  %v1476_v22 = vld [vmem:[#allocation3 + $0xc4] sm:$0xf0]  ;;  %v1219_v23 = vor.u32 %v1462_v51, %v1218_v50  ;;  %v1283_v29 = vor.u32 %v1478_v41, %v1282_v57  ;;  %v1346_v52 = vld [vmem:[#allocation3 + $0x150] sm:$0xf] }
  0xc4   :  { %v350_v1 = vmul.f32 %v1824_v25, %v342_v48  ;;  %v361_v25 = vsub.f32 0.0, %v1857_v20  ;;  %v312_v27 = vadd.f32 1.4214138, %v304_v8  ;;  %848 = vmatpush.bf16.msrb.mxu2 %v1363_v11  ;;  %862 = vmatpush.bf16.msrb.mxu3 %v1427_v13  ;;  %v1494_v31 = vld [vmem:[#allocation3 + $0x154] sm:$0xf0]  ;;  %v1888_v26 = vadd.f32 1.0, %v402_v55 }
  0xc5   :  { %v1545_v32 = vpop.eup %1544  ;;  %v349_v3 = vmul.f32 %v1811_v5, %v341_v61  ;;  %v343_v37 = vadd.f32 0.2548296, %v335_v16  ;;  %1548 = vpow2.f32 %v382_v4  ;;  %v1410_v40 = vld [vmem:[#allocation3 + $0x1d0] sm:$0xf]  ;;  %v1893_v45 = vadd.f32 1.0, %v403_v58  ;;  %822 = vmatpush.bf16.msrb.mxu0 %v1219_v23  ;;  %836 = vmatpush.bf16.msrb.mxu1 %v1283_v29 }
  0xc6   :  { %v1879_v44 = vmul.f32 %v1543_v7, %v350_v1  ;;  %v1891_v43 = vpop.eup %1546  ;;  %v1895_v24 = vmul.f32 %v1539_v28, %v348_v38  ;;  %v320_v47 = vmul.f32 %v1861_v21, %v312_v27  ;;  %v1355_v48 = vor.u32 %v1496_v34, %v1354_v14  ;;  %v1510_v49 = vld [vmem:[#allocation3 + $0x1d4] sm:$0xf0]  ;;  %v1202_v50 = vld [vmem:[#allocation3 + $0x30] sm:$0xf]  ;;  %v1338_v11 = vld [vmem:[#allocation3 + $0x140] sm:$0xf] }
  0xc7   :  { %v351_v5 = vmul.f32 %v1841_v60, %v343_v37  ;;  %v289_v55 = vmul.f32 1.0614054, %v1891_v43  ;;  %v369_v56 = vmul.f32 %v361_v25, %v1857_v20  ;;  %v1458_v4 = vld [vmem:[#allocation3 + $0x34] sm:$0xf0]  ;;  %v1419_v28 = vor.u32 %v1512_v63, %v1418_v17  ;;  %v1266_v1 = vld [vmem:[#allocation3 + $0xb0] sm:$0xf] }
  0xc8   :  { %v398_v51 = vsub.f32 1.0, %v1879_v44  ;;  %v328_v57 = vadd.f32 -0.28449672, %v320_v47  ;;  %849 = vmatpush.bf16.msrb.mxu2 %v1355_v48  ;;  %v1211_v58 = vor.u32 %v1460_v42, %v1210_v0  ;;  %v1275_v61 = vor.u32 %v1476_v22, %v1274_v19  ;;  %v1474_v6 = vld [vmem:[#allocation3 + $0xb4] sm:$0xf0] }
  0xc9   :  { %v1902_v41 = vmul.f32 %v1541_v53, %v349_v3  ;;  %v391_v7 = vmul.f32 %v1545_v32, %v351_v5  ;;  %v297_v38 = vadd.f32 -1.4531521, %v289_v55  ;;  %v1347_v8 = vor.u32 %v1494_v31, %v1346_v52  ;;  %v1492_v13 = vld [vmem:[#allocation3 + $0x144] sm:$0xf0]  ;;  %863 = vmatpush.bf16.msrb.mxu3 %v1419_v28  ;;  %v1402_v34 = vld [vmem:[#allocation3 + $0x1c0] sm:$0xf] }
  0xca   :  { %v336_v60 = vmul.f32 %v1861_v21, %v328_v57  ;;  %823 = vmatpush.bf16.msrb.mxu0 %v1211_v58  ;;  %v1411_v20 = vor.u32 %v1510_v49, %v1410_v40  ;;  %v1203_v14 = vor.u32 %v1458_v4, %v1202_v50  ;;  %v1508_v44 = vld [vmem:[#allocation3 + $0x1c4] sm:$0xf0]  ;;  %v1194_v16 = vld [vmem:[#allocation3 + $0x20] sm:$0xf]  ;;  %v396_v17 = vsub.f32 1.0, %v1895_v24  ;;  %837 = vmatpush.bf16.msrb.mxu1 %v1275_v61 }
  0xcb   :  { %v1549_v25 = vpop.eup %1548  ;;  %v399_v63 = vsub.f32 1.0, %v391_v7  ;;  %v305_v53 = vmul.f32 %v1891_v43, %v297_v38  ;;  %v1267_v0 = vor.u32 %v1474_v6, %v1266_v1  ;;  %v1456_v42 = vld [vmem:[#allocation3 + $0x24] sm:$0xf0]  ;;  %v1258_v19 = vld [vmem:[#allocation3 + $0xa0] sm:$0xf]  ;;  %v406_v22 = vmul.f32 %v398_v51, %v1820_v15 }
  0xcc   :  { %v344_v27 = vadd.f32 0.2548296, %v336_v60  ;;  %v384_v23 = vmul.f32 1.442695, %v369_v56  ;;  %850 = vmatpush.bf16.msrb.mxu2 %v1347_v8  ;;  %v1339_v29 = vor.u32 %v1492_v13, %v1338_v11  ;;  %v1472_v52 = vld [vmem:[#allocation3 + $0xa4] sm:$0xf0]  ;;  %v1403_v32 = vor.u32 %v1508_v44, %v1402_v34 }
  0xcd   :  { %v313_v31 = vadd.f32 1.4214138, %v305_v53  ;;  %v1330_v3 = vld [vmem:[#allocation3 + $0x130] sm:$0xf]  ;;  %v1490_v37 = vld [vmem:[#allocation3 + $0x134] sm:$0xf0]  ;;  %v407_v40 = vmul.f32 %v399_v63, %v1869_v46  ;;  %864 = vmatpush.bf16.msrb.mxu3 %v1411_v20  ;;  %v1195_v47 = vor.u32 %v1456_v42, %v1194_v16  ;;  %v1259_v51 = vor.u32 %v1472_v52, %v1258_v19 }
  0xce   :  { %v352_v24 = vmul.f32 %v1861_v21, %v344_v27  ;;  %824 = vmatpush.bf16.msrb.mxu0 %v1203_v14  ;;  %v1394_v48 = vld [vmem:[#allocation3 + $0x1b0] sm:$0xf]  ;;  %v1506_v49 = vld [vmem:[#allocation3 + $0x1b4] sm:$0xf0]  ;;  %838 = vmatpush.bf16.msrb.mxu1 %v1267_v0  ;;  %v397_v4 = vsub.f32 1.0, %v1902_v41  ;;  %v414_v57 = vadd.f32 1.0, %v406_v22  ;;  %v1331_v46 = vor.u32 %v1490_v37, %v1330_v3 }
  0xcf   :  { %v1186_v50 = vld [vmem:[#allocation3 + $0x10] sm:$0xf]  ;;  %v321_v15 = vmul.f32 %v1891_v43, %v313_v31  ;;  %v1454_v5 = vld [vmem:[#allocation3 + $0x14] sm:$0xf0]  ;;  %v1322_v21 = vld [vmem:[#allocation3 + $0x120] sm:$0xf]  ;;  %1550 = vpow2.f32 %v384_v23  ;;  %v1395_v8 = vor.u32 %v1506_v49, %v1394_v48  ;;  %v404_v16 = vmul.f32 %v396_v17, %v1798_v59 }
  0xd0   :  { %v1250_v55 = vld [vmem:[#allocation3 + $0x90] sm:$0xf]  ;;  %v1470_v56 = vld [vmem:[#allocation3 + $0x94] sm:$0xf0]  ;;  %v392_v28 = vmul.f32 %v1549_v25, %v352_v24  ;;  %851 = vmatpush.bf16.msrb.mxu2 %v1339_v29  ;;  %v1488_v58 = vld [vmem:[#allocation3 + $0x124] sm:$0xf0]  ;;  %v1187_v11 = vor.u32 %v1454_v5, %v1186_v50  ;;  %v418_v19 = vmul.f32 %v1888_v26, %v1767_v30  ;;  %v422_v22 = vmul.f32 %v414_v57, %v1816_v12 }
  0xd1   :  { %v329_v61 = vadd.f32 -0.28449672, %v321_v15  ;;  %v1386_v1 = vld [vmem:[#allocation3 + $0x1a0] sm:$0xf]  ;;  %v1504_v6 = vld [vmem:[#allocation3 + $0x1a4] sm:$0xf0]  ;;  %865 = vmatpush.bf16.msrb.mxu3 %v1403_v32  ;;  %v1251_v20 = vor.u32 %v1470_v56, %v1250_v55  ;;  %v1323_v63 = vor.u32 %v1488_v58, %v1322_v21  ;;  %v419_v31 = vmul.f32 %v1893_v45, %v1773_v35 }
  0xd2   :  { %v415_v7 = vadd.f32 1.0, %v407_v40  ;;  %v400_v38 = vsub.f32 1.0, %v392_v28  ;;  %825 = vmatpush.bf16.msrb.mxu0 %v1195_v47  ;;  %v1178_v13 = vld [vmem:[#allocation3] sm:$0xf]  ;;  %v1452_v60 = vld [vmem:[#allocation3 + $0x4] sm:$0xf0]  ;;  %839 = vmatpush.bf16.msrb.mxu1 %v1259_v51  ;;  %v1387_v59 = vor.u32 %v1504_v6, %v1386_v1  ;;  %v405_v50 = vmul.f32 %v397_v4, %v1802_v62 }
  0xd3   :  { %v337_v41 = vmul.f32 %v1891_v43, %v329_v61  ;;  %v1242_v14 = vld [vmem:[#allocation3 + $0x80] sm:$0xf]  ;;  %v1468_v34 = vld [vmem:[#allocation3 + $0x84] sm:$0xf0]  ;;  %v1465_v44 = vld [vmem:[#allocation3 + $0x74] sm:$0xf] }
  0xd4   :  { %v408_v25 = vmul.f32 %v400_v38, %v1885_v39  ;;  %852 = vmatpush.bf16.msrb.mxu2 %v1331_v46  ;;  %v1236_v53 = vld [vmem:[#allocation3 + $0x78] sm:$0xf0]  ;;  %v1481_v0 = vld [vmem:[#allocation3 + $0xf4] sm:$0xf]  ;;  %v1314_v23 = vld [vmem:[#allocation3 + $0x110] sm:$0xf]  ;;  %v423_v52 = vmul.f32 %v415_v7, %v1849_v9  ;;  %v1179_v39 = vor.u32 %v1452_v60, %v1178_v13  ;;  %v1243_v30 = vor.u32 %v1468_v34, %v1242_v14 }
  0xd5   :  { %v1300_v42 = vld [vmem:[#allocation3 + $0xf8] sm:$0xf0]  ;;  %v345_v27 = vadd.f32 0.2548296, %v337_v41  ;;  %v1486_v29 = vld [vmem:[#allocation3 + $0x114] sm:$0xf0]  ;;  %866 = vmatpush.bf16.msrb.mxu3 %v1395_v8  ;;  %v1551_v17 = vpop.eup %1550  ;;  %v1239_v12 = vor.u32 %v1465_v44, %v1236_v53 }
  0xd6   :  { %826 = vmatpush.bf16.msrb.mxu0 %v1187_v11  ;;  %840 = vmatpush.bf16.msrb.mxu1 %v1251_v20  ;;  %v1378_v26 = vld [vmem:[#allocation3 + $0x190] sm:$0xf]  ;;  %v1502_v3 = vld [vmem:[#allocation3 + $0x194] sm:$0xf0]  ;;  %v1463_v37 = vld [vmem:[#allocation3 + $0x64] sm:$0xf]  ;;  %v1303_v24 = vor.u32 %v1481_v0, %v1300_v42  ;;  %v1315_v47 = vor.u32 %v1486_v29, %v1314_v23  ;;  %v1926_v28 = vpack.c.bf16 %v423_v52, %v419_v31 }
  0xd7   :  { %v353_v32 = vmul.f32 %v1891_v43, %v345_v27  ;;  %v412_v40 = vadd.f32 1.0, %v404_v16  ;;  %v416_v9 = vadd.f32 1.0, %v408_v25  ;;  %v1228_v48 = vld [vmem:[#allocation3 + $0x68] sm:$0xf0]  ;;  %v1479_v49 = vld [vmem:[#allocation3 + $0xe4] sm:$0xf]  ;;  %v1924_v43 = vpack.c.bf16 %v422_v22, %v418_v19 }
  0xd8   :  { %853 = vmatpush.bf16.msrb.mxu2 %v1323_v63  ;;  %v1292_v51 = vld [vmem:[#allocation3 + $0xe8] sm:$0xf0]  ;;  %v1306_v35 = vld [vmem:[#allocation3 + $0x100] sm:$0xf]  ;;  %v1484_v45 = vld [vmem:[#allocation3 + $0x104] sm:$0xf0]  ;;  %v1379_v5 = vor.u32 %v1502_v3, %v1378_v26  ;;  %v1231_v62 = vor.u32 %v1463_v37, %v1228_v48 }
  0xd9   :  { %v393_v15 = vmul.f32 %v1551_v17, %v353_v32  ;;  %867 = vmatpush.bf16.msrb.mxu3 %v1387_v59  ;;  %v1370_v55 = vld [vmem:[#allocation3 + $0x180] sm:$0xf]  ;;  %v1497_v56 = vld [vmem:[#allocation3 + $0x174] sm:$0xf]  ;;  %v1364_v57 = vld [vmem:[#allocation3 + $0x178] sm:$0xf0]  ;;  %v424_v61 = vmul.f32 %v416_v9, %v1854_v10  ;;  %v1295_v1 = vor.u32 %v1479_v49, %v1292_v51  ;;  %v1307_v6 = vor.u32 %v1484_v45, %v1306_v35 }
  0xda   :  { %827 = vmatpush.bf16.msrb.mxu0 %v1179_v39  ;;  %v249_v46 = vsel %vm241_vm8, 1.0, %v1605_v33  ;;  %841 = vmatpush.bf16.msrb.mxu1 %v1243_v30  ;;  %v1500_v4 = vld [vmem:[#allocation3 + $0x184] sm:$0xf0]  ;;  %v1513_v58 = vld [vmem:[#allocation3 + $0x1f4] sm:$0xf]  ;;  %v413_v11 = vadd.f32 1.0, %v405_v50  ;;  %v1367_v60 = vor.u32 %v1497_v56, %v1364_v57  ;;  %v420_v20 = vmul.f32 %v412_v40, %v1791_v54 }
  0xdb   :  { %v401_v21 = vsub.f32 1.0, %v393_v15  ;;  %v1428_v7 = vld [vmem:[#allocation3 + $0x1f8] sm:$0xf0]  ;;  %v1461_v38 = vld [vmem:[#allocation3 + $0x54] sm:$0xf]  ;;  %v221_v14 = vmul.f32 0.5, %v1762_v18  ;;  %v1371_v10 = vor.u32 %v1500_v4, %v1370_v55 }
  0xdc   :  { %854 = vmatpush.bf16.msrb.mxu2 %v1315_v47  ;;  %v1220_v8 = vld [vmem:[#allocation3 + $0x58] sm:$0xf0]  ;;  %v1495_v34 = vld [vmem:[#allocation3 + $0x164] sm:$0xf]  ;;  %v1356_v44 = vld [vmem:[#allocation3 + $0x168] sm:$0xf0]  ;;  %v1431_v63 = vor.u32 %v1513_v58, %v1428_v7  ;;  %v1937_v18 = vpack.c.bf16 %v424_v61, %v420_v20 }
  0xdd   :  { %v409_v13 = vmul.f32 %v401_v21, %v249_v46  ;;  %v1284_v41 = vld [vmem:[#allocation3 + $0xd8] sm:$0xf0]  ;;  %828 = vmatmul.bf16.vlgmr.msrb.gmra.mxu0 %v1924_v43  ;;  %868 = vmatpush.bf16.msrb.mxu3 %v1379_v5  ;;  %v225_v16 = vmul.f32 0.5, %v1833_v36  ;;  %v1223_v53 = vor.u32 %v1461_v38, %v1220_v8  ;;  %v1511_v0 = vld [vmem:[#allocation3 + $0x1e4] sm:$0xf]  ;;  %v421_v27 = vmul.f32 %v413_v11, %v221_v14 }
  0xde   :  { %876 = vmatpush.bf16.msra.mxu0 %v1239_v12  ;;  %890 = vmatpush.bf16.msra.mxu1 %v1303_v24  ;;  %v1287_v42 = vor.u32 %v1477_v2, %v1284_v41  ;;  %v1420_v19 = vld [vmem:[#allocation3 + $0x1e8] sm:$0xf0]  ;;  %v1459_v54 = vld [vmem:[#allocation3 + $0x44] sm:$0xf]  ;;  %v1359_v29 = vor.u32 %v1495_v34, %v1356_v44  ;;  %v1493_v36 = vld [vmem:[#allocation3 + $0x154] sm:$0xf] }
  0xdf   :  { %842 = vmatmul.bf16.vlgmr.msrb.gmra.mxu1 %v1926_v28  ;;  %v417_v25 = vadd.f32 1.0, %v409_v13  ;;  %v1212_v22 = vld [vmem:[#allocation3 + $0x48] sm:$0xf0]  ;;  %v1475_v52 = vld [vmem:[#allocation3 + $0xc4] sm:$0xf]  ;;  %v1423_v17 = vor.u32 %v1511_v0, %v1420_v19 }
  0xe0   :  { %855 = vmatpush.bf16.msrb.mxu2 %v1307_v6  ;;  %v1276_v59 = vld [vmem:[#allocation3 + $0xc8] sm:$0xf0]  ;;  %v1348_v39 = vld [vmem:[#allocation3 + $0x158] sm:$0xf0]  ;;  %v1215_v31 = vor.u32 %v1459_v54, %v1212_v22  ;;  %v1509_v32 = vld [vmem:[#allocation3 + $0x1d4] sm:$0xf] }
  0xe1   :  { %v425_v23 = vmul.f32 %v417_v25, %v225_v16  ;;  %869 = vmatpush.bf16.msrb.mxu3 %v1371_v10  ;;  %v1279_v12 = vor.u32 %v1475_v52, %v1276_v59  ;;  %v1412_v26 = vld [vmem:[#allocation3 + $0x1d8] sm:$0xf0]  ;;  %v1457_v3 = vld [vmem:[#allocation3 + $0x34] sm:$0xf]  ;;  %v1351_v40 = vor.u32 %v1493_v36, %v1348_v39  ;;  %v1491_v47 = vld [vmem:[#allocation3 + $0x144] sm:$0xf] }
  0xe2   :  { %877 = vmatpush.bf16.msra.mxu0 %v1231_v62  ;;  %891 = vmatpush.bf16.msra.mxu1 %v1295_v1  ;;  %v1204_v37 = vld [vmem:[#allocation3 + $0x38] sm:$0xf0]  ;;  %v1473_v9 = vld [vmem:[#allocation3 + $0xb4] sm:$0xf]  ;;  %v1340_v48 = vld [vmem:[#allocation3 + $0x148] sm:$0xf0]  ;;  %v1415_v49 = vor.u32 %v1509_v32, %v1412_v26 }
  0xe3   :  { %v1939_v30 = vpack.c.bf16 %v425_v23, %v421_v27  ;;  %856 = vmatmul.bf16.vlgmr.msrb.gmra.mxu2 %v1937_v18  ;;  %v1268_v24 = vld [vmem:[#allocation3 + $0xb8] sm:$0xf0]  ;;  %v1207_v50 = vor.u32 %v1457_v3, %v1204_v37  ;;  %v1507_v15 = vld [vmem:[#allocation3 + $0x1c4] sm:$0xf]  ;;  %v1404_v35 = vld [vmem:[#allocation3 + $0x1c8] sm:$0xf0]  ;;  %v1343_v55 = vor.u32 %v1491_v47, %v1340_v48 }
  0xe4   :  { %904 = vmatpush.bf16.msra.mxu2 %v1367_v60  ;;  %v1271_v51 = vor.u32 %v1473_v9, %v1268_v24  ;;  %v1455_v45 = vld [vmem:[#allocation3 + $0x24] sm:$0xf]  ;;  %v1196_v5 = vld [vmem:[#allocation3 + $0x28] sm:$0xf0]  ;;  %v1489_v46 = vld [vmem:[#allocation3 + $0x134] sm:$0xf]  ;;  %v1407_v62 = vor.u32 %v1507_v15, %v1404_v35 }
  0xe5   :  { %918 = vmatpush.bf16.msra.mxu3 %v1431_v63  ;;  %v1471_v56 = vld [vmem:[#allocation3 + $0xa4] sm:$0xf]  ;;  %v1260_v57 = vld [vmem:[#allocation3 + $0xa8] sm:$0xf0]  ;;  %v1332_v21 = vld [vmem:[#allocation3 + $0x138] sm:$0xf0]  ;;  %v1199_v4 = vor.u32 %v1455_v45, %v1196_v5 }
  0xe6   :  { %878 = vmatpush.bf16.msra.mxu0 %v1223_v53  ;;  %892 = vmatpush.bf16.msra.mxu1 %v1287_v42  ;;  %v1505_v58 = vld [vmem:[#allocation3 + $0x1b4] sm:$0xf]  ;;  %v1263_v61 = vor.u32 %v1471_v56, %v1260_v57  ;;  %v1396_v1 = vld [vmem:[#allocation3 + $0x1b8] sm:$0xf0]  ;;  %v1335_v38 = vor.u32 %v1489_v46, %v1332_v21  ;;  %v1487_v13 = vld [vmem:[#allocation3 + $0x124] sm:$0xf] }
  0xe7   :  { %870 = vmatmul.bf16.vlgmr.msrb.gmra.mxu3 %v1939_v30  ;;  %v1453_v6 = vld [vmem:[#allocation3 + $0x14] sm:$0xf]  ;;  %v1188_v7 = vld [vmem:[#allocation3 + $0x18] sm:$0xf0]  ;;  %v1324_v60 = vld [vmem:[#allocation3 + $0x128] sm:$0xf0]  ;;  %v1399_v2 = vor.u32 %v1505_v58, %v1396_v1 }
  0xe8   :  { %905 = vmatpush.bf16.msra.mxu2 %v1359_v29  ;;  %v1469_v8 = vld [vmem:[#allocation3 + $0x94] sm:$0xf]  ;;  %v1252_v11 = vld [vmem:[#allocation3 + $0x98] sm:$0xf0]  ;;  %v1191_v41 = vor.u32 %v1453_v6, %v1188_v7  ;;  %v1503_v20 = vld [vmem:[#allocation3 + $0x1a4] sm:$0xf]  ;;  %v1327_v16 = vor.u32 %v1487_v13, %v1324_v60 }
  0xe9   :  { %919 = vmatpush.bf16.msra.mxu3 %v1423_v17  ;;  %v1255_v14 = vor.u32 %v1469_v8, %v1252_v11  ;;  %v1388_v10 = vld [vmem:[#allocation3 + $0x1a8] sm:$0xf0]  ;;  %v1451_v34 = vld [vmem:[#allocation3 + $0x4] sm:$0xf]  ;;  %v1485_v53 = vld [vmem:[#allocation3 + $0x114] sm:$0xf] }
  0xea   :  { %879 = vmatpush.bf16.msra.mxu0 %v1215_v31  ;;  %893 = vmatpush.bf16.msra.mxu1 %v1279_v12  ;;  %v1180_v44 = vld [vmem:[#allocation3 + $0x8] sm:$0xf0]  ;;  %v1467_v25 = vld [vmem:[#allocation3 + $0x84] sm:$0xf]  ;;  %v1316_v0 = vld [vmem:[#allocation3 + $0x118] sm:$0xf0]  ;;  %v1391_v42 = vor.u32 %v1503_v20, %v1388_v10 }
  0xeb   :  { %v1244_v63 = vld [vmem:[#allocation3 + $0x88] sm:$0xf0]  ;;  %v1183_v19 = vor.u32 %v1451_v34, %v1180_v44  ;;  %v1501_v22 = vld [vmem:[#allocation3 + $0x194] sm:$0xf]  ;;  %v1380_v27 = vld [vmem:[#allocation3 + $0x198] sm:$0xf0]  ;;  %v1319_v23 = vor.u32 %v1485_v53, %v1316_v0 }
  0xec   :  { %906 = vmatpush.bf16.msra.mxu2 %v1351_v40  ;;  %v1247_v54 = vor.u32 %v1467_v25, %v1244_v63  ;;  %v1483_v29 = vld [vmem:[#allocation3 + $0x104] sm:$0xf]  ;;  %v1308_v52 = vld [vmem:[#allocation3 + $0x108] sm:$0xf0]  ;;  %v1383_v59 = vor.u32 %v1501_v22, %v1380_v27  ;;  %v494_v32 = vld [vmem:[%s2008_s4] sm:$0x3] }
  0xed   :  { %920 = vmatpush.bf16.msra.mxu3 %v1415_v49  ;;  %v1499_v36 = vld [vmem:[#allocation3 + $0x184] sm:$0xf]  ;;  %v1372_v39 = vld [vmem:[#allocation3 + $0x188] sm:$0xf0]  ;;  %v1311_v17 = vor.u32 %v1483_v29, %v1308_v52  ;;  %v496_v26 = vperm.slane %v494_v32, 0 }
  0xee   :  { %880 = vmatpush.bf16.msra.mxu0 %v1207_v50  ;;  %894 = vmatpush.bf16.msra.mxu1 %v1271_v51  ;;  %v1375_v31 = vor.u32 %v1499_v36, %v1372_v39 }
  0xf0   :  { %907 = vmatpush.bf16.msra.mxu2 %v1343_v55 }
  0xf1   :  { %921 = vmatpush.bf16.msra.mxu3 %v1407_v62 }
  0xf2   :  { %881 = vmatpush.bf16.msra.mxu0 %v1199_v4  ;;  %895 = vmatpush.bf16.msra.mxu1 %v1263_v61  ;;  %v497_v4 = vperm.slane %v494_v32, 1 }
  0xf4   :  { %908 = vmatpush.bf16.msra.mxu2 %v1335_v38 }
  0xf5   :  { %922 = vmatpush.bf16.msra.mxu3 %v1399_v2 }
  0xf6   :  { %882 = vmatpush.bf16.msra.mxu0 %v1191_v41  ;;  %896 = vmatpush.bf16.msra.mxu1 %v1255_v14 }
  0xf8   :  { %909 = vmatpush.bf16.msra.mxu2 %v1327_v16 }
  0xf9   :  { %923 = vmatpush.bf16.msra.mxu3 %v1391_v42 }
  0xfa   :  { %883 = vmatpush.bf16.msra.mxu0 %v1183_v19  ;;  %897 = vmatpush.bf16.msra.mxu1 %v1247_v54 }
  0xfc   :  { %910 = vmatpush.bf16.msra.mxu2 %v1319_v23 }
  0xfd   :  { %884 = vmatmul.bf16.vlgmr.msra.gmra.mxu0 %v1924_v43  ;;  %924 = vmatpush.bf16.msra.mxu3 %v1383_v59 }
  0xfe   :  { %898 = vmatmul.bf16.vlgmr.msra.gmra.mxu1 %v1926_v28 }
 0x100   :  { %911 = vmatpush.bf16.msra.mxu2 %v1311_v17 }
 0x101   :  { %925 = vmatpush.bf16.msra.mxu3 %v1375_v31 }
 0x103   :  { %912 = vmatmul.bf16.vlgmr.msra.gmra.mxu2 %v1937_v18 }
 0x104   :  { %926 = vmatmul.bf16.vlgmr.msra.gmra.mxu3 %v1939_v30 }
 0x15a   :  { %v829_v12 = vpop.f32.mrf.mxu0 }
 0x15b   :  { %v830_v3 = vadd.f32 %v829_v12, %v496_v26 }
 0x15c   :  { %v843_v37 = vpop.f32.mrf.mxu1 }
 0x15d   :  { %v844_v40 = vadd.f32 %v843_v37, %v830_v3 }
 0x162   :  { %v831_v43 = vpop.f32.mrf.mxu0 }
 0x163   :  { %v832_v47 = vadd.f32 %v831_v43, %v496_v26 }
 0x164   :  { %v845_v30 = vpop.f32.mrf.mxu1 }
 0x165   :  { %v846_v49 = vadd.f32 %v845_v30, %v832_v47 }
 0x166   :  { %v857_v9 = vpop.f32.mrf.mxu2 }
 0x167   :  { %v858_v24 = vadd.f32 %v857_v9, %v844_v40 }
 0x16a   :  { %v871_v28 = vpop.f32.mrf.mxu3 }
 0x16b   :  { %v1950_v48 = vadd.f32 %v871_v28, %v858_v24 }
 0x16d   :  { %v1953_v18 = vmul.f32 0.70710677, %v1950_v48 }
 0x16e   :  { %v859_v15 = vpop.f32.mrf.mxu2 }
 0x16f   :  { %v948_v50 = vand.u32 2147483647, %v1953_v18  ;;  %v860_v35 = vadd.f32 %v859_v15, %v846_v49  ;;  %vm940_vm9 = vcmp.ge.f32.partialorder %v1953_v18, 0.0 }
 0x171   :  { %v952_v51 = vmul.f32 0.3275911, %v948_v50  ;;  %v1000_v0 = vsub.f32 0.0, %v948_v50 }
 0x172   :  { %v873_v45 = vpop.f32.mrf.mxu3 }
 0x173   :  { %v956_v5 = vadd.f32 1.0, %v952_v51  ;;  %v1956_v55 = vadd.f32 %v873_v45, %v860_v35  ;;  %v1004_v59 = vmul.f32 %v1000_v0, %v948_v50 }
 0x175   :  { %1552 = vrcp.f32 %v956_v5  ;;  %v1959_v56 = vmul.f32 0.70710677, %v1956_v55  ;;  %v1008_v32 = vmul.f32 1.442695, %v1004_v59  ;;  %v932_v59 = vmul.f32 0.5, %v1950_v48 }
 0x177   :  { %v950_v57 = vand.u32 2147483647, %v1959_v56  ;;  %vm942_vm11 = vcmp.ge.f32.partialorder %v1959_v56, 0.0 }
 0x179   :  { %v954_v46 = vmul.f32 0.3275911, %v950_v57  ;;  %v1002_v3 = vsub.f32 0.0, %v950_v57 }
 0x17a   :  { %v885_v21 = vpop.f32.mrf.mxu0 }
 0x17b   :  { %v1553_v62 = vpop.eup %1552  ;;  %v958_v58 = vadd.f32 1.0, %v954_v46  ;;  %v886_v1 = vadd.f32 %v885_v21, %v497_v4  ;;  %v899_v6 = vpop.f32.mrf.mxu1  ;;  %v1006_v30 = vmul.f32 %v1002_v3, %v950_v57 }
 0x17c   :  { %v964_v61 = vmul.f32 1.0614054, %v1553_v62 }
 0x17d   :  { %1554 = vrcp.f32 %v958_v58  ;;  %v900_v8 = vadd.f32 %v899_v6, %v886_v1  ;;  %v1012_v45 = vmul.f32 1.442695, %v1006_v30 }
 0x17e   :  { %v968_v7 = vadd.f32 -1.4531521, %v964_v61 }
 0x180   :  { %v972_v2 = vmul.f32 %v1553_v62, %v968_v7 }
 0x182   :  { %v887_v13 = vpop.f32.mrf.mxu0  ;;  %v976_v44 = vadd.f32 1.4214138, %v972_v2 }
 0x183   :  { %v1962_v38 = vpop.eup %1554  ;;  %v888_v14 = vadd.f32 %v887_v13, %v497_v4  ;;  %v901_v25 = vpop.f32.mrf.mxu1 }
 0x184   :  { %v966_v11 = vmul.f32 1.0614054, %v1962_v38  ;;  %v980_v54 = vmul.f32 %v1553_v62, %v976_v44 }
 0x185   :  { %v902_v63 = vadd.f32 %v901_v25, %v888_v14 }
 0x186   :  { %v913_v60 = vpop.f32.mrf.mxu2  ;;  %v970_v34 = vadd.f32 -1.4531521, %v966_v11  ;;  %v984_v39 = vadd.f32 -0.28449672, %v980_v54 }
 0x187   :  { %v914_v41 = vadd.f32 %v913_v60, %v900_v8  ;;  %v927_v20 = vpop.f32.mrf.mxu3 }
 0x188   :  { %v974_v42 = vmul.f32 %v1962_v38, %v970_v34  ;;  %v988_v26 = vmul.f32 %v1553_v62, %v984_v39  ;;  %v944_v34 = vsel %vm940_vm9, 1.0, %v1605_v33 }
 0x189   :  { %v1965_v10 = vadd.f32 %v927_v20, %v914_v41 }
 0x18a   :  { %v978_v36 = vadd.f32 1.4214138, %v974_v42  ;;  %v992_v47 = vadd.f32 0.2548296, %v988_v26 }
 0x18b   :  { %v1968_v16 = vmul.f32 0.70710677, %v1965_v10 }
 0x18c   :  { %v982_v12 = vmul.f32 %v1962_v38, %v978_v36  ;;  %v996_v35 = vmul.f32 %v1553_v62, %v992_v47 }
 0x18d   :  { %v949_v53 = vand.u32 2147483647, %v1968_v16  ;;  %vm941_vm10 = vcmp.ge.f32.partialorder %v1968_v16, 0.0  ;;  %v946_v16 = vsel %vm942_vm11, 1.0, %v1605_v33 }
 0x18e   :  { %v915_v19 = vpop.f32.mrf.mxu2  ;;  %v986_v24 = vadd.f32 -0.28449672, %v982_v12 }
 0x18f   :  { %v953_v22 = vmul.f32 0.3275911, %v949_v53  ;;  %v916_v27 = vadd.f32 %v915_v19, %v902_v63  ;;  %v929_v23 = vpop.f32.mrf.mxu3  ;;  %v1001_v43 = vsub.f32 0.0, %v949_v53 }
 0x190   :  { %v990_v15 = vmul.f32 %v1962_v38, %v986_v24 }
 0x191   :  { %v957_v29 = vadd.f32 1.0, %v953_v22  ;;  %v1972_v52 = vadd.f32 %v929_v23, %v916_v27  ;;  %v1005_v50 = vmul.f32 %v1001_v43, %v949_v53  ;;  %v1036_v23 = vld [vmem:[%s2009_s5] sm:$0x3] }
 0x192   :  { %v994_v61 = vadd.f32 0.2548296, %v990_v15  ;;  %v1038_v56 = vperm.slane %v1036_v23, 0 }
 0x193   :  { %1556 = vrcp.f32 %v957_v29  ;;  %v1975_v17 = vmul.f32 0.70710677, %v1972_v52  ;;  %v1010_v4 = vmul.f32 1.442695, %v1005_v50  ;;  %v945_v29 = vsel %vm941_vm10, 1.0, %v1605_v33 }
 0x194   :  { %1558 = vpow2.f32 %v1008_v32  ;;  %v998_v13 = vmul.f32 %v1962_v38, %v994_v61  ;;  %v1039_v32 = vperm.slane %v1036_v23, 1 }
 0x195   :  { %v951_v31 = vand.u32 2147483647, %v1975_v17  ;;  %vm943_vm12 = vcmp.ge.f32.partialorder %v1975_v17, 0.0 }
 0x196   :  { %v947_v30 = vsel %vm943_vm12, 1.0, %v1605_v33 }
 0x197   :  { %v955_v37 = vmul.f32 0.3275911, %v951_v31  ;;  %v1003_v58 = vsub.f32 0.0, %v951_v31 }
 0x199   :  { %v1557_v40 = vpop.eup %1556  ;;  %v959_v9 = vadd.f32 1.0, %v955_v37  ;;  %v1007_v11 = vmul.f32 %v1003_v58, %v951_v31  ;;  %v933_v31 = vmul.f32 0.5, %v1965_v10 }
 0x19a   :  { %v965_v28 = vmul.f32 1.0614054, %v1557_v40  ;;  %v1559_v5 = vpop.eup %1558 }
 0x19b   :  { %1560 = vrcp.f32 %v959_v9  ;;  %v1016_v7 = vmul.f32 %v1559_v5, %v996_v35  ;;  %v1014_v44 = vmul.f32 1.442695, %v1007_v11 }
 0x19c   :  { %v969_v49 = vadd.f32 -1.4531521, %v965_v28  ;;  %1562 = vpow2.f32 %v1012_v45 }
 0x19d   :  { %1564 = vpow2.f32 %v1010_v4  ;;  %v1020_v2 = vsub.f32 1.0, %v1016_v7 }
 0x19e   :  { %v973_v51 = vmul.f32 %v1557_v40, %v969_v49  ;;  %1566 = vpow2.f32 %v1014_v44  ;;  %v934_v49 = vmul.f32 0.5, %v1956_v55 }
 0x19f   :  { %v1024_v0 = vmul.f32 %v1020_v2, %v944_v34 }
 0x1a0   :  { %v977_v46 = vadd.f32 1.4214138, %v973_v51  ;;  %v935_v51 = vmul.f32 0.5, %v1972_v52 }
 0x1a1   :  { %v1561_v21 = vpop.eup %1560  ;;  %v1028_v27 = vadd.f32 1.0, %v1024_v0 }
 0x1a2   :  { %v967_v1 = vmul.f32 1.0614054, %v1561_v21  ;;  %v981_v6 = vmul.f32 %v1557_v40, %v977_v46  ;;  %v1563_v14 = vpop.eup %1562 }
 0x1a3   :  { %v1018_v25 = vmul.f32 %v1563_v14, %v998_v13  ;;  %v1565_v42 = vpop.eup %1564  ;;  %v1032_v37 = vmul.f32 %v1028_v27, %v932_v59 }
 0x1a4   :  { %v971_v8 = vadd.f32 -1.4531521, %v967_v1  ;;  %v985_v57 = vadd.f32 -0.28449672, %v981_v6 }
 0x1a5   :  { %v1022_v38 = vsub.f32 1.0, %v1018_v25  ;;  %v1042_v48 = vmul.f32 %v1038_v56, %v1032_v37 }
 0x1a6   :  { %v975_v62 = vmul.f32 %v1561_v21, %v971_v8  ;;  %v989_v60 = vmul.f32 %v1557_v40, %v985_v57 }
 0x1a7   :  { %v1026_v12 = vmul.f32 %v1022_v38, %v946_v16 }
 0x1a8   :  { %v979_v41 = vadd.f32 1.4214138, %v975_v62  ;;  %v993_v20 = vadd.f32 0.2548296, %v989_v60 }
 0x1a9   :  { %v1030_v24 = vadd.f32 1.0, %v1026_v12 }
 0x1aa   :  { %v983_v63 = vmul.f32 %v1561_v21, %v979_v41  ;;  %v997_v53 = vmul.f32 %v1557_v40, %v993_v20  ;;  %v1567_v40 = vpop.eup %1566 }
 0x1ab   :  { %v1034_v15 = vmul.f32 %v1030_v24, %v934_v49 }
 0x1ac   :  { %v987_v18 = vadd.f32 -0.28449672, %v983_v63  ;;  %v1017_v19 = vmul.f32 %v1565_v42, %v997_v53 }
 0x1ad   :  { %v1044_v5 = vmul.f32 %v1038_v56, %v1034_v15 }
 0x1ae   :  { %v991_v54 = vmul.f32 %v1561_v21, %v987_v18  ;;  %v1021_v22 = vsub.f32 1.0, %v1017_v19 }
 0x1b0   :  { %v995_v36 = vadd.f32 0.2548296, %v991_v54  ;;  %v1025_v39 = vmul.f32 %v1021_v22, %v945_v29 }
 0x1b2   :  { %v999_v26 = vmul.f32 %v1561_v21, %v995_v36  ;;  %v1029_v3 = vadd.f32 1.0, %v1025_v39  ;;  %v1519_v21 = vld [vmem:[#allocation2] ss:$0 sm:$0xff] }
 0x1b4   :  { %v1019_v43 = vmul.f32 %v1567_v40, %v999_v26  ;;  %v1033_v9 = vmul.f32 %v1029_v3, %v933_v31 }
 0x1b6   :  { %v1023_v28 = vsub.f32 1.0, %v1019_v43  ;;  %v1043_v47 = vmul.f32 %v1039_v32, %v1033_v9 }
 0x1b8   :  { %v1027_v10 = vmul.f32 %v1023_v28, %v947_v30  ;;  %v1046_v50 = vadd.f32 %v1043_v47, %v1042_v48 }
 0x1ba   :  { %v1031_v35 = vadd.f32 1.0, %v1027_v10  ;;  %1047 = vadd.xlane.f32.xlu0 %v1046_v50 }
 0x1bc   :  { %v1035_v45 = vmul.f32 %v1031_v35, %v935_v51 }
 0x1be   :  { %v1045_v17 = vmul.f32 %v1039_v32, %v1035_v45 }
 0x1c0   :  { %v1049_v46 = vadd.f32 %v1045_v17, %v1044_v5 }
 0x1c2   :  { %1050 = vadd.xlane.f32.xlu0 %v1049_v46 }
 0x22d   :  { %v1048_v4 = vpop.xlane.xlu0 %1047 }
 0x22e   :  { %v1056_v58 = vadd.f32 %v1519_v21, %v1048_v4 }
 0x230   :  { %v1432_v61 = vmul.f32 -1.442695, %v1056_v58 }
 0x232   :  { %1568 = vpow2.f32 %v1432_v61 }
 0x235   :  { %v1051_v33 = vpop.xlane.xlu0 %1050 }
 0x236   :  { %v1057_v1 = vadd.f32 %v1519_v21, %v1051_v33 }
 0x238   :  { %v1569_v55 = vpop.eup %1568  ;;  %v1433_v6 = vmul.f32 -1.442695, %v1057_v1 }
 0x239   :  { %v1064_v7 = vadd.f32 1.0, %v1569_v55 }
 0x23a   :  { %1570 = vpow2.f32 %v1433_v6 }
 0x23b   :  { %1572 = vrcp.f32 %v1064_v7  ;;  %v1077_v62 = vand.u32 2147483648, %v1064_v7  ;;  %v1075_v2 = vand.u32 2147483647, %v1064_v7  ;;  %vm1071_vm14 = vweird.f32 %v1064_v7 }
 0x23d   :  { %v1078_v14 = vor.u32 1.1754944e-38, %v1077_v62  ;;  %vm1076_vm1 = vcmp.eq.f32.partialorder %v1075_v2, 8.507059e+37 }
 0x240   :  { %v1571_v52 = vpop.eup %1570 }
 0x241   :  { %v1573_v8 = vpop.eup %1572  ;;  %v1065_v57 = vadd.f32 1.0, %v1571_v52 }
 0x242   :  { %v1067_v11 = vmul.f32 %v1573_v8, %v1064_v7  ;;  %vm1072_vm13 = vweird.f32 %v1573_v8 }
 0x243   :  { %1574 = vrcp.f32 %v1065_v57  ;;  %vm1073_vm0 = vmor %vm1071_vm14, %vm1072_vm13  ;;  %v1092_v53 = vand.u32 2147483648, %v1065_v57  ;;  %v1090_v42 = vand.u32 2147483647, %v1065_v57  ;;  %vm1086_vm3 = vweird.f32 %v1065_v57 }
 0x244   :  { %v1068_v13 = vsub.f32 1.0, %v1067_v11 }
 0x245   :  { %v1093_v19 = vor.u32 1.1754944e-38, %v1092_v53  ;;  %vm1091_vm5 = vcmp.eq.f32.partialorder %v1090_v42, 8.507059e+37 }
 0x246   :  { %v1069_v60 = vmul.f32 %v1573_v8, %v1068_v13 }
 0x248   :  { %v1070_v41 = vadd.f32 %v1573_v8, %v1069_v60 }
 0x249   :  { %v1575_v20 = vpop.eup %1574 }
 0x24a   :  { %v1074_v34 = vsel %vm1073_vm0, %v1573_v8, %v1070_v41  ;;  %v1082_v44 = vmul.f32 %v1575_v20, %v1065_v57  ;;  %vm1087_vm2 = vweird.f32 %v1575_v20 }
 0x24b   :  { %v1079_v25 = vsel %vm1076_vm1, %v1078_v14, %v1074_v34  ;;  %vm1088_vm4 = vmor %vm1086_vm3, %vm1087_vm2 }
 0x24c   :  { %1097 = vst.msk [vmem:[%s2011_s7] sm:$0xff] %vm1096_vm15, %v1079_v25  ;;  %v1083_v63 = vsub.f32 1.0, %v1082_v44 }
 0x24e   :  { %v1084_v0 = vmul.f32 %v1575_v20, %v1083_v63 }
 0x250   :  { %v1085_v18 = vadd.f32 %v1575_v20, %v1084_v0 }
 0x252   :  { %v1089_v38 = vsel %vm1088_vm4, %v1575_v20, %v1085_v18 }
 0x253   :  { %v1094_v54 = vsel %vm1091_vm5, %v1093_v19, %v1089_v38 }
 0x254   :  { %1098 = vst.msk [vmem:[%s2011_s7 + $0x8] sm:$0xff] %vm1096_vm15, %v1094_v54 }
 0x255   :  { %1103 = vsyncpa [#allocation4], 1 }

</bundles_post_ra>
